<compile_context>
chip_gen: v6e
topology: v6e:2x2x1
jax: 0.10.0
libtpu: 0.0.40
codegen_flags: <defaults>
</compile_context>

<pallas_src>
import functools

import jax
import jax.numpy as jnp
from jax import lax
from jax.experimental import pallas as pl
from jax.experimental.pallas import tpu as pltpu


# ------------------------------ fused kernel --------------------------------


def _inverted_residual_kernel(*refs, stride, R_out, H, W, Wo, hidden,
                              has_expand, use_res):
    if has_expand:
        (x_ref, we_ref, be_ref, wd_ref, bd_ref, wp_ref, bp_ref,
         o_ref, h_ref, d_ref) = refs
    else:
        (x_ref, wd_ref, bd_ref, wp_ref, bp_ref, o_ref, h_ref, d_ref) = refs

    t = pl.program_id(1)
    r_band = (R_out - 1) * stride + 3       # input rows feeding this row tile
    start = t * (R_out * stride)            # first always-valid input row
    if (R_out * stride) % 8 == 0:
        start = pl.multiple_of(start, 8)
    base = start - 1                        # input row of band row 0 (may be -1)
    cin = x_ref.shape[3]

    # ---- stage 1: 1x1 expand conv (+BN bias + ReLU6) as ONE band matmul ----
    # Band rows 1..r_band-2 are always inside the image; band rows 0 and
    # r_band-1 may be the 3x3 zero halo (top of tile 0 / bottom of the last
    # tile) and are fixed up below, so three loads assemble the band.
    top = x_ref[0, jnp.maximum(base, 0), :, :]                       # (W, cin)
    bot = x_ref[0, jnp.minimum(base + r_band - 1, H - 1), :, :]      # (W, cin)
    core = x_ref[0, pl.ds(start, r_band - 2), :, :]        # (r_band-2, W, cin)
    slab = jnp.concatenate(
        [top, core.reshape((r_band - 2) * W, cin), bot], axis=0)

    if has_expand:
        hb = jnp.dot(slab.astype(jnp.float32), we_ref[...],
                     preferred_element_type=jnp.float32)   # MXU, M = r_band*W
        hb = jnp.clip(hb + be_ref[0, :], 0.0, 6.0)
    else:
        hb = slab.astype(jnp.float32)
    hb = hb.reshape(r_band, W, hidden)

    # No full-scratch zeroing: write the two halo columns + the band once.
    h_ref[:, 0:1, :] = jnp.zeros((r_band, 1, hidden), jnp.float32)
    h_ref[:, W + 1:W + 2, :] = jnp.zeros((r_band, 1, hidden), jnp.float32)
    h_ref[:, 1:W + 1, :] = hb

    # Out-of-image rows (at most one at the top, one at the bottom for a
    # 3x3 / pad 1 / stride {1,2} conv) must be exact zeros post-ReLU6.
    @pl.when(base < 0)
    def _():
        h_ref[0] = jnp.zeros((W + 2, hidden), jnp.float32)

    @pl.when(base + r_band - 1 >= H)
    def _():
        h_ref[r_band - 1] = jnp.zeros((W + 2, hidden), jnp.float32)

    # ---- stage 2: 3x3 depthwise conv (+BN bias + ReLU6) --------------------
    def dw_row(ro, carry):
        acc = jnp.zeros((Wo, hidden), jnp.float32)
        for ky in range(3):
            r = ro * stride + ky
            if stride == 1:
                # one aligned row load; kx shifts are slices of the value
                row = h_ref[r]                                   # (W+2, hidden)
                for kx in range(3):
                    acc = acc + row[kx:kx + W, :] * wd_ref[3 * ky + kx, :]
            else:
                # strided window reads only the Wo needed columns (halves MACs,
                # no post-hoc 0/1 selection matmul)
                for kx in range(3):
                    win = h_ref[r, pl.ds(kx, Wo, stride), :]     # (Wo, hidden)
                    acc = acc + win * wd_ref[3 * ky + kx, :]
        d_ref[ro] = jnp.clip(acc + bd_ref[0, :], 0.0, 6.0)
        return carry

    lax.fori_loop(0, R_out, dw_row, 0, unroll=True)

    # ---- stage 3: batched 1x1 projection (+BN bias [+ residual]) -----------
    d2 = d_ref[...].reshape(R_out * Wo, hidden)
    y = jnp.dot(d2, wp_ref[...], preferred_element_type=jnp.float32)
    y = y + bp_ref[0, :]
    if use_res:                      # only when stride == 1 and inp == oup
        xres = x_ref[0, pl.ds(t * R_out, R_out), :, :]           # (R_out, W, cin)
        y = y + xres.reshape(R_out * W, cin)
    # single block store for the whole row tile (see lane-dense TODO above)
    o_ref[0] = y.astype(o_ref.dtype)


# ----------------------------- pallas_call glue ------------------------------


def _round_up(v, m):
    return -(-v // m) * m


def _pick_row_tile(Ho, stride, W, hidden, oup, budget_bytes=12 * 1024 * 1024):
    """Largest divisor of Ho whose VMEM scratch/output bands fit the budget."""
    Wo = (W - 1) // stride + 1
    best = 1
    for r in range(1, Ho + 1):
        if Ho % r:
            continue
        r_band = (r - 1) * stride + 3
        lanes_h = _round_up(hidden, 128)
        h_bytes = r_band * _round_up(W + 2, 8) * lanes_h * 4
        d_bytes = r * _round_up(Wo, 8) * lanes_h * 4
        o_bytes = 2 * _round_up(r * Wo, 8) * _round_up(oup, 128) * 4
        if h_bytes + d_bytes + o_bytes <= budget_bytes:
            best = r
    return best


def inverted_residual_fused(x_nhwc, params, *, stride, has_expand, use_res):
    N, H, W, cin = x_nhwc.shape
    hidden = params["w_dw"].shape[1]
    oup = params["w_proj"].shape[1]
    Ho = (H - 1) // stride + 1
    Wo = (W - 1) // stride + 1
    R_out = _pick_row_tile(Ho, stride, W, hidden, oup)
    T = Ho // R_out
    r_band = (R_out - 1) * stride + 3

    def const_spec(arr):
        nd = arr.ndim
        return pl.BlockSpec(arr.shape, lambda n, t, _nd=nd: (0,) * _nd)

    in_specs = [pl.BlockSpec((1, H, W, cin), lambda n, t: (n, 0, 0, 0))]
    args = [x_nhwc]
    if has_expand:
        in_specs += [const_spec(params["w_exp"]), const_spec(params["b_exp"])]
        args += [params["w_exp"], params["b_exp"]]
    for k in ("w_dw", "b_dw", "w_proj", "b_proj"):
        in_specs.append(const_spec(params[k]))
        args.append(params[k])

    kern = functools.partial(
        _inverted_residual_kernel, stride=stride, R_out=R_out, H=H, W=W,
        Wo=Wo, hidden=hidden, has_expand=has_expand, use_res=use_res)

    out = pl.pallas_call(
        kern,
        grid=(N, T),
        in_specs=in_specs,
        out_specs=pl.BlockSpec((1, R_out * Wo, oup), lambda n, t: (n, t, 0)),
        out_shape=jax.ShapeDtypeStruct((N, Ho * Wo, oup), x_nhwc.dtype),
        scratch_shapes=[pltpu.VMEM((r_band, W + 2, hidden), jnp.float32),
                        pltpu.VMEM((R_out, Wo, hidden), jnp.float32)],
        compiler_params=pltpu.CompilerParams(
            dimension_semantics=("parallel", "parallel"),
            vmem_limit_bytes=48 * 1024 * 1024),
    )(*args)
    return out.reshape(N, Ho, Wo, oup)


# ------------------------------- module class --------------------------------


class InvertedResidualPallas:
    def __init__(self, inp, oup, stride, expand_ratio, key):
        assert stride in (1, 2)
        self.inp, self.oup, self.stride = inp, oup, stride
        self.expand_ratio = expand_ratio
        self.hidden = int(inp * expand_ratio)
        self.use_res_connect = (stride == 1) and (inp == oup)
        eps = 1e-5
        keys = jax.random.split(key, 16)

        def bn_params(k0, k1, k2, k3, c):
            gamma = jax.random.uniform(k0, (c,), jnp.float32, 0.5, 1.5)
            beta = 0.1 * jax.random.normal(k1, (c,), jnp.float32)
            mean = 0.1 * jax.random.normal(k2, (c,), jnp.float32)
            var = jax.random.uniform(k3, (c,), jnp.float32, 0.5, 1.5)
            scale = gamma / jnp.sqrt(var + eps)
            bias = beta - mean * scale
            return scale.reshape(1, c), bias.reshape(1, c)

        if expand_ratio != 1:
            # PyTorch weight (hidden, inp, 1, 1) stored transposed (inp, hidden)
            self.w_expand = 0.3 * jax.random.normal(
                keys[0], (inp, self.hidden), jnp.float32)
            self.s_expand, self.b_expand = bn_params(
                keys[1], keys[2], keys[3], keys[4], self.hidden)
        # PyTorch depthwise weight (hidden, 1, 3, 3) stored as (9, hidden)
        self.w_dw = 0.3 * jax.random.normal(keys[5], (9, self.hidden),
                                            jnp.float32)
        self.s_dw, self.b_dw = bn_params(keys[6], keys[7], keys[8], keys[9],
                                         self.hidden)
        # PyTorch weight (oup, hidden, 1, 1) stored transposed (hidden, oup)
        self.w_proj = 0.3 * jax.random.normal(
            keys[10], (self.hidden, oup), jnp.float32)
        self.s_proj, self.b_proj = bn_params(keys[11], keys[12], keys[13],
                                             keys[14], oup)

        # Inference-mode BN: fold the scale into the conv weights; only the
        # per-channel bias is added inside the kernel.
        params = {
            "w_dw": self.w_dw * self.s_dw,
            "b_dw": self.b_dw,
            "w_proj": self.w_proj * self.s_proj,
            "b_proj": self.b_proj,
        }
        if expand_ratio != 1:
            params["w_exp"] = self.w_expand * self.s_expand
            params["b_exp"] = self.b_expand
        self.params = params

    def __call__(self, x_nchw):
        N, C, H, W = x_nchw.shape
        assert C == self.inp
        # module-boundary glue: PyTorch NCHW -> NHWC (channels on lanes)
        x = jnp.transpose(x_nchw, (0, 2, 3, 1)).astype(jnp.float32)
        out = inverted_residual_fused(
            x, self.params, stride=self.stride,
            has_expand=(self.expand_ratio != 1),
            use_res=self.use_res_connect)
        return jnp.transpose(out, (0, 3, 1, 2))  # -> NCHW

    # plain-JAX reference (unfolded BN, HIGHEST precision) for correctness
    def reference(self, x_nchw):
        hp = lax.Precision.HIGHEST
        x = jnp.transpose(x_nchw, (0, 2, 3, 1)).astype(jnp.float32)
        h = x
        if self.expand_ratio != 1:
            h = jnp.einsum('nhwc,cd->nhwd', h, self.w_expand, precision=hp)
            h = jnp.clip(h * self.s_expand.reshape(1, 1, 1, -1)
                         + self.b_expand.reshape(1, 1, 1, -1), 0.0, 6.0)
        wdw = self.w_dw.reshape(3, 3, 1, self.hidden)
        d = jax.lax.conv_general_dilated(
            h, wdw, window_strides=(self.stride, self.stride),
            padding=((1, 1), (1, 1)),
            dimension_numbers=('NHWC', 'HWIO', 'NHWC'),
            feature_group_count=self.hidden, precision=hp)
        d = jnp.clip(d * self.s_dw.reshape(1, 1, 1, -1)
                     + self.b_dw.reshape(1, 1, 1, -1), 0.0, 6.0)
        out = jnp.einsum('nhwc,cd->nhwd', d, self.w_proj, precision=hp)
        out = out * self.s_proj.reshape(1, 1, 1, -1) \
            + self.b_proj.reshape(1, 1, 1, -1)
        if self.use_res_connect:
            out = out + x
        return jnp.transpose(out, (0, 3, 1, 2))


# ---------------------------------- main -------------------------------------

if __name__ == "__main__":
    key = jax.random.PRNGKey(0)
    kx, kp1, kp2, kp3 = jax.random.split(key, 4)
    x = jax.random.normal(kx, (2, 8, 16, 16), jnp.float32)  # NCHW like PyTorch

    configs = [
        dict(inp=8, oup=8, stride=1, expand_ratio=6),    # residual path
        dict(inp=8, oup=16, stride=2, expand_ratio=6),   # strided, no residual
        dict(inp=8, oup=16, stride=1, expand_ratio=1),   # expand_ratio == 1
    ]
    for cfg, kp in zip(configs, (kp1, kp2, kp3)):
        mod = InvertedResidualPallas(key=kp, **cfg)
        out = jax.block_until_ready(mod(x))
        ref = jax.block_until_ready(mod.reference(x))
        if out.shape != ref.shape or not bool(
                jnp.allclose(out, ref, atol=5e-3, rtol=5e-3)):
            raise SystemExit(
                f"mismatch for config {cfg}: "
                f"max err {float(jnp.max(jnp.abs(out - ref)))}")
    print("KERNEL_OK")
</pallas_src>

<mosaic_0001>
module attributes {stable_mosaic.version = 11 : i64} {
  func.func @_inverted_residual_kernel(%arg0: i32, %arg1: i32, %arg2: memref<1x16x16x8xf32, #tpu.memory_space<vmem>>, %arg3: memref<8x48xf32, #tpu.memory_space<vmem>>, %arg4: memref<1x48xf32, #tpu.memory_space<vmem>>, %arg5: memref<9x48xf32, #tpu.memory_space<vmem>>, %arg6: memref<1x48xf32, #tpu.memory_space<vmem>>, %arg7: memref<48x8xf32, #tpu.memory_space<vmem>>, %arg8: memref<1x8xf32, #tpu.memory_space<vmem>>, %arg9: memref<1x256x8xf32, #tpu.memory_space<vmem>>, %arg10: memref<18x18x48xf32, #tpu.memory_space<vmem>>, %arg11: memref<16x16x48xf32, #tpu.memory_space<vmem>>) attributes {dimension_semantics = [#tpu.dimension_semantics<parallel>, #tpu.dimension_semantics<parallel>], iteration_bounds = array<i64: 2, 1>, scalar_prefetch = 0 : i64, scratch_operands = 2 : i64, tpu.core_type = #tpu.core_type<tc>, window_params = [{transform_indices = @transform_0, window_bounds = array<i64: 1, 16, 16, 8>}, {pipeline_mode = #tpu.pipeline_mode<synchronous>, transform_indices = @transform_1, window_bounds = array<i64: 8, 48>}, {pipeline_mode = #tpu.pipeline_mode<synchronous>, transform_indices = @transform_2, window_bounds = array<i64: 1, 48>}, {pipeline_mode = #tpu.pipeline_mode<synchronous>, transform_indices = @transform_3, window_bounds = array<i64: 9, 48>}, {pipeline_mode = #tpu.pipeline_mode<synchronous>, transform_indices = @transform_4, window_bounds = array<i64: 1, 48>}, {pipeline_mode = #tpu.pipeline_mode<synchronous>, transform_indices = @transform_5, window_bounds = array<i64: 48, 8>}, {pipeline_mode = #tpu.pipeline_mode<synchronous>, transform_indices = @transform_6, window_bounds = array<i64: 1, 8>}, {transform_indices = @transform_7, window_bounds = array<i64: 1, 256, 8>}]} {
    %c16_i32 = arith.constant 16 : i32
    %0 = arith.muli %arg1, %c16_i32 : i32
    %1 = tpu.assume_multiple %0, 8 : i32
    %c1_i32 = arith.constant 1 : i32
    %2 = arith.subi %1, %c1_i32 : i32
    %c0_i32 = arith.constant 0 : i32
    %3 = arith.maxsi %2, %c0_i32 : i32
    %c0 = arith.constant 0 : index
    %4 = arith.index_cast %3 : i32 to index
    %c0_0 = arith.constant 0 : index
    %c0_1 = arith.constant 0 : index
    %5 = vector.load %arg2[%c0, %4, %c0_0, %c0_1] : memref<1x16x16x8xf32, #tpu.memory_space<vmem>>, vector<1x1x16x8xf32>
    %6 = vector.shape_cast %5 : vector<1x1x16x8xf32> to vector<16x8xf32>
    %c18_i32 = arith.constant 18 : i32
    %7 = arith.addi %2, %c18_i32 : i32
    %c1_i32_2 = arith.constant 1 : i32
    %8 = arith.subi %7, %c1_i32_2 : i32
    %c15_i32 = arith.constant 15 : i32
    %9 = arith.minsi %8, %c15_i32 : i32
    %c0_3 = arith.constant 0 : index
    %10 = arith.index_cast %9 : i32 to index
    %c0_4 = arith.constant 0 : index
    %c0_5 = arith.constant 0 : index
    %11 = vector.load %arg2[%c0_3, %10, %c0_4, %c0_5] : memref<1x16x16x8xf32, #tpu.memory_space<vmem>>, vector<1x1x16x8xf32>
    %12 = vector.shape_cast %11 : vector<1x1x16x8xf32> to vector<16x8xf32>
    %c0_6 = arith.constant 0 : index
    %13 = arith.index_cast %1 : i32 to index
    %c0_7 = arith.constant 0 : index
    %c0_8 = arith.constant 0 : index
    %14 = vector.load %arg2[%c0_6, %13, %c0_7, %c0_8] : memref<1x16x16x8xf32, #tpu.memory_space<vmem>>, vector<1x16x16x8xf32>
    %15 = vector.shape_cast %14 : vector<1x16x16x8xf32> to vector<16x16x8xf32>
    %16 = vector.shape_cast %15 : vector<16x16x8xf32> to vector<256x8xf32>
    %17 = tpu.concatenate %6, %16, %12 in 0 : vector<16x8xf32>, vector<256x8xf32>, vector<16x8xf32> -> vector<288x8xf32>
    %c0_9 = arith.constant 0 : index
    %c0_10 = arith.constant 0 : index
    %18 = vector.load %arg3[%c0_9, %c0_10] : memref<8x48xf32, #tpu.memory_space<vmem>>, vector<8x48xf32>
    %cst = arith.constant dense<0.000000e+00> : vector<288x48xf32>
    %19 = tpu.matmul %17, %18, %cst {dimension_numbers = #tpu.dot_dimension_numbers<[1], [0], [0], [1], [0, 0, 1, 1], [], []>} : vector<288x8xf32>, vector<8x48xf32>, vector<288x48xf32> -> vector<288x48xf32>
    %c0_11 = arith.constant 0 : index
    %c0_12 = arith.constant 0 : index
    %20 = vector.load %arg4[%c0_11, %c0_12] : memref<1x48xf32, #tpu.memory_space<vmem>>, vector<1x48xf32>
    %21 = vector.shape_cast %20 : vector<1x48xf32> to vector<48xf32>
    %22 = vector.shape_cast %21 : vector<48xf32> to vector<1x48xf32>
    %23 = vector.broadcast %22 : vector<1x48xf32> to vector<288x48xf32>
    %24 = arith.addf %19, %23 : vector<288x48xf32>
    %cst_13 = arith.constant 0.000000e+00 : f32
    %cst_14 = arith.constant 6.000000e+00 : f32
    %25 = vector.broadcast %cst_13 : f32 to vector<288x48xf32>
    %26 = arith.maximumf %25, %24 : vector<288x48xf32>
    %27 = vector.broadcast %cst_14 : f32 to vector<288x48xf32>
    %28 = arith.minimumf %27, %26 : vector<288x48xf32>
    %29 = vector.shape_cast %28 : vector<288x48xf32> to vector<18x16x48xf32>
    %cst_15 = arith.constant 0.000000e+00 : f32
    %30 = vector.broadcast %cst_15 : f32 to vector<18x1x48xf32>
    %c0_16 = arith.constant 0 : index
    %c0_17 = arith.constant 0 : index
    %c0_18 = arith.constant 0 : index
    %31 = vector.load %arg10[%c0_16, %c0_17, %c0_18] : memref<18x18x48xf32, #tpu.memory_space<vmem>>, vector<18x1x48xf32>
    tpu.vector_store %arg10[%c0_16, %c0_17, %c0_18], %30 {strides = array<i32>} : memref<18x18x48xf32, #tpu.memory_space<vmem>>, vector<18x1x48xf32>,
    %cst_19 = arith.constant 0.000000e+00 : f32
    %32 = vector.broadcast %cst_19 : f32 to vector<18x1x48xf32>
    %c0_20 = arith.constant 0 : index
    %c17 = arith.constant 17 : index
    %c0_21 = arith.constant 0 : index
    %33 = vector.load %arg10[%c0_20, %c17, %c0_21] : memref<18x18x48xf32, #tpu.memory_space<vmem>>, vector<18x1x48xf32>
    tpu.vector_store %arg10[%c0_20, %c17, %c0_21], %32 {strides = array<i32>} : memref<18x18x48xf32, #tpu.memory_space<vmem>>, vector<18x1x48xf32>,
    %c0_22 = arith.constant 0 : index
    %c1 = arith.constant 1 : index
    %c0_23 = arith.constant 0 : index
    %34 = vector.load %arg10[%c0_22, %c1, %c0_23] : memref<18x18x48xf32, #tpu.memory_space<vmem>>, vector<18x16x48xf32>
    tpu.vector_store %arg10[%c0_22, %c1, %c0_23], %29 {strides = array<i32>} : memref<18x18x48xf32, #tpu.memory_space<vmem>>, vector<18x16x48xf32>,
    %c0_i32_24 = arith.constant 0 : i32
    %35 = arith.cmpi slt, %2, %c0_i32_24 : i32
    %36 = arith.extui %35 : i1 to i32
    %c0_i32_25 = arith.constant 0 : i32
    %37 = arith.cmpi ne, %36, %c0_i32_25 : i32
    scf.if %37 {
      %cst_634 = arith.constant 0.000000e+00 : f32
      %1533 = vector.broadcast %cst_634 : f32 to vector<18x48xf32>
      %c0_635 = arith.constant 0 : index
      %c0_636 = arith.constant 0 : index
      %c0_637 = arith.constant 0 : index
      %1534 = vector.load %arg10[%c0_635, %c0_636, %c0_637] : memref<18x18x48xf32, #tpu.memory_space<vmem>>, vector<1x18x48xf32>
      %1535 = vector.shape_cast %1534 : vector<1x18x48xf32> to vector<18x48xf32>
      %1536 = vector.shape_cast %1533 : vector<18x48xf32> to vector<1x18x48xf32>
      tpu.vector_store %arg10[%c0_635, %c0_636, %c0_637], %1536 {strides = array<i32>} : memref<18x18x48xf32, #tpu.memory_space<vmem>>, vector<1x18x48xf32>,
    } else {
    }
    %c18_i32_26 = arith.constant 18 : i32
    %38 = arith.addi %2, %c18_i32_26 : i32
    %c1_i32_27 = arith.constant 1 : i32
    %39 = arith.subi %38, %c1_i32_27 : i32
    %c16_i32_28 = arith.constant 16 : i32
    %40 = arith.cmpi sge, %39, %c16_i32_28 : i32
    %41 = arith.extui %40 : i1 to i32
    %c0_i32_29 = arith.constant 0 : i32
    %42 = arith.cmpi ne, %41, %c0_i32_29 : i32
    scf.if %42 {
      %cst_634 = arith.constant 0.000000e+00 : f32
      %1533 = vector.broadcast %cst_634 : f32 to vector<18x48xf32>
      %c17_635 = arith.constant 17 : index
      %c0_636 = arith.constant 0 : index
      %c0_637 = arith.constant 0 : index
      %1534 = vector.load %arg10[%c17_635, %c0_636, %c0_637] : memref<18x18x48xf32, #tpu.memory_space<vmem>>, vector<1x18x48xf32>
      %1535 = vector.shape_cast %1534 : vector<1x18x48xf32> to vector<18x48xf32>
      %1536 = vector.shape_cast %1533 : vector<18x48xf32> to vector<1x18x48xf32>
      tpu.vector_store %arg10[%c17_635, %c0_636, %c0_637], %1536 {strides = array<i32>} : memref<18x18x48xf32, #tpu.memory_space<vmem>>, vector<1x18x48xf32>,
    } else {
    }
    %c0_i32_30 = arith.constant 0 : i32
    %cst_31 = arith.constant 0.000000e+00 : f32
    %43 = vector.broadcast %cst_31 : f32 to vector<16x48xf32>
    %c1_i32_32 = arith.constant 1 : i32
    %44 = arith.muli %c0_i32_30, %c1_i32_32 : i32
    %c0_i32_33 = arith.constant 0 : i32
    %45 = arith.addi %44, %c0_i32_33 : i32
    %46 = arith.index_cast %45 : i32 to index
    %c0_34 = arith.constant 0 : index
    %c0_35 = arith.constant 0 : index
    %47 = vector.load %arg10[%46, %c0_34, %c0_35] : memref<18x18x48xf32, #tpu.memory_space<vmem>>, vector<1x18x48xf32>
    %48 = vector.shape_cast %47 : vector<1x18x48xf32> to vector<18x48xf32>
    %49 = vector.extract_strided_slice %48 {offsets = [0, 0], sizes = [16, 48], strides = [1, 1]} : vector<18x48xf32> to vector<16x48xf32>
    %c0_36 = arith.constant 0 : index
    %c0_37 = arith.constant 0 : index
    %50 = vector.load %arg5[%c0_36, %c0_37] : memref<9x48xf32, #tpu.memory_space<vmem>>, vector<1x48xf32>
    %51 = vector.shape_cast %50 : vector<1x48xf32> to vector<48xf32>
    %52 = vector.shape_cast %51 : vector<48xf32> to vector<1x48xf32>
    %53 = vector.broadcast %52 : vector<1x48xf32> to vector<16x48xf32>
    %54 = arith.mulf %49, %53 : vector<16x48xf32>
    %55 = arith.addf %43, %54 : vector<16x48xf32>
    %56 = vector.extract_strided_slice %48 {offsets = [1, 0], sizes = [16, 48], strides = [1, 1]} : vector<18x48xf32> to vector<16x48xf32>
    %c1_38 = arith.constant 1 : index
    %c0_39 = arith.constant 0 : index
    %57 = vector.load %arg5[%c1_38, %c0_39] : memref<9x48xf32, #tpu.memory_space<vmem>>, vector<1x48xf32>
    %58 = vector.shape_cast %57 : vector<1x48xf32> to vector<48xf32>
    %59 = vector.shape_cast %58 : vector<48xf32> to vector<1x48xf32>
    %60 = vector.broadcast %59 : vector<1x48xf32> to vector<16x48xf32>
    %61 = arith.mulf %56, %60 : vector<16x48xf32>
    %62 = arith.addf %55, %61 : vector<16x48xf32>
    %63 = vector.extract_strided_slice %48 {offsets = [2, 0], sizes = [16, 48], strides = [1, 1]} : vector<18x48xf32> to vector<16x48xf32>
    %c2 = arith.constant 2 : index
    %c0_40 = arith.constant 0 : index
    %64 = vector.load %arg5[%c2, %c0_40] : memref<9x48xf32, #tpu.memory_space<vmem>>, vector<1x48xf32>
    %65 = vector.shape_cast %64 : vector<1x48xf32> to vector<48xf32>
    %66 = vector.shape_cast %65 : vector<48xf32> to vector<1x48xf32>
    %67 = vector.broadcast %66 : vector<1x48xf32> to vector<16x48xf32>
    %68 = arith.mulf %63, %67 : vector<16x48xf32>
    %69 = arith.addf %62, %68 : vector<16x48xf32>
    %c1_i32_41 = arith.constant 1 : i32
    %70 = arith.muli %c0_i32_30, %c1_i32_41 : i32
    %c1_i32_42 = arith.constant 1 : i32
    %71 = arith.addi %70, %c1_i32_42 : i32
    %72 = arith.index_cast %71 : i32 to index
    %c0_43 = arith.constant 0 : index
    %c0_44 = arith.constant 0 : index
    %73 = vector.load %arg10[%72, %c0_43, %c0_44] : memref<18x18x48xf32, #tpu.memory_space<vmem>>, vector<1x18x48xf32>
    %74 = vector.shape_cast %73 : vector<1x18x48xf32> to vector<18x48xf32>
    %75 = vector.extract_strided_slice %74 {offsets = [0, 0], sizes = [16, 48], strides = [1, 1]} : vector<18x48xf32> to vector<16x48xf32>
    %c3 = arith.constant 3 : index
    %c0_45 = arith.constant 0 : index
    %76 = vector.load %arg5[%c3, %c0_45] : memref<9x48xf32, #tpu.memory_space<vmem>>, vector<1x48xf32>
    %77 = vector.shape_cast %76 : vector<1x48xf32> to vector<48xf32>
    %78 = vector.shape_cast %77 : vector<48xf32> to vector<1x48xf32>
    %79 = vector.broadcast %78 : vector<1x48xf32> to vector<16x48xf32>
    %80 = arith.mulf %75, %79 : vector<16x48xf32>
    %81 = arith.addf %69, %80 : vector<16x48xf32>
    %82 = vector.extract_strided_slice %74 {offsets = [1, 0], sizes = [16, 48], strides = [1, 1]} : vector<18x48xf32> to vector<16x48xf32>
    %c4 = arith.constant 4 : index
    %c0_46 = arith.constant 0 : index
    %83 = vector.load %arg5[%c4, %c0_46] : memref<9x48xf32, #tpu.memory_space<vmem>>, vector<1x48xf32>
    %84 = vector.shape_cast %83 : vector<1x48xf32> to vector<48xf32>
    %85 = vector.shape_cast %84 : vector<48xf32> to vector<1x48xf32>
    %86 = vector.broadcast %85 : vector<1x48xf32> to vector<16x48xf32>
    %87 = arith.mulf %82, %86 : vector<16x48xf32>
    %88 = arith.addf %81, %87 : vector<16x48xf32>
    %89 = vector.extract_strided_slice %74 {offsets = [2, 0], sizes = [16, 48], strides = [1, 1]} : vector<18x48xf32> to vector<16x48xf32>
    %c5 = arith.constant 5 : index
    %c0_47 = arith.constant 0 : index
    %90 = vector.load %arg5[%c5, %c0_47] : memref<9x48xf32, #tpu.memory_space<vmem>>, vector<1x48xf32>
    %91 = vector.shape_cast %90 : vector<1x48xf32> to vector<48xf32>
    %92 = vector.shape_cast %91 : vector<48xf32> to vector<1x48xf32>
    %93 = vector.broadcast %92 : vector<1x48xf32> to vector<16x48xf32>
    %94 = arith.mulf %89, %93 : vector<16x48xf32>
    %95 = arith.addf %88, %94 : vector<16x48xf32>
    %c1_i32_48 = arith.constant 1 : i32
    %96 = arith.muli %c0_i32_30, %c1_i32_48 : i32
    %c2_i32 = arith.constant 2 : i32
    %97 = arith.addi %96, %c2_i32 : i32
    %98 = arith.index_cast %97 : i32 to index
    %c0_49 = arith.constant 0 : index
    %c0_50 = arith.constant 0 : index
    %99 = vector.load %arg10[%98, %c0_49, %c0_50] : memref<18x18x48xf32, #tpu.memory_space<vmem>>, vector<1x18x48xf32>
    %100 = vector.shape_cast %99 : vector<1x18x48xf32> to vector<18x48xf32>
    %101 = vector.extract_strided_slice %100 {offsets = [0, 0], sizes = [16, 48], strides = [1, 1]} : vector<18x48xf32> to vector<16x48xf32>
    %c6 = arith.constant 6 : index
    %c0_51 = arith.constant 0 : index
    %102 = vector.load %arg5[%c6, %c0_51] : memref<9x48xf32, #tpu.memory_space<vmem>>, vector<1x48xf32>
    %103 = vector.shape_cast %102 : vector<1x48xf32> to vector<48xf32>
    %104 = vector.shape_cast %103 : vector<48xf32> to vector<1x48xf32>
    %105 = vector.broadcast %104 : vector<1x48xf32> to vector<16x48xf32>
    %106 = arith.mulf %101, %105 : vector<16x48xf32>
    %107 = arith.addf %95, %106 : vector<16x48xf32>
    %108 = vector.extract_strided_slice %100 {offsets = [1, 0], sizes = [16, 48], strides = [1, 1]} : vector<18x48xf32> to vector<16x48xf32>
    %c7 = arith.constant 7 : index
    %c0_52 = arith.constant 0 : index
    %109 = vector.load %arg5[%c7, %c0_52] : memref<9x48xf32, #tpu.memory_space<vmem>>, vector<1x48xf32>
    %110 = vector.shape_cast %109 : vector<1x48xf32> to vector<48xf32>
    %111 = vector.shape_cast %110 : vector<48xf32> to vector<1x48xf32>
    %112 = vector.broadcast %111 : vector<1x48xf32> to vector<16x48xf32>
    %113 = arith.mulf %108, %112 : vector<16x48xf32>
    %114 = arith.addf %107, %113 : vector<16x48xf32>
    %115 = vector.extract_strided_slice %100 {offsets = [2, 0], sizes = [16, 48], strides = [1, 1]} : vector<18x48xf32> to vector<16x48xf32>
    %c8 = arith.constant 8 : index
    %c0_53 = arith.constant 0 : index
    %116 = vector.load %arg5[%c8, %c0_53] : memref<9x48xf32, #tpu.memory_space<vmem>>, vector<1x48xf32>
    %117 = vector.shape_cast %116 : vector<1x48xf32> to vector<48xf32>
    %118 = vector.shape_cast %117 : vector<48xf32> to vector<1x48xf32>
    %119 = vector.broadcast %118 : vector<1x48xf32> to vector<16x48xf32>
    %120 = arith.mulf %115, %119 : vector<16x48xf32>
    %121 = arith.addf %114, %120 : vector<16x48xf32>
    %c0_54 = arith.constant 0 : index
    %c0_55 = arith.constant 0 : index
    %122 = vector.load %arg6[%c0_54, %c0_55] : memref<1x48xf32, #tpu.memory_space<vmem>>, vector<1x48xf32>
    %123 = vector.shape_cast %122 : vector<1x48xf32> to vector<48xf32>
    %124 = vector.shape_cast %123 : vector<48xf32> to vector<1x48xf32>
    %125 = vector.broadcast %124 : vector<1x48xf32> to vector<16x48xf32>
    %126 = arith.addf %121, %125 : vector<16x48xf32>
    %cst_56 = arith.constant 0.000000e+00 : f32
    %cst_57 = arith.constant 6.000000e+00 : f32
    %127 = vector.broadcast %cst_56 : f32 to vector<16x48xf32>
    %128 = arith.maximumf %127, %126 : vector<16x48xf32>
    %129 = vector.broadcast %cst_57 : f32 to vector<16x48xf32>
    %130 = arith.minimumf %129, %128 : vector<16x48xf32>
    %131 = arith.index_cast %c0_i32_30 : i32 to index
    %c0_58 = arith.constant 0 : index
    %c0_59 = arith.constant 0 : index
    %132 = vector.load %arg11[%131, %c0_58, %c0_59] : memref<16x16x48xf32, #tpu.memory_space<vmem>>, vector<1x16x48xf32>
    %133 = vector.shape_cast %132 : vector<1x16x48xf32> to vector<16x48xf32>
    %134 = vector.shape_cast %130 : vector<16x48xf32> to vector<1x16x48xf32>
    tpu.vector_store %arg11[%131, %c0_58, %c0_59], %134 {strides = array<i32>} : memref<16x16x48xf32, #tpu.memory_space<vmem>>, vector<1x16x48xf32>,
    %c1_i32_60 = arith.constant 1 : i32
    %cst_61 = arith.constant 0.000000e+00 : f32
    %135 = vector.broadcast %cst_61 : f32 to vector<16x48xf32>
    %c1_i32_62 = arith.constant 1 : i32
    %136 = arith.muli %c1_i32_60, %c1_i32_62 : i32
    %c0_i32_63 = arith.constant 0 : i32
    %137 = arith.addi %136, %c0_i32_63 : i32
    %138 = arith.index_cast %137 : i32 to index
    %c0_64 = arith.constant 0 : index
    %c0_65 = arith.constant 0 : index
    %139 = vector.load %arg10[%138, %c0_64, %c0_65] : memref<18x18x48xf32, #tpu.memory_space<vmem>>, vector<1x18x48xf32>
    %140 = vector.shape_cast %139 : vector<1x18x48xf32> to vector<18x48xf32>
    %141 = vector.extract_strided_slice %140 {offsets = [0, 0], sizes = [16, 48], strides = [1, 1]} : vector<18x48xf32> to vector<16x48xf32>
    %c0_66 = arith.constant 0 : index
    %c0_67 = arith.constant 0 : index
    %142 = vector.load %arg5[%c0_66, %c0_67] : memref<9x48xf32, #tpu.memory_space<vmem>>, vector<1x48xf32>
    %143 = vector.shape_cast %142 : vector<1x48xf32> to vector<48xf32>
    %144 = vector.shape_cast %143 : vector<48xf32> to vector<1x48xf32>
    %145 = vector.broadcast %144 : vector<1x48xf32> to vector<16x48xf32>
    %146 = arith.mulf %141, %145 : vector<16x48xf32>
    %147 = arith.addf %135, %146 : vector<16x48xf32>
    %148 = vector.extract_strided_slice %140 {offsets = [1, 0], sizes = [16, 48], strides = [1, 1]} : vector<18x48xf32> to vector<16x48xf32>
    %c1_68 = arith.constant 1 : index
    %c0_69 = arith.constant 0 : index
    %149 = vector.load %arg5[%c1_68, %c0_69] : memref<9x48xf32, #tpu.memory_space<vmem>>, vector<1x48xf32>
    %150 = vector.shape_cast %149 : vector<1x48xf32> to vector<48xf32>
    %151 = vector.shape_cast %150 : vector<48xf32> to vector<1x48xf32>
    %152 = vector.broadcast %151 : vector<1x48xf32> to vector<16x48xf32>
    %153 = arith.mulf %148, %152 : vector<16x48xf32>
    %154 = arith.addf %147, %153 : vector<16x48xf32>
    %155 = vector.extract_strided_slice %140 {offsets = [2, 0], sizes = [16, 48], strides = [1, 1]} : vector<18x48xf32> to vector<16x48xf32>
    %c2_70 = arith.constant 2 : index
    %c0_71 = arith.constant 0 : index
    %156 = vector.load %arg5[%c2_70, %c0_71] : memref<9x48xf32, #tpu.memory_space<vmem>>, vector<1x48xf32>
    %157 = vector.shape_cast %156 : vector<1x48xf32> to vector<48xf32>
    %158 = vector.shape_cast %157 : vector<48xf32> to vector<1x48xf32>
    %159 = vector.broadcast %158 : vector<1x48xf32> to vector<16x48xf32>
    %160 = arith.mulf %155, %159 : vector<16x48xf32>
    %161 = arith.addf %154, %160 : vector<16x48xf32>
    %c1_i32_72 = arith.constant 1 : i32
    %162 = arith.muli %c1_i32_60, %c1_i32_72 : i32
    %c1_i32_73 = arith.constant 1 : i32
    %163 = arith.addi %162, %c1_i32_73 : i32
    %164 = arith.index_cast %163 : i32 to index
    %c0_74 = arith.constant 0 : index
    %c0_75 = arith.constant 0 : index
    %165 = vector.load %arg10[%164, %c0_74, %c0_75] : memref<18x18x48xf32, #tpu.memory_space<vmem>>, vector<1x18x48xf32>
    %166 = vector.shape_cast %165 : vector<1x18x48xf32> to vector<18x48xf32>
    %167 = vector.extract_strided_slice %166 {offsets = [0, 0], sizes = [16, 48], strides = [1, 1]} : vector<18x48xf32> to vector<16x48xf32>
    %c3_76 = arith.constant 3 : index
    %c0_77 = arith.constant 0 : index
    %168 = vector.load %arg5[%c3_76, %c0_77] : memref<9x48xf32, #tpu.memory_space<vmem>>, vector<1x48xf32>
    %169 = vector.shape_cast %168 : vector<1x48xf32> to vector<48xf32>
    %170 = vector.shape_cast %169 : vector<48xf32> to vector<1x48xf32>
    %171 = vector.broadcast %170 : vector<1x48xf32> to vector<16x48xf32>
    %172 = arith.mulf %167, %171 : vector<16x48xf32>
    %173 = arith.addf %161, %172 : vector<16x48xf32>
    %174 = vector.extract_strided_slice %166 {offsets = [1, 0], sizes = [16, 48], strides = [1, 1]} : vector<18x48xf32> to vector<16x48xf32>
    %c4_78 = arith.constant 4 : index
    %c0_79 = arith.constant 0 : index
    %175 = vector.load %arg5[%c4_78, %c0_79] : memref<9x48xf32, #tpu.memory_space<vmem>>, vector<1x48xf32>
    %176 = vector.shape_cast %175 : vector<1x48xf32> to vector<48xf32>
    %177 = vector.shape_cast %176 : vector<48xf32> to vector<1x48xf32>
    %178 = vector.broadcast %177 : vector<1x48xf32> to vector<16x48xf32>
    %179 = arith.mulf %174, %178 : vector<16x48xf32>
    %180 = arith.addf %173, %179 : vector<16x48xf32>
    %181 = vector.extract_strided_slice %166 {offsets = [2, 0], sizes = [16, 48], strides = [1, 1]} : vector<18x48xf32> to vector<16x48xf32>
    %c5_80 = arith.constant 5 : index
    %c0_81 = arith.constant 0 : index
    %182 = vector.load %arg5[%c5_80, %c0_81] : memref<9x48xf32, #tpu.memory_space<vmem>>, vector<1x48xf32>
    %183 = vector.shape_cast %182 : vector<1x48xf32> to vector<48xf32>
    %184 = vector.shape_cast %183 : vector<48xf32> to vector<1x48xf32>
    %185 = vector.broadcast %184 : vector<1x48xf32> to vector<16x48xf32>
    %186 = arith.mulf %181, %185 : vector<16x48xf32>
    %187 = arith.addf %180, %186 : vector<16x48xf32>
    %c1_i32_82 = arith.constant 1 : i32
    %188 = arith.muli %c1_i32_60, %c1_i32_82 : i32
    %c2_i32_83 = arith.constant 2 : i32
    %189 = arith.addi %188, %c2_i32_83 : i32
    %190 = arith.index_cast %189 : i32 to index
    %c0_84 = arith.constant 0 : index
    %c0_85 = arith.constant 0 : index
    %191 = vector.load %arg10[%190, %c0_84, %c0_85] : memref<18x18x48xf32, #tpu.memory_space<vmem>>, vector<1x18x48xf32>
    %192 = vector.shape_cast %191 : vector<1x18x48xf32> to vector<18x48xf32>
    %193 = vector.extract_strided_slice %192 {offsets = [0, 0], sizes = [16, 48], strides = [1, 1]} : vector<18x48xf32> to vector<16x48xf32>
    %c6_86 = arith.constant 6 : index
    %c0_87 = arith.constant 0 : index
    %194 = vector.load %arg5[%c6_86, %c0_87] : memref<9x48xf32, #tpu.memory_space<vmem>>, vector<1x48xf32>
    %195 = vector.shape_cast %194 : vector<1x48xf32> to vector<48xf32>
    %196 = vector.shape_cast %195 : vector<48xf32> to vector<1x48xf32>
    %197 = vector.broadcast %196 : vector<1x48xf32> to vector<16x48xf32>
    %198 = arith.mulf %193, %197 : vector<16x48xf32>
    %199 = arith.addf %187, %198 : vector<16x48xf32>
    %200 = vector.extract_strided_slice %192 {offsets = [1, 0], sizes = [16, 48], strides = [1, 1]} : vector<18x48xf32> to vector<16x48xf32>
    %c7_88 = arith.constant 7 : index
    %c0_89 = arith.constant 0 : index
    %201 = vector.load %arg5[%c7_88, %c0_89] : memref<9x48xf32, #tpu.memory_space<vmem>>, vector<1x48xf32>
    %202 = vector.shape_cast %201 : vector<1x48xf32> to vector<48xf32>
    %203 = vector.shape_cast %202 : vector<48xf32> to vector<1x48xf32>
    %204 = vector.broadcast %203 : vector<1x48xf32> to vector<16x48xf32>
    %205 = arith.mulf %200, %204 : vector<16x48xf32>
    %206 = arith.addf %199, %205 : vector<16x48xf32>
    %207 = vector.extract_strided_slice %192 {offsets = [2, 0], sizes = [16, 48], strides = [1, 1]} : vector<18x48xf32> to vector<16x48xf32>
    %c8_90 = arith.constant 8 : index
    %c0_91 = arith.constant 0 : index
    %208 = vector.load %arg5[%c8_90, %c0_91] : memref<9x48xf32, #tpu.memory_space<vmem>>, vector<1x48xf32>
    %209 = vector.shape_cast %208 : vector<1x48xf32> to vector<48xf32>
    %210 = vector.shape_cast %209 : vector<48xf32> to vector<1x48xf32>
    %211 = vector.broadcast %210 : vector<1x48xf32> to vector<16x48xf32>
    %212 = arith.mulf %207, %211 : vector<16x48xf32>
    %213 = arith.addf %206, %212 : vector<16x48xf32>
    %c0_92 = arith.constant 0 : index
    %c0_93 = arith.constant 0 : index
    %214 = vector.load %arg6[%c0_92, %c0_93] : memref<1x48xf32, #tpu.memory_space<vmem>>, vector<1x48xf32>
    %215 = vector.shape_cast %214 : vector<1x48xf32> to vector<48xf32>
    %216 = vector.shape_cast %215 : vector<48xf32> to vector<1x48xf32>
    %217 = vector.broadcast %216 : vector<1x48xf32> to vector<16x48xf32>
    %218 = arith.addf %213, %217 : vector<16x48xf32>
    %cst_94 = arith.constant 0.000000e+00 : f32
    %cst_95 = arith.constant 6.000000e+00 : f32
    %219 = vector.broadcast %cst_94 : f32 to vector<16x48xf32>
    %220 = arith.maximumf %219, %218 : vector<16x48xf32>
    %221 = vector.broadcast %cst_95 : f32 to vector<16x48xf32>
    %222 = arith.minimumf %221, %220 : vector<16x48xf32>
    %223 = arith.index_cast %c1_i32_60 : i32 to index
    %c0_96 = arith.constant 0 : index
    %c0_97 = arith.constant 0 : index
    %224 = vector.load %arg11[%223, %c0_96, %c0_97] : memref<16x16x48xf32, #tpu.memory_space<vmem>>, vector<1x16x48xf32>
    %225 = vector.shape_cast %224 : vector<1x16x48xf32> to vector<16x48xf32>
    %226 = vector.shape_cast %222 : vector<16x48xf32> to vector<1x16x48xf32>
    tpu.vector_store %arg11[%223, %c0_96, %c0_97], %226 {strides = array<i32>} : memref<16x16x48xf32, #tpu.memory_space<vmem>>, vector<1x16x48xf32>,
    %c2_i32_98 = arith.constant 2 : i32
    %cst_99 = arith.constant 0.000000e+00 : f32
    %227 = vector.broadcast %cst_99 : f32 to vector<16x48xf32>
    %c1_i32_100 = arith.constant 1 : i32
    %228 = arith.muli %c2_i32_98, %c1_i32_100 : i32
    %c0_i32_101 = arith.constant 0 : i32
    %229 = arith.addi %228, %c0_i32_101 : i32
    %230 = arith.index_cast %229 : i32 to index
    %c0_102 = arith.constant 0 : index
    %c0_103 = arith.constant 0 : index
    %231 = vector.load %arg10[%230, %c0_102, %c0_103] : memref<18x18x48xf32, #tpu.memory_space<vmem>>, vector<1x18x48xf32>
    %232 = vector.shape_cast %231 : vector<1x18x48xf32> to vector<18x48xf32>
    %233 = vector.extract_strided_slice %232 {offsets = [0, 0], sizes = [16, 48], strides = [1, 1]} : vector<18x48xf32> to vector<16x48xf32>
    %c0_104 = arith.constant 0 : index
    %c0_105 = arith.constant 0 : index
    %234 = vector.load %arg5[%c0_104, %c0_105] : memref<9x48xf32, #tpu.memory_space<vmem>>, vector<1x48xf32>
    %235 = vector.shape_cast %234 : vector<1x48xf32> to vector<48xf32>
    %236 = vector.shape_cast %235 : vector<48xf32> to vector<1x48xf32>
    %237 = vector.broadcast %236 : vector<1x48xf32> to vector<16x48xf32>
    %238 = arith.mulf %233, %237 : vector<16x48xf32>
    %239 = arith.addf %227, %238 : vector<16x48xf32>
    %240 = vector.extract_strided_slice %232 {offsets = [1, 0], sizes = [16, 48], strides = [1, 1]} : vector<18x48xf32> to vector<16x48xf32>
    %c1_106 = arith.constant 1 : index
    %c0_107 = arith.constant 0 : index
    %241 = vector.load %arg5[%c1_106, %c0_107] : memref<9x48xf32, #tpu.memory_space<vmem>>, vector<1x48xf32>
    %242 = vector.shape_cast %241 : vector<1x48xf32> to vector<48xf32>
    %243 = vector.shape_cast %242 : vector<48xf32> to vector<1x48xf32>
    %244 = vector.broadcast %243 : vector<1x48xf32> to vector<16x48xf32>
    %245 = arith.mulf %240, %244 : vector<16x48xf32>
    %246 = arith.addf %239, %245 : vector<16x48xf32>
    %247 = vector.extract_strided_slice %232 {offsets = [2, 0], sizes = [16, 48], strides = [1, 1]} : vector<18x48xf32> to vector<16x48xf32>
    %c2_108 = arith.constant 2 : index
    %c0_109 = arith.constant 0 : index
    %248 = vector.load %arg5[%c2_108, %c0_109] : memref<9x48xf32, #tpu.memory_space<vmem>>, vector<1x48xf32>
    %249 = vector.shape_cast %248 : vector<1x48xf32> to vector<48xf32>
    %250 = vector.shape_cast %249 : vector<48xf32> to vector<1x48xf32>
    %251 = vector.broadcast %250 : vector<1x48xf32> to vector<16x48xf32>
    %252 = arith.mulf %247, %251 : vector<16x48xf32>
    %253 = arith.addf %246, %252 : vector<16x48xf32>
    %c1_i32_110 = arith.constant 1 : i32
    %254 = arith.muli %c2_i32_98, %c1_i32_110 : i32
    %c1_i32_111 = arith.constant 1 : i32
    %255 = arith.addi %254, %c1_i32_111 : i32
    %256 = arith.index_cast %255 : i32 to index
    %c0_112 = arith.constant 0 : index
    %c0_113 = arith.constant 0 : index
    %257 = vector.load %arg10[%256, %c0_112, %c0_113] : memref<18x18x48xf32, #tpu.memory_space<vmem>>, vector<1x18x48xf32>
    %258 = vector.shape_cast %257 : vector<1x18x48xf32> to vector<18x48xf32>
    %259 = vector.extract_strided_slice %258 {offsets = [0, 0], sizes = [16, 48], strides = [1, 1]} : vector<18x48xf32> to vector<16x48xf32>
    %c3_114 = arith.constant 3 : index
    %c0_115 = arith.constant 0 : index
    %260 = vector.load %arg5[%c3_114, %c0_115] : memref<9x48xf32, #tpu.memory_space<vmem>>, vector<1x48xf32>
    %261 = vector.shape_cast %260 : vector<1x48xf32> to vector<48xf32>
    %262 = vector.shape_cast %261 : vector<48xf32> to vector<1x48xf32>
    %263 = vector.broadcast %262 : vector<1x48xf32> to vector<16x48xf32>
    %264 = arith.mulf %259, %263 : vector<16x48xf32>
    %265 = arith.addf %253, %264 : vector<16x48xf32>
    %266 = vector.extract_strided_slice %258 {offsets = [1, 0], sizes = [16, 48], strides = [1, 1]} : vector<18x48xf32> to vector<16x48xf32>
    %c4_116 = arith.constant 4 : index
    %c0_117 = arith.constant 0 : index
    %267 = vector.load %arg5[%c4_116, %c0_117] : memref<9x48xf32, #tpu.memory_space<vmem>>, vector<1x48xf32>
    %268 = vector.shape_cast %267 : vector<1x48xf32> to vector<48xf32>
    %269 = vector.shape_cast %268 : vector<48xf32> to vector<1x48xf32>
    %270 = vector.broadcast %269 : vector<1x48xf32> to vector<16x48xf32>
    %271 = arith.mulf %266, %270 : vector<16x48xf32>
    %272 = arith.addf %265, %271 : vector<16x48xf32>
    %273 = vector.extract_strided_slice %258 {offsets = [2, 0], sizes = [16, 48], strides = [1, 1]} : vector<18x48xf32> to vector<16x48xf32>
    %c5_118 = arith.constant 5 : index
    %c0_119 = arith.constant 0 : index
    %274 = vector.load %arg5[%c5_118, %c0_119] : memref<9x48xf32, #tpu.memory_space<vmem>>, vector<1x48xf32>
    %275 = vector.shape_cast %274 : vector<1x48xf32> to vector<48xf32>
    %276 = vector.shape_cast %275 : vector<48xf32> to vector<1x48xf32>
    %277 = vector.broadcast %276 : vector<1x48xf32> to vector<16x48xf32>
    %278 = arith.mulf %273, %277 : vector<16x48xf32>
    %279 = arith.addf %272, %278 : vector<16x48xf32>
    %c1_i32_120 = arith.constant 1 : i32
    %280 = arith.muli %c2_i32_98, %c1_i32_120 : i32
    %c2_i32_121 = arith.constant 2 : i32
    %281 = arith.addi %280, %c2_i32_121 : i32
    %282 = arith.index_cast %281 : i32 to index
    %c0_122 = arith.constant 0 : index
    %c0_123 = arith.constant 0 : index
    %283 = vector.load %arg10[%282, %c0_122, %c0_123] : memref<18x18x48xf32, #tpu.memory_space<vmem>>, vector<1x18x48xf32>
    %284 = vector.shape_cast %283 : vector<1x18x48xf32> to vector<18x48xf32>
    %285 = vector.extract_strided_slice %284 {offsets = [0, 0], sizes = [16, 48], strides = [1, 1]} : vector<18x48xf32> to vector<16x48xf32>
    %c6_124 = arith.constant 6 : index
    %c0_125 = arith.constant 0 : index
    %286 = vector.load %arg5[%c6_124, %c0_125] : memref<9x48xf32, #tpu.memory_space<vmem>>, vector<1x48xf32>
    %287 = vector.shape_cast %286 : vector<1x48xf32> to vector<48xf32>
    %288 = vector.shape_cast %287 : vector<48xf32> to vector<1x48xf32>
    %289 = vector.broadcast %288 : vector<1x48xf32> to vector<16x48xf32>
    %290 = arith.mulf %285, %289 : vector<16x48xf32>
    %291 = arith.addf %279, %290 : vector<16x48xf32>
    %292 = vector.extract_strided_slice %284 {offsets = [1, 0], sizes = [16, 48], strides = [1, 1]} : vector<18x48xf32> to vector<16x48xf32>
    %c7_126 = arith.constant 7 : index
    %c0_127 = arith.constant 0 : index
    %293 = vector.load %arg5[%c7_126, %c0_127] : memref<9x48xf32, #tpu.memory_space<vmem>>, vector<1x48xf32>
    %294 = vector.shape_cast %293 : vector<1x48xf32> to vector<48xf32>
    %295 = vector.shape_cast %294 : vector<48xf32> to vector<1x48xf32>
    %296 = vector.broadcast %295 : vector<1x48xf32> to vector<16x48xf32>
    %297 = arith.mulf %292, %296 : vector<16x48xf32>
    %298 = arith.addf %291, %297 : vector<16x48xf32>
    %299 = vector.extract_strided_slice %284 {offsets = [2, 0], sizes = [16, 48], strides = [1, 1]} : vector<18x48xf32> to vector<16x48xf32>
    %c8_128 = arith.constant 8 : index
    %c0_129 = arith.constant 0 : index
    %300 = vector.load %arg5[%c8_128, %c0_129] : memref<9x48xf32, #tpu.memory_space<vmem>>, vector<1x48xf32>
    %301 = vector.shape_cast %300 : vector<1x48xf32> to vector<48xf32>
    %302 = vector.shape_cast %301 : vector<48xf32> to vector<1x48xf32>
    %303 = vector.broadcast %302 : vector<1x48xf32> to vector<16x48xf32>
    %304 = arith.mulf %299, %303 : vector<16x48xf32>
    %305 = arith.addf %298, %304 : vector<16x48xf32>
    %c0_130 = arith.constant 0 : index
    %c0_131 = arith.constant 0 : index
    %306 = vector.load %arg6[%c0_130, %c0_131] : memref<1x48xf32, #tpu.memory_space<vmem>>, vector<1x48xf32>
    %307 = vector.shape_cast %306 : vector<1x48xf32> to vector<48xf32>
    %308 = vector.shape_cast %307 : vector<48xf32> to vector<1x48xf32>
    %309 = vector.broadcast %308 : vector<1x48xf32> to vector<16x48xf32>
    %310 = arith.addf %305, %309 : vector<16x48xf32>
    %cst_132 = arith.constant 0.000000e+00 : f32
    %cst_133 = arith.constant 6.000000e+00 : f32
    %311 = vector.broadcast %cst_132 : f32 to vector<16x48xf32>
    %312 = arith.maximumf %311, %310 : vector<16x48xf32>
    %313 = vector.broadcast %cst_133 : f32 to vector<16x48xf32>
    %314 = arith.minimumf %313, %312 : vector<16x48xf32>
    %315 = arith.index_cast %c2_i32_98 : i32 to index
    %c0_134 = arith.constant 0 : index
    %c0_135 = arith.constant 0 : index
    %316 = vector.load %arg11[%315, %c0_134, %c0_135] : memref<16x16x48xf32, #tpu.memory_space<vmem>>, vector<1x16x48xf32>
    %317 = vector.shape_cast %316 : vector<1x16x48xf32> to vector<16x48xf32>
    %318 = vector.shape_cast %314 : vector<16x48xf32> to vector<1x16x48xf32>
    tpu.vector_store %arg11[%315, %c0_134, %c0_135], %318 {strides = array<i32>} : memref<16x16x48xf32, #tpu.memory_space<vmem>>, vector<1x16x48xf32>,
    %c3_i32 = arith.constant 3 : i32
    %cst_136 = arith.constant 0.000000e+00 : f32
    %319 = vector.broadcast %cst_136 : f32 to vector<16x48xf32>
    %c1_i32_137 = arith.constant 1 : i32
    %320 = arith.muli %c3_i32, %c1_i32_137 : i32
    %c0_i32_138 = arith.constant 0 : i32
    %321 = arith.addi %320, %c0_i32_138 : i32
    %322 = arith.index_cast %321 : i32 to index
    %c0_139 = arith.constant 0 : index
    %c0_140 = arith.constant 0 : index
    %323 = vector.load %arg10[%322, %c0_139, %c0_140] : memref<18x18x48xf32, #tpu.memory_space<vmem>>, vector<1x18x48xf32>
    %324 = vector.shape_cast %323 : vector<1x18x48xf32> to vector<18x48xf32>
    %325 = vector.extract_strided_slice %324 {offsets = [0, 0], sizes = [16, 48], strides = [1, 1]} : vector<18x48xf32> to vector<16x48xf32>
    %c0_141 = arith.constant 0 : index
    %c0_142 = arith.constant 0 : index
    %326 = vector.load %arg5[%c0_141, %c0_142] : memref<9x48xf32, #tpu.memory_space<vmem>>, vector<1x48xf32>
    %327 = vector.shape_cast %326 : vector<1x48xf32> to vector<48xf32>
    %328 = vector.shape_cast %327 : vector<48xf32> to vector<1x48xf32>
    %329 = vector.broadcast %328 : vector<1x48xf32> to vector<16x48xf32>
    %330 = arith.mulf %325, %329 : vector<16x48xf32>
    %331 = arith.addf %319, %330 : vector<16x48xf32>
    %332 = vector.extract_strided_slice %324 {offsets = [1, 0], sizes = [16, 48], strides = [1, 1]} : vector<18x48xf32> to vector<16x48xf32>
    %c1_143 = arith.constant 1 : index
    %c0_144 = arith.constant 0 : index
    %333 = vector.load %arg5[%c1_143, %c0_144] : memref<9x48xf32, #tpu.memory_space<vmem>>, vector<1x48xf32>
    %334 = vector.shape_cast %333 : vector<1x48xf32> to vector<48xf32>
    %335 = vector.shape_cast %334 : vector<48xf32> to vector<1x48xf32>
    %336 = vector.broadcast %335 : vector<1x48xf32> to vector<16x48xf32>
    %337 = arith.mulf %332, %336 : vector<16x48xf32>
    %338 = arith.addf %331, %337 : vector<16x48xf32>
    %339 = vector.extract_strided_slice %324 {offsets = [2, 0], sizes = [16, 48], strides = [1, 1]} : vector<18x48xf32> to vector<16x48xf32>
    %c2_145 = arith.constant 2 : index
    %c0_146 = arith.constant 0 : index
    %340 = vector.load %arg5[%c2_145, %c0_146] : memref<9x48xf32, #tpu.memory_space<vmem>>, vector<1x48xf32>
    %341 = vector.shape_cast %340 : vector<1x48xf32> to vector<48xf32>
    %342 = vector.shape_cast %341 : vector<48xf32> to vector<1x48xf32>
    %343 = vector.broadcast %342 : vector<1x48xf32> to vector<16x48xf32>
    %344 = arith.mulf %339, %343 : vector<16x48xf32>
    %345 = arith.addf %338, %344 : vector<16x48xf32>
    %c1_i32_147 = arith.constant 1 : i32
    %346 = arith.muli %c3_i32, %c1_i32_147 : i32
    %c1_i32_148 = arith.constant 1 : i32
    %347 = arith.addi %346, %c1_i32_148 : i32
    %348 = arith.index_cast %347 : i32 to index
    %c0_149 = arith.constant 0 : index
    %c0_150 = arith.constant 0 : index
    %349 = vector.load %arg10[%348, %c0_149, %c0_150] : memref<18x18x48xf32, #tpu.memory_space<vmem>>, vector<1x18x48xf32>
    %350 = vector.shape_cast %349 : vector<1x18x48xf32> to vector<18x48xf32>
    %351 = vector.extract_strided_slice %350 {offsets = [0, 0], sizes = [16, 48], strides = [1, 1]} : vector<18x48xf32> to vector<16x48xf32>
    %c3_151 = arith.constant 3 : index
    %c0_152 = arith.constant 0 : index
    %352 = vector.load %arg5[%c3_151, %c0_152] : memref<9x48xf32, #tpu.memory_space<vmem>>, vector<1x48xf32>
    %353 = vector.shape_cast %352 : vector<1x48xf32> to vector<48xf32>
    %354 = vector.shape_cast %353 : vector<48xf32> to vector<1x48xf32>
    %355 = vector.broadcast %354 : vector<1x48xf32> to vector<16x48xf32>
    %356 = arith.mulf %351, %355 : vector<16x48xf32>
    %357 = arith.addf %345, %356 : vector<16x48xf32>
    %358 = vector.extract_strided_slice %350 {offsets = [1, 0], sizes = [16, 48], strides = [1, 1]} : vector<18x48xf32> to vector<16x48xf32>
    %c4_153 = arith.constant 4 : index
    %c0_154 = arith.constant 0 : index
    %359 = vector.load %arg5[%c4_153, %c0_154] : memref<9x48xf32, #tpu.memory_space<vmem>>, vector<1x48xf32>
    %360 = vector.shape_cast %359 : vector<1x48xf32> to vector<48xf32>
    %361 = vector.shape_cast %360 : vector<48xf32> to vector<1x48xf32>
    %362 = vector.broadcast %361 : vector<1x48xf32> to vector<16x48xf32>
    %363 = arith.mulf %358, %362 : vector<16x48xf32>
    %364 = arith.addf %357, %363 : vector<16x48xf32>
    %365 = vector.extract_strided_slice %350 {offsets = [2, 0], sizes = [16, 48], strides = [1, 1]} : vector<18x48xf32> to vector<16x48xf32>
    %c5_155 = arith.constant 5 : index
    %c0_156 = arith.constant 0 : index
    %366 = vector.load %arg5[%c5_155, %c0_156] : memref<9x48xf32, #tpu.memory_space<vmem>>, vector<1x48xf32>
    %367 = vector.shape_cast %366 : vector<1x48xf32> to vector<48xf32>
    %368 = vector.shape_cast %367 : vector<48xf32> to vector<1x48xf32>
    %369 = vector.broadcast %368 : vector<1x48xf32> to vector<16x48xf32>
    %370 = arith.mulf %365, %369 : vector<16x48xf32>
    %371 = arith.addf %364, %370 : vector<16x48xf32>
    %c1_i32_157 = arith.constant 1 : i32
    %372 = arith.muli %c3_i32, %c1_i32_157 : i32
    %c2_i32_158 = arith.constant 2 : i32
    %373 = arith.addi %372, %c2_i32_158 : i32
    %374 = arith.index_cast %373 : i32 to index
    %c0_159 = arith.constant 0 : index
    %c0_160 = arith.constant 0 : index
    %375 = vector.load %arg10[%374, %c0_159, %c0_160] : memref<18x18x48xf32, #tpu.memory_space<vmem>>, vector<1x18x48xf32>
    %376 = vector.shape_cast %375 : vector<1x18x48xf32> to vector<18x48xf32>
    %377 = vector.extract_strided_slice %376 {offsets = [0, 0], sizes = [16, 48], strides = [1, 1]} : vector<18x48xf32> to vector<16x48xf32>
    %c6_161 = arith.constant 6 : index
    %c0_162 = arith.constant 0 : index
    %378 = vector.load %arg5[%c6_161, %c0_162] : memref<9x48xf32, #tpu.memory_space<vmem>>, vector<1x48xf32>
    %379 = vector.shape_cast %378 : vector<1x48xf32> to vector<48xf32>
    %380 = vector.shape_cast %379 : vector<48xf32> to vector<1x48xf32>
    %381 = vector.broadcast %380 : vector<1x48xf32> to vector<16x48xf32>
    %382 = arith.mulf %377, %381 : vector<16x48xf32>
    %383 = arith.addf %371, %382 : vector<16x48xf32>
    %384 = vector.extract_strided_slice %376 {offsets = [1, 0], sizes = [16, 48], strides = [1, 1]} : vector<18x48xf32> to vector<16x48xf32>
    %c7_163 = arith.constant 7 : index
    %c0_164 = arith.constant 0 : index
    %385 = vector.load %arg5[%c7_163, %c0_164] : memref<9x48xf32, #tpu.memory_space<vmem>>, vector<1x48xf32>
    %386 = vector.shape_cast %385 : vector<1x48xf32> to vector<48xf32>
    %387 = vector.shape_cast %386 : vector<48xf32> to vector<1x48xf32>
    %388 = vector.broadcast %387 : vector<1x48xf32> to vector<16x48xf32>
    %389 = arith.mulf %384, %388 : vector<16x48xf32>
    %390 = arith.addf %383, %389 : vector<16x48xf32>
    %391 = vector.extract_strided_slice %376 {offsets = [2, 0], sizes = [16, 48], strides = [1, 1]} : vector<18x48xf32> to vector<16x48xf32>
    %c8_165 = arith.constant 8 : index
    %c0_166 = arith.constant 0 : index
    %392 = vector.load %arg5[%c8_165, %c0_166] : memref<9x48xf32, #tpu.memory_space<vmem>>, vector<1x48xf32>
    %393 = vector.shape_cast %392 : vector<1x48xf32> to vector<48xf32>
    %394 = vector.shape_cast %393 : vector<48xf32> to vector<1x48xf32>
    %395 = vector.broadcast %394 : vector<1x48xf32> to vector<16x48xf32>
    %396 = arith.mulf %391, %395 : vector<16x48xf32>
    %397 = arith.addf %390, %396 : vector<16x48xf32>
    %c0_167 = arith.constant 0 : index
    %c0_168 = arith.constant 0 : index
    %398 = vector.load %arg6[%c0_167, %c0_168] : memref<1x48xf32, #tpu.memory_space<vmem>>, vector<1x48xf32>
    %399 = vector.shape_cast %398 : vector<1x48xf32> to vector<48xf32>
    %400 = vector.shape_cast %399 : vector<48xf32> to vector<1x48xf32>
    %401 = vector.broadcast %400 : vector<1x48xf32> to vector<16x48xf32>
    %402 = arith.addf %397, %401 : vector<16x48xf32>
    %cst_169 = arith.constant 0.000000e+00 : f32
    %cst_170 = arith.constant 6.000000e+00 : f32
    %403 = vector.broadcast %cst_169 : f32 to vector<16x48xf32>
    %404 = arith.maximumf %403, %402 : vector<16x48xf32>
    %405 = vector.broadcast %cst_170 : f32 to vector<16x48xf32>
    %406 = arith.minimumf %405, %404 : vector<16x48xf32>
    %407 = arith.index_cast %c3_i32 : i32 to index
    %c0_171 = arith.constant 0 : index
    %c0_172 = arith.constant 0 : index
    %408 = vector.load %arg11[%407, %c0_171, %c0_172] : memref<16x16x48xf32, #tpu.memory_space<vmem>>, vector<1x16x48xf32>
    %409 = vector.shape_cast %408 : vector<1x16x48xf32> to vector<16x48xf32>
    %410 = vector.shape_cast %406 : vector<16x48xf32> to vector<1x16x48xf32>
    tpu.vector_store %arg11[%407, %c0_171, %c0_172], %410 {strides = array<i32>} : memref<16x16x48xf32, #tpu.memory_space<vmem>>, vector<1x16x48xf32>,
    %c4_i32 = arith.constant 4 : i32
    %cst_173 = arith.constant 0.000000e+00 : f32
    %411 = vector.broadcast %cst_173 : f32 to vector<16x48xf32>
    %c1_i32_174 = arith.constant 1 : i32
    %412 = arith.muli %c4_i32, %c1_i32_174 : i32
    %c0_i32_175 = arith.constant 0 : i32
    %413 = arith.addi %412, %c0_i32_175 : i32
    %414 = arith.index_cast %413 : i32 to index
    %c0_176 = arith.constant 0 : index
    %c0_177 = arith.constant 0 : index
    %415 = vector.load %arg10[%414, %c0_176, %c0_177] : memref<18x18x48xf32, #tpu.memory_space<vmem>>, vector<1x18x48xf32>
    %416 = vector.shape_cast %415 : vector<1x18x48xf32> to vector<18x48xf32>
    %417 = vector.extract_strided_slice %416 {offsets = [0, 0], sizes = [16, 48], strides = [1, 1]} : vector<18x48xf32> to vector<16x48xf32>
    %c0_178 = arith.constant 0 : index
    %c0_179 = arith.constant 0 : index
    %418 = vector.load %arg5[%c0_178, %c0_179] : memref<9x48xf32, #tpu.memory_space<vmem>>, vector<1x48xf32>
    %419 = vector.shape_cast %418 : vector<1x48xf32> to vector<48xf32>
    %420 = vector.shape_cast %419 : vector<48xf32> to vector<1x48xf32>
    %421 = vector.broadcast %420 : vector<1x48xf32> to vector<16x48xf32>
    %422 = arith.mulf %417, %421 : vector<16x48xf32>
    %423 = arith.addf %411, %422 : vector<16x48xf32>
    %424 = vector.extract_strided_slice %416 {offsets = [1, 0], sizes = [16, 48], strides = [1, 1]} : vector<18x48xf32> to vector<16x48xf32>
    %c1_180 = arith.constant 1 : index
    %c0_181 = arith.constant 0 : index
    %425 = vector.load %arg5[%c1_180, %c0_181] : memref<9x48xf32, #tpu.memory_space<vmem>>, vector<1x48xf32>
    %426 = vector.shape_cast %425 : vector<1x48xf32> to vector<48xf32>
    %427 = vector.shape_cast %426 : vector<48xf32> to vector<1x48xf32>
    %428 = vector.broadcast %427 : vector<1x48xf32> to vector<16x48xf32>
    %429 = arith.mulf %424, %428 : vector<16x48xf32>
    %430 = arith.addf %423, %429 : vector<16x48xf32>
    %431 = vector.extract_strided_slice %416 {offsets = [2, 0], sizes = [16, 48], strides = [1, 1]} : vector<18x48xf32> to vector<16x48xf32>
    %c2_182 = arith.constant 2 : index
    %c0_183 = arith.constant 0 : index
    %432 = vector.load %arg5[%c2_182, %c0_183] : memref<9x48xf32, #tpu.memory_space<vmem>>, vector<1x48xf32>
    %433 = vector.shape_cast %432 : vector<1x48xf32> to vector<48xf32>
    %434 = vector.shape_cast %433 : vector<48xf32> to vector<1x48xf32>
    %435 = vector.broadcast %434 : vector<1x48xf32> to vector<16x48xf32>
    %436 = arith.mulf %431, %435 : vector<16x48xf32>
    %437 = arith.addf %430, %436 : vector<16x48xf32>
    %c1_i32_184 = arith.constant 1 : i32
    %438 = arith.muli %c4_i32, %c1_i32_184 : i32
    %c1_i32_185 = arith.constant 1 : i32
    %439 = arith.addi %438, %c1_i32_185 : i32
    %440 = arith.index_cast %439 : i32 to index
    %c0_186 = arith.constant 0 : index
    %c0_187 = arith.constant 0 : index
    %441 = vector.load %arg10[%440, %c0_186, %c0_187] : memref<18x18x48xf32, #tpu.memory_space<vmem>>, vector<1x18x48xf32>
    %442 = vector.shape_cast %441 : vector<1x18x48xf32> to vector<18x48xf32>
    %443 = vector.extract_strided_slice %442 {offsets = [0, 0], sizes = [16, 48], strides = [1, 1]} : vector<18x48xf32> to vector<16x48xf32>
    %c3_188 = arith.constant 3 : index
    %c0_189 = arith.constant 0 : index
    %444 = vector.load %arg5[%c3_188, %c0_189] : memref<9x48xf32, #tpu.memory_space<vmem>>, vector<1x48xf32>
    %445 = vector.shape_cast %444 : vector<1x48xf32> to vector<48xf32>
    %446 = vector.shape_cast %445 : vector<48xf32> to vector<1x48xf32>
    %447 = vector.broadcast %446 : vector<1x48xf32> to vector<16x48xf32>
    %448 = arith.mulf %443, %447 : vector<16x48xf32>
    %449 = arith.addf %437, %448 : vector<16x48xf32>
    %450 = vector.extract_strided_slice %442 {offsets = [1, 0], sizes = [16, 48], strides = [1, 1]} : vector<18x48xf32> to vector<16x48xf32>
    %c4_190 = arith.constant 4 : index
    %c0_191 = arith.constant 0 : index
    %451 = vector.load %arg5[%c4_190, %c0_191] : memref<9x48xf32, #tpu.memory_space<vmem>>, vector<1x48xf32>
    %452 = vector.shape_cast %451 : vector<1x48xf32> to vector<48xf32>
    %453 = vector.shape_cast %452 : vector<48xf32> to vector<1x48xf32>
    %454 = vector.broadcast %453 : vector<1x48xf32> to vector<16x48xf32>
    %455 = arith.mulf %450, %454 : vector<16x48xf32>
    %456 = arith.addf %449, %455 : vector<16x48xf32>
    %457 = vector.extract_strided_slice %442 {offsets = [2, 0], sizes = [16, 48], strides = [1, 1]} : vector<18x48xf32> to vector<16x48xf32>
    %c5_192 = arith.constant 5 : index
    %c0_193 = arith.constant 0 : index
    %458 = vector.load %arg5[%c5_192, %c0_193] : memref<9x48xf32, #tpu.memory_space<vmem>>, vector<1x48xf32>
    %459 = vector.shape_cast %458 : vector<1x48xf32> to vector<48xf32>
    %460 = vector.shape_cast %459 : vector<48xf32> to vector<1x48xf32>
    %461 = vector.broadcast %460 : vector<1x48xf32> to vector<16x48xf32>
    %462 = arith.mulf %457, %461 : vector<16x48xf32>
    %463 = arith.addf %456, %462 : vector<16x48xf32>
    %c1_i32_194 = arith.constant 1 : i32
    %464 = arith.muli %c4_i32, %c1_i32_194 : i32
    %c2_i32_195 = arith.constant 2 : i32
    %465 = arith.addi %464, %c2_i32_195 : i32
    %466 = arith.index_cast %465 : i32 to index
    %c0_196 = arith.constant 0 : index
    %c0_197 = arith.constant 0 : index
    %467 = vector.load %arg10[%466, %c0_196, %c0_197] : memref<18x18x48xf32, #tpu.memory_space<vmem>>, vector<1x18x48xf32>
    %468 = vector.shape_cast %467 : vector<1x18x48xf32> to vector<18x48xf32>
    %469 = vector.extract_strided_slice %468 {offsets = [0, 0], sizes = [16, 48], strides = [1, 1]} : vector<18x48xf32> to vector<16x48xf32>
    %c6_198 = arith.constant 6 : index
    %c0_199 = arith.constant 0 : index
    %470 = vector.load %arg5[%c6_198, %c0_199] : memref<9x48xf32, #tpu.memory_space<vmem>>, vector<1x48xf32>
    %471 = vector.shape_cast %470 : vector<1x48xf32> to vector<48xf32>
    %472 = vector.shape_cast %471 : vector<48xf32> to vector<1x48xf32>
    %473 = vector.broadcast %472 : vector<1x48xf32> to vector<16x48xf32>
    %474 = arith.mulf %469, %473 : vector<16x48xf32>
    %475 = arith.addf %463, %474 : vector<16x48xf32>
    %476 = vector.extract_strided_slice %468 {offsets = [1, 0], sizes = [16, 48], strides = [1, 1]} : vector<18x48xf32> to vector<16x48xf32>
    %c7_200 = arith.constant 7 : index
    %c0_201 = arith.constant 0 : index
    %477 = vector.load %arg5[%c7_200, %c0_201] : memref<9x48xf32, #tpu.memory_space<vmem>>, vector<1x48xf32>
    %478 = vector.shape_cast %477 : vector<1x48xf32> to vector<48xf32>
    %479 = vector.shape_cast %478 : vector<48xf32> to vector<1x48xf32>
    %480 = vector.broadcast %479 : vector<1x48xf32> to vector<16x48xf32>
    %481 = arith.mulf %476, %480 : vector<16x48xf32>
    %482 = arith.addf %475, %481 : vector<16x48xf32>
    %483 = vector.extract_strided_slice %468 {offsets = [2, 0], sizes = [16, 48], strides = [1, 1]} : vector<18x48xf32> to vector<16x48xf32>
    %c8_202 = arith.constant 8 : index
    %c0_203 = arith.constant 0 : index
    %484 = vector.load %arg5[%c8_202, %c0_203] : memref<9x48xf32, #tpu.memory_space<vmem>>, vector<1x48xf32>
    %485 = vector.shape_cast %484 : vector<1x48xf32> to vector<48xf32>
    %486 = vector.shape_cast %485 : vector<48xf32> to vector<1x48xf32>
    %487 = vector.broadcast %486 : vector<1x48xf32> to vector<16x48xf32>
    %488 = arith.mulf %483, %487 : vector<16x48xf32>
    %489 = arith.addf %482, %488 : vector<16x48xf32>
    %c0_204 = arith.constant 0 : index
    %c0_205 = arith.constant 0 : index
    %490 = vector.load %arg6[%c0_204, %c0_205] : memref<1x48xf32, #tpu.memory_space<vmem>>, vector<1x48xf32>
    %491 = vector.shape_cast %490 : vector<1x48xf32> to vector<48xf32>
    %492 = vector.shape_cast %491 : vector<48xf32> to vector<1x48xf32>
    %493 = vector.broadcast %492 : vector<1x48xf32> to vector<16x48xf32>
    %494 = arith.addf %489, %493 : vector<16x48xf32>
    %cst_206 = arith.constant 0.000000e+00 : f32
    %cst_207 = arith.constant 6.000000e+00 : f32
    %495 = vector.broadcast %cst_206 : f32 to vector<16x48xf32>
    %496 = arith.maximumf %495, %494 : vector<16x48xf32>
    %497 = vector.broadcast %cst_207 : f32 to vector<16x48xf32>
    %498 = arith.minimumf %497, %496 : vector<16x48xf32>
    %499 = arith.index_cast %c4_i32 : i32 to index
    %c0_208 = arith.constant 0 : index
    %c0_209 = arith.constant 0 : index
    %500 = vector.load %arg11[%499, %c0_208, %c0_209] : memref<16x16x48xf32, #tpu.memory_space<vmem>>, vector<1x16x48xf32>
    %501 = vector.shape_cast %500 : vector<1x16x48xf32> to vector<16x48xf32>
    %502 = vector.shape_cast %498 : vector<16x48xf32> to vector<1x16x48xf32>
    tpu.vector_store %arg11[%499, %c0_208, %c0_209], %502 {strides = array<i32>} : memref<16x16x48xf32, #tpu.memory_space<vmem>>, vector<1x16x48xf32>,
    %c5_i32 = arith.constant 5 : i32
    %cst_210 = arith.constant 0.000000e+00 : f32
    %503 = vector.broadcast %cst_210 : f32 to vector<16x48xf32>
    %c1_i32_211 = arith.constant 1 : i32
    %504 = arith.muli %c5_i32, %c1_i32_211 : i32
    %c0_i32_212 = arith.constant 0 : i32
    %505 = arith.addi %504, %c0_i32_212 : i32
    %506 = arith.index_cast %505 : i32 to index
    %c0_213 = arith.constant 0 : index
    %c0_214 = arith.constant 0 : index
    %507 = vector.load %arg10[%506, %c0_213, %c0_214] : memref<18x18x48xf32, #tpu.memory_space<vmem>>, vector<1x18x48xf32>
    %508 = vector.shape_cast %507 : vector<1x18x48xf32> to vector<18x48xf32>
    %509 = vector.extract_strided_slice %508 {offsets = [0, 0], sizes = [16, 48], strides = [1, 1]} : vector<18x48xf32> to vector<16x48xf32>
    %c0_215 = arith.constant 0 : index
    %c0_216 = arith.constant 0 : index
    %510 = vector.load %arg5[%c0_215, %c0_216] : memref<9x48xf32, #tpu.memory_space<vmem>>, vector<1x48xf32>
    %511 = vector.shape_cast %510 : vector<1x48xf32> to vector<48xf32>
    %512 = vector.shape_cast %511 : vector<48xf32> to vector<1x48xf32>
    %513 = vector.broadcast %512 : vector<1x48xf32> to vector<16x48xf32>
    %514 = arith.mulf %509, %513 : vector<16x48xf32>
    %515 = arith.addf %503, %514 : vector<16x48xf32>
    %516 = vector.extract_strided_slice %508 {offsets = [1, 0], sizes = [16, 48], strides = [1, 1]} : vector<18x48xf32> to vector<16x48xf32>
    %c1_217 = arith.constant 1 : index
    %c0_218 = arith.constant 0 : index
    %517 = vector.load %arg5[%c1_217, %c0_218] : memref<9x48xf32, #tpu.memory_space<vmem>>, vector<1x48xf32>
    %518 = vector.shape_cast %517 : vector<1x48xf32> to vector<48xf32>
    %519 = vector.shape_cast %518 : vector<48xf32> to vector<1x48xf32>
    %520 = vector.broadcast %519 : vector<1x48xf32> to vector<16x48xf32>
    %521 = arith.mulf %516, %520 : vector<16x48xf32>
    %522 = arith.addf %515, %521 : vector<16x48xf32>
    %523 = vector.extract_strided_slice %508 {offsets = [2, 0], sizes = [16, 48], strides = [1, 1]} : vector<18x48xf32> to vector<16x48xf32>
    %c2_219 = arith.constant 2 : index
    %c0_220 = arith.constant 0 : index
    %524 = vector.load %arg5[%c2_219, %c0_220] : memref<9x48xf32, #tpu.memory_space<vmem>>, vector<1x48xf32>
    %525 = vector.shape_cast %524 : vector<1x48xf32> to vector<48xf32>
    %526 = vector.shape_cast %525 : vector<48xf32> to vector<1x48xf32>
    %527 = vector.broadcast %526 : vector<1x48xf32> to vector<16x48xf32>
    %528 = arith.mulf %523, %527 : vector<16x48xf32>
    %529 = arith.addf %522, %528 : vector<16x48xf32>
    %c1_i32_221 = arith.constant 1 : i32
    %530 = arith.muli %c5_i32, %c1_i32_221 : i32
    %c1_i32_222 = arith.constant 1 : i32
    %531 = arith.addi %530, %c1_i32_222 : i32
    %532 = arith.index_cast %531 : i32 to index
    %c0_223 = arith.constant 0 : index
    %c0_224 = arith.constant 0 : index
    %533 = vector.load %arg10[%532, %c0_223, %c0_224] : memref<18x18x48xf32, #tpu.memory_space<vmem>>, vector<1x18x48xf32>
    %534 = vector.shape_cast %533 : vector<1x18x48xf32> to vector<18x48xf32>
    %535 = vector.extract_strided_slice %534 {offsets = [0, 0], sizes = [16, 48], strides = [1, 1]} : vector<18x48xf32> to vector<16x48xf32>
    %c3_225 = arith.constant 3 : index
    %c0_226 = arith.constant 0 : index
    %536 = vector.load %arg5[%c3_225, %c0_226] : memref<9x48xf32, #tpu.memory_space<vmem>>, vector<1x48xf32>
    %537 = vector.shape_cast %536 : vector<1x48xf32> to vector<48xf32>
    %538 = vector.shape_cast %537 : vector<48xf32> to vector<1x48xf32>
    %539 = vector.broadcast %538 : vector<1x48xf32> to vector<16x48xf32>
    %540 = arith.mulf %535, %539 : vector<16x48xf32>
    %541 = arith.addf %529, %540 : vector<16x48xf32>
    %542 = vector.extract_strided_slice %534 {offsets = [1, 0], sizes = [16, 48], strides = [1, 1]} : vector<18x48xf32> to vector<16x48xf32>
    %c4_227 = arith.constant 4 : index
    %c0_228 = arith.constant 0 : index
    %543 = vector.load %arg5[%c4_227, %c0_228] : memref<9x48xf32, #tpu.memory_space<vmem>>, vector<1x48xf32>
    %544 = vector.shape_cast %543 : vector<1x48xf32> to vector<48xf32>
    %545 = vector.shape_cast %544 : vector<48xf32> to vector<1x48xf32>
    %546 = vector.broadcast %545 : vector<1x48xf32> to vector<16x48xf32>
    %547 = arith.mulf %542, %546 : vector<16x48xf32>
    %548 = arith.addf %541, %547 : vector<16x48xf32>
    %549 = vector.extract_strided_slice %534 {offsets = [2, 0], sizes = [16, 48], strides = [1, 1]} : vector<18x48xf32> to vector<16x48xf32>
    %c5_229 = arith.constant 5 : index
    %c0_230 = arith.constant 0 : index
    %550 = vector.load %arg5[%c5_229, %c0_230] : memref<9x48xf32, #tpu.memory_space<vmem>>, vector<1x48xf32>
    %551 = vector.shape_cast %550 : vector<1x48xf32> to vector<48xf32>
    %552 = vector.shape_cast %551 : vector<48xf32> to vector<1x48xf32>
    %553 = vector.broadcast %552 : vector<1x48xf32> to vector<16x48xf32>
    %554 = arith.mulf %549, %553 : vector<16x48xf32>
    %555 = arith.addf %548, %554 : vector<16x48xf32>
    %c1_i32_231 = arith.constant 1 : i32
    %556 = arith.muli %c5_i32, %c1_i32_231 : i32
    %c2_i32_232 = arith.constant 2 : i32
    %557 = arith.addi %556, %c2_i32_232 : i32
    %558 = arith.index_cast %557 : i32 to index
    %c0_233 = arith.constant 0 : index
    %c0_234 = arith.constant 0 : index
    %559 = vector.load %arg10[%558, %c0_233, %c0_234] : memref<18x18x48xf32, #tpu.memory_space<vmem>>, vector<1x18x48xf32>
    %560 = vector.shape_cast %559 : vector<1x18x48xf32> to vector<18x48xf32>
    %561 = vector.extract_strided_slice %560 {offsets = [0, 0], sizes = [16, 48], strides = [1, 1]} : vector<18x48xf32> to vector<16x48xf32>
    %c6_235 = arith.constant 6 : index
    %c0_236 = arith.constant 0 : index
    %562 = vector.load %arg5[%c6_235, %c0_236] : memref<9x48xf32, #tpu.memory_space<vmem>>, vector<1x48xf32>
    %563 = vector.shape_cast %562 : vector<1x48xf32> to vector<48xf32>
    %564 = vector.shape_cast %563 : vector<48xf32> to vector<1x48xf32>
    %565 = vector.broadcast %564 : vector<1x48xf32> to vector<16x48xf32>
    %566 = arith.mulf %561, %565 : vector<16x48xf32>
    %567 = arith.addf %555, %566 : vector<16x48xf32>
    %568 = vector.extract_strided_slice %560 {offsets = [1, 0], sizes = [16, 48], strides = [1, 1]} : vector<18x48xf32> to vector<16x48xf32>
    %c7_237 = arith.constant 7 : index
    %c0_238 = arith.constant 0 : index
    %569 = vector.load %arg5[%c7_237, %c0_238] : memref<9x48xf32, #tpu.memory_space<vmem>>, vector<1x48xf32>
    %570 = vector.shape_cast %569 : vector<1x48xf32> to vector<48xf32>
    %571 = vector.shape_cast %570 : vector<48xf32> to vector<1x48xf32>
    %572 = vector.broadcast %571 : vector<1x48xf32> to vector<16x48xf32>
    %573 = arith.mulf %568, %572 : vector<16x48xf32>
    %574 = arith.addf %567, %573 : vector<16x48xf32>
    %575 = vector.extract_strided_slice %560 {offsets = [2, 0], sizes = [16, 48], strides = [1, 1]} : vector<18x48xf32> to vector<16x48xf32>
    %c8_239 = arith.constant 8 : index
    %c0_240 = arith.constant 0 : index
    %576 = vector.load %arg5[%c8_239, %c0_240] : memref<9x48xf32, #tpu.memory_space<vmem>>, vector<1x48xf32>
    %577 = vector.shape_cast %576 : vector<1x48xf32> to vector<48xf32>
    %578 = vector.shape_cast %577 : vector<48xf32> to vector<1x48xf32>
    %579 = vector.broadcast %578 : vector<1x48xf32> to vector<16x48xf32>
    %580 = arith.mulf %575, %579 : vector<16x48xf32>
    %581 = arith.addf %574, %580 : vector<16x48xf32>
    %c0_241 = arith.constant 0 : index
    %c0_242 = arith.constant 0 : index
    %582 = vector.load %arg6[%c0_241, %c0_242] : memref<1x48xf32, #tpu.memory_space<vmem>>, vector<1x48xf32>
    %583 = vector.shape_cast %582 : vector<1x48xf32> to vector<48xf32>
    %584 = vector.shape_cast %583 : vector<48xf32> to vector<1x48xf32>
    %585 = vector.broadcast %584 : vector<1x48xf32> to vector<16x48xf32>
    %586 = arith.addf %581, %585 : vector<16x48xf32>
    %cst_243 = arith.constant 0.000000e+00 : f32
    %cst_244 = arith.constant 6.000000e+00 : f32
    %587 = vector.broadcast %cst_243 : f32 to vector<16x48xf32>
    %588 = arith.maximumf %587, %586 : vector<16x48xf32>
    %589 = vector.broadcast %cst_244 : f32 to vector<16x48xf32>
    %590 = arith.minimumf %589, %588 : vector<16x48xf32>
    %591 = arith.index_cast %c5_i32 : i32 to index
    %c0_245 = arith.constant 0 : index
    %c0_246 = arith.constant 0 : index
    %592 = vector.load %arg11[%591, %c0_245, %c0_246] : memref<16x16x48xf32, #tpu.memory_space<vmem>>, vector<1x16x48xf32>
    %593 = vector.shape_cast %592 : vector<1x16x48xf32> to vector<16x48xf32>
    %594 = vector.shape_cast %590 : vector<16x48xf32> to vector<1x16x48xf32>
    tpu.vector_store %arg11[%591, %c0_245, %c0_246], %594 {strides = array<i32>} : memref<16x16x48xf32, #tpu.memory_space<vmem>>, vector<1x16x48xf32>,
    %c6_i32 = arith.constant 6 : i32
    %cst_247 = arith.constant 0.000000e+00 : f32
    %595 = vector.broadcast %cst_247 : f32 to vector<16x48xf32>
    %c1_i32_248 = arith.constant 1 : i32
    %596 = arith.muli %c6_i32, %c1_i32_248 : i32
    %c0_i32_249 = arith.constant 0 : i32
    %597 = arith.addi %596, %c0_i32_249 : i32
    %598 = arith.index_cast %597 : i32 to index
    %c0_250 = arith.constant 0 : index
    %c0_251 = arith.constant 0 : index
    %599 = vector.load %arg10[%598, %c0_250, %c0_251] : memref<18x18x48xf32, #tpu.memory_space<vmem>>, vector<1x18x48xf32>
    %600 = vector.shape_cast %599 : vector<1x18x48xf32> to vector<18x48xf32>
    %601 = vector.extract_strided_slice %600 {offsets = [0, 0], sizes = [16, 48], strides = [1, 1]} : vector<18x48xf32> to vector<16x48xf32>
    %c0_252 = arith.constant 0 : index
    %c0_253 = arith.constant 0 : index
    %602 = vector.load %arg5[%c0_252, %c0_253] : memref<9x48xf32, #tpu.memory_space<vmem>>, vector<1x48xf32>
    %603 = vector.shape_cast %602 : vector<1x48xf32> to vector<48xf32>
    %604 = vector.shape_cast %603 : vector<48xf32> to vector<1x48xf32>
    %605 = vector.broadcast %604 : vector<1x48xf32> to vector<16x48xf32>
    %606 = arith.mulf %601, %605 : vector<16x48xf32>
    %607 = arith.addf %595, %606 : vector<16x48xf32>
    %608 = vector.extract_strided_slice %600 {offsets = [1, 0], sizes = [16, 48], strides = [1, 1]} : vector<18x48xf32> to vector<16x48xf32>
    %c1_254 = arith.constant 1 : index
    %c0_255 = arith.constant 0 : index
    %609 = vector.load %arg5[%c1_254, %c0_255] : memref<9x48xf32, #tpu.memory_space<vmem>>, vector<1x48xf32>
    %610 = vector.shape_cast %609 : vector<1x48xf32> to vector<48xf32>
    %611 = vector.shape_cast %610 : vector<48xf32> to vector<1x48xf32>
    %612 = vector.broadcast %611 : vector<1x48xf32> to vector<16x48xf32>
    %613 = arith.mulf %608, %612 : vector<16x48xf32>
    %614 = arith.addf %607, %613 : vector<16x48xf32>
    %615 = vector.extract_strided_slice %600 {offsets = [2, 0], sizes = [16, 48], strides = [1, 1]} : vector<18x48xf32> to vector<16x48xf32>
    %c2_256 = arith.constant 2 : index
    %c0_257 = arith.constant 0 : index
    %616 = vector.load %arg5[%c2_256, %c0_257] : memref<9x48xf32, #tpu.memory_space<vmem>>, vector<1x48xf32>
    %617 = vector.shape_cast %616 : vector<1x48xf32> to vector<48xf32>
    %618 = vector.shape_cast %617 : vector<48xf32> to vector<1x48xf32>
    %619 = vector.broadcast %618 : vector<1x48xf32> to vector<16x48xf32>
    %620 = arith.mulf %615, %619 : vector<16x48xf32>
    %621 = arith.addf %614, %620 : vector<16x48xf32>
    %c1_i32_258 = arith.constant 1 : i32
    %622 = arith.muli %c6_i32, %c1_i32_258 : i32
    %c1_i32_259 = arith.constant 1 : i32
    %623 = arith.addi %622, %c1_i32_259 : i32
    %624 = arith.index_cast %623 : i32 to index
    %c0_260 = arith.constant 0 : index
    %c0_261 = arith.constant 0 : index
    %625 = vector.load %arg10[%624, %c0_260, %c0_261] : memref<18x18x48xf32, #tpu.memory_space<vmem>>, vector<1x18x48xf32>
    %626 = vector.shape_cast %625 : vector<1x18x48xf32> to vector<18x48xf32>
    %627 = vector.extract_strided_slice %626 {offsets = [0, 0], sizes = [16, 48], strides = [1, 1]} : vector<18x48xf32> to vector<16x48xf32>
    %c3_262 = arith.constant 3 : index
    %c0_263 = arith.constant 0 : index
    %628 = vector.load %arg5[%c3_262, %c0_263] : memref<9x48xf32, #tpu.memory_space<vmem>>, vector<1x48xf32>
    %629 = vector.shape_cast %628 : vector<1x48xf32> to vector<48xf32>
    %630 = vector.shape_cast %629 : vector<48xf32> to vector<1x48xf32>
    %631 = vector.broadcast %630 : vector<1x48xf32> to vector<16x48xf32>
    %632 = arith.mulf %627, %631 : vector<16x48xf32>
    %633 = arith.addf %621, %632 : vector<16x48xf32>
    %634 = vector.extract_strided_slice %626 {offsets = [1, 0], sizes = [16, 48], strides = [1, 1]} : vector<18x48xf32> to vector<16x48xf32>
    %c4_264 = arith.constant 4 : index
    %c0_265 = arith.constant 0 : index
    %635 = vector.load %arg5[%c4_264, %c0_265] : memref<9x48xf32, #tpu.memory_space<vmem>>, vector<1x48xf32>
    %636 = vector.shape_cast %635 : vector<1x48xf32> to vector<48xf32>
    %637 = vector.shape_cast %636 : vector<48xf32> to vector<1x48xf32>
    %638 = vector.broadcast %637 : vector<1x48xf32> to vector<16x48xf32>
    %639 = arith.mulf %634, %638 : vector<16x48xf32>
    %640 = arith.addf %633, %639 : vector<16x48xf32>
    %641 = vector.extract_strided_slice %626 {offsets = [2, 0], sizes = [16, 48], strides = [1, 1]} : vector<18x48xf32> to vector<16x48xf32>
    %c5_266 = arith.constant 5 : index
    %c0_267 = arith.constant 0 : index
    %642 = vector.load %arg5[%c5_266, %c0_267] : memref<9x48xf32, #tpu.memory_space<vmem>>, vector<1x48xf32>
    %643 = vector.shape_cast %642 : vector<1x48xf32> to vector<48xf32>
    %644 = vector.shape_cast %643 : vector<48xf32> to vector<1x48xf32>
    %645 = vector.broadcast %644 : vector<1x48xf32> to vector<16x48xf32>
    %646 = arith.mulf %641, %645 : vector<16x48xf32>
    %647 = arith.addf %640, %646 : vector<16x48xf32>
    %c1_i32_268 = arith.constant 1 : i32
    %648 = arith.muli %c6_i32, %c1_i32_268 : i32
    %c2_i32_269 = arith.constant 2 : i32
    %649 = arith.addi %648, %c2_i32_269 : i32
    %650 = arith.index_cast %649 : i32 to index
    %c0_270 = arith.constant 0 : index
    %c0_271 = arith.constant 0 : index
    %651 = vector.load %arg10[%650, %c0_270, %c0_271] : memref<18x18x48xf32, #tpu.memory_space<vmem>>, vector<1x18x48xf32>
    %652 = vector.shape_cast %651 : vector<1x18x48xf32> to vector<18x48xf32>
    %653 = vector.extract_strided_slice %652 {offsets = [0, 0], sizes = [16, 48], strides = [1, 1]} : vector<18x48xf32> to vector<16x48xf32>
    %c6_272 = arith.constant 6 : index
    %c0_273 = arith.constant 0 : index
    %654 = vector.load %arg5[%c6_272, %c0_273] : memref<9x48xf32, #tpu.memory_space<vmem>>, vector<1x48xf32>
    %655 = vector.shape_cast %654 : vector<1x48xf32> to vector<48xf32>
    %656 = vector.shape_cast %655 : vector<48xf32> to vector<1x48xf32>
    %657 = vector.broadcast %656 : vector<1x48xf32> to vector<16x48xf32>
    %658 = arith.mulf %653, %657 : vector<16x48xf32>
    %659 = arith.addf %647, %658 : vector<16x48xf32>
    %660 = vector.extract_strided_slice %652 {offsets = [1, 0], sizes = [16, 48], strides = [1, 1]} : vector<18x48xf32> to vector<16x48xf32>
    %c7_274 = arith.constant 7 : index
    %c0_275 = arith.constant 0 : index
    %661 = vector.load %arg5[%c7_274, %c0_275] : memref<9x48xf32, #tpu.memory_space<vmem>>, vector<1x48xf32>
    %662 = vector.shape_cast %661 : vector<1x48xf32> to vector<48xf32>
    %663 = vector.shape_cast %662 : vector<48xf32> to vector<1x48xf32>
    %664 = vector.broadcast %663 : vector<1x48xf32> to vector<16x48xf32>
    %665 = arith.mulf %660, %664 : vector<16x48xf32>
    %666 = arith.addf %659, %665 : vector<16x48xf32>
    %667 = vector.extract_strided_slice %652 {offsets = [2, 0], sizes = [16, 48], strides = [1, 1]} : vector<18x48xf32> to vector<16x48xf32>
    %c8_276 = arith.constant 8 : index
    %c0_277 = arith.constant 0 : index
    %668 = vector.load %arg5[%c8_276, %c0_277] : memref<9x48xf32, #tpu.memory_space<vmem>>, vector<1x48xf32>
    %669 = vector.shape_cast %668 : vector<1x48xf32> to vector<48xf32>
    %670 = vector.shape_cast %669 : vector<48xf32> to vector<1x48xf32>
    %671 = vector.broadcast %670 : vector<1x48xf32> to vector<16x48xf32>
    %672 = arith.mulf %667, %671 : vector<16x48xf32>
    %673 = arith.addf %666, %672 : vector<16x48xf32>
    %c0_278 = arith.constant 0 : index
    %c0_279 = arith.constant 0 : index
    %674 = vector.load %arg6[%c0_278, %c0_279] : memref<1x48xf32, #tpu.memory_space<vmem>>, vector<1x48xf32>
    %675 = vector.shape_cast %674 : vector<1x48xf32> to vector<48xf32>
    %676 = vector.shape_cast %675 : vector<48xf32> to vector<1x48xf32>
    %677 = vector.broadcast %676 : vector<1x48xf32> to vector<16x48xf32>
    %678 = arith.addf %673, %677 : vector<16x48xf32>
    %cst_280 = arith.constant 0.000000e+00 : f32
    %cst_281 = arith.constant 6.000000e+00 : f32
    %679 = vector.broadcast %cst_280 : f32 to vector<16x48xf32>
    %680 = arith.maximumf %679, %678 : vector<16x48xf32>
    %681 = vector.broadcast %cst_281 : f32 to vector<16x48xf32>
    %682 = arith.minimumf %681, %680 : vector<16x48xf32>
    %683 = arith.index_cast %c6_i32 : i32 to index
    %c0_282 = arith.constant 0 : index
    %c0_283 = arith.constant 0 : index
    %684 = vector.load %arg11[%683, %c0_282, %c0_283] : memref<16x16x48xf32, #tpu.memory_space<vmem>>, vector<1x16x48xf32>
    %685 = vector.shape_cast %684 : vector<1x16x48xf32> to vector<16x48xf32>
    %686 = vector.shape_cast %682 : vector<16x48xf32> to vector<1x16x48xf32>
    tpu.vector_store %arg11[%683, %c0_282, %c0_283], %686 {strides = array<i32>} : memref<16x16x48xf32, #tpu.memory_space<vmem>>, vector<1x16x48xf32>,
    %c7_i32 = arith.constant 7 : i32
    %cst_284 = arith.constant 0.000000e+00 : f32
    %687 = vector.broadcast %cst_284 : f32 to vector<16x48xf32>
    %c1_i32_285 = arith.constant 1 : i32
    %688 = arith.muli %c7_i32, %c1_i32_285 : i32
    %c0_i32_286 = arith.constant 0 : i32
    %689 = arith.addi %688, %c0_i32_286 : i32
    %690 = arith.index_cast %689 : i32 to index
    %c0_287 = arith.constant 0 : index
    %c0_288 = arith.constant 0 : index
    %691 = vector.load %arg10[%690, %c0_287, %c0_288] : memref<18x18x48xf32, #tpu.memory_space<vmem>>, vector<1x18x48xf32>
    %692 = vector.shape_cast %691 : vector<1x18x48xf32> to vector<18x48xf32>
    %693 = vector.extract_strided_slice %692 {offsets = [0, 0], sizes = [16, 48], strides = [1, 1]} : vector<18x48xf32> to vector<16x48xf32>
    %c0_289 = arith.constant 0 : index
    %c0_290 = arith.constant 0 : index
    %694 = vector.load %arg5[%c0_289, %c0_290] : memref<9x48xf32, #tpu.memory_space<vmem>>, vector<1x48xf32>
    %695 = vector.shape_cast %694 : vector<1x48xf32> to vector<48xf32>
    %696 = vector.shape_cast %695 : vector<48xf32> to vector<1x48xf32>
    %697 = vector.broadcast %696 : vector<1x48xf32> to vector<16x48xf32>
    %698 = arith.mulf %693, %697 : vector<16x48xf32>
    %699 = arith.addf %687, %698 : vector<16x48xf32>
    %700 = vector.extract_strided_slice %692 {offsets = [1, 0], sizes = [16, 48], strides = [1, 1]} : vector<18x48xf32> to vector<16x48xf32>
    %c1_291 = arith.constant 1 : index
    %c0_292 = arith.constant 0 : index
    %701 = vector.load %arg5[%c1_291, %c0_292] : memref<9x48xf32, #tpu.memory_space<vmem>>, vector<1x48xf32>
    %702 = vector.shape_cast %701 : vector<1x48xf32> to vector<48xf32>
    %703 = vector.shape_cast %702 : vector<48xf32> to vector<1x48xf32>
    %704 = vector.broadcast %703 : vector<1x48xf32> to vector<16x48xf32>
    %705 = arith.mulf %700, %704 : vector<16x48xf32>
    %706 = arith.addf %699, %705 : vector<16x48xf32>
    %707 = vector.extract_strided_slice %692 {offsets = [2, 0], sizes = [16, 48], strides = [1, 1]} : vector<18x48xf32> to vector<16x48xf32>
    %c2_293 = arith.constant 2 : index
    %c0_294 = arith.constant 0 : index
    %708 = vector.load %arg5[%c2_293, %c0_294] : memref<9x48xf32, #tpu.memory_space<vmem>>, vector<1x48xf32>
    %709 = vector.shape_cast %708 : vector<1x48xf32> to vector<48xf32>
    %710 = vector.shape_cast %709 : vector<48xf32> to vector<1x48xf32>
    %711 = vector.broadcast %710 : vector<1x48xf32> to vector<16x48xf32>
    %712 = arith.mulf %707, %711 : vector<16x48xf32>
    %713 = arith.addf %706, %712 : vector<16x48xf32>
    %c1_i32_295 = arith.constant 1 : i32
    %714 = arith.muli %c7_i32, %c1_i32_295 : i32
    %c1_i32_296 = arith.constant 1 : i32
    %715 = arith.addi %714, %c1_i32_296 : i32
    %716 = arith.index_cast %715 : i32 to index
    %c0_297 = arith.constant 0 : index
    %c0_298 = arith.constant 0 : index
    %717 = vector.load %arg10[%716, %c0_297, %c0_298] : memref<18x18x48xf32, #tpu.memory_space<vmem>>, vector<1x18x48xf32>
    %718 = vector.shape_cast %717 : vector<1x18x48xf32> to vector<18x48xf32>
    %719 = vector.extract_strided_slice %718 {offsets = [0, 0], sizes = [16, 48], strides = [1, 1]} : vector<18x48xf32> to vector<16x48xf32>
    %c3_299 = arith.constant 3 : index
    %c0_300 = arith.constant 0 : index
    %720 = vector.load %arg5[%c3_299, %c0_300] : memref<9x48xf32, #tpu.memory_space<vmem>>, vector<1x48xf32>
    %721 = vector.shape_cast %720 : vector<1x48xf32> to vector<48xf32>
    %722 = vector.shape_cast %721 : vector<48xf32> to vector<1x48xf32>
    %723 = vector.broadcast %722 : vector<1x48xf32> to vector<16x48xf32>
    %724 = arith.mulf %719, %723 : vector<16x48xf32>
    %725 = arith.addf %713, %724 : vector<16x48xf32>
    %726 = vector.extract_strided_slice %718 {offsets = [1, 0], sizes = [16, 48], strides = [1, 1]} : vector<18x48xf32> to vector<16x48xf32>
    %c4_301 = arith.constant 4 : index
    %c0_302 = arith.constant 0 : index
    %727 = vector.load %arg5[%c4_301, %c0_302] : memref<9x48xf32, #tpu.memory_space<vmem>>, vector<1x48xf32>
    %728 = vector.shape_cast %727 : vector<1x48xf32> to vector<48xf32>
    %729 = vector.shape_cast %728 : vector<48xf32> to vector<1x48xf32>
    %730 = vector.broadcast %729 : vector<1x48xf32> to vector<16x48xf32>
    %731 = arith.mulf %726, %730 : vector<16x48xf32>
    %732 = arith.addf %725, %731 : vector<16x48xf32>
    %733 = vector.extract_strided_slice %718 {offsets = [2, 0], sizes = [16, 48], strides = [1, 1]} : vector<18x48xf32> to vector<16x48xf32>
    %c5_303 = arith.constant 5 : index
    %c0_304 = arith.constant 0 : index
    %734 = vector.load %arg5[%c5_303, %c0_304] : memref<9x48xf32, #tpu.memory_space<vmem>>, vector<1x48xf32>
    %735 = vector.shape_cast %734 : vector<1x48xf32> to vector<48xf32>
    %736 = vector.shape_cast %735 : vector<48xf32> to vector<1x48xf32>
    %737 = vector.broadcast %736 : vector<1x48xf32> to vector<16x48xf32>
    %738 = arith.mulf %733, %737 : vector<16x48xf32>
    %739 = arith.addf %732, %738 : vector<16x48xf32>
    %c1_i32_305 = arith.constant 1 : i32
    %740 = arith.muli %c7_i32, %c1_i32_305 : i32
    %c2_i32_306 = arith.constant 2 : i32
    %741 = arith.addi %740, %c2_i32_306 : i32
    %742 = arith.index_cast %741 : i32 to index
    %c0_307 = arith.constant 0 : index
    %c0_308 = arith.constant 0 : index
    %743 = vector.load %arg10[%742, %c0_307, %c0_308] : memref<18x18x48xf32, #tpu.memory_space<vmem>>, vector<1x18x48xf32>
    %744 = vector.shape_cast %743 : vector<1x18x48xf32> to vector<18x48xf32>
    %745 = vector.extract_strided_slice %744 {offsets = [0, 0], sizes = [16, 48], strides = [1, 1]} : vector<18x48xf32> to vector<16x48xf32>
    %c6_309 = arith.constant 6 : index
    %c0_310 = arith.constant 0 : index
    %746 = vector.load %arg5[%c6_309, %c0_310] : memref<9x48xf32, #tpu.memory_space<vmem>>, vector<1x48xf32>
    %747 = vector.shape_cast %746 : vector<1x48xf32> to vector<48xf32>
    %748 = vector.shape_cast %747 : vector<48xf32> to vector<1x48xf32>
    %749 = vector.broadcast %748 : vector<1x48xf32> to vector<16x48xf32>
    %750 = arith.mulf %745, %749 : vector<16x48xf32>
    %751 = arith.addf %739, %750 : vector<16x48xf32>
    %752 = vector.extract_strided_slice %744 {offsets = [1, 0], sizes = [16, 48], strides = [1, 1]} : vector<18x48xf32> to vector<16x48xf32>
    %c7_311 = arith.constant 7 : index
    %c0_312 = arith.constant 0 : index
    %753 = vector.load %arg5[%c7_311, %c0_312] : memref<9x48xf32, #tpu.memory_space<vmem>>, vector<1x48xf32>
    %754 = vector.shape_cast %753 : vector<1x48xf32> to vector<48xf32>
    %755 = vector.shape_cast %754 : vector<48xf32> to vector<1x48xf32>
    %756 = vector.broadcast %755 : vector<1x48xf32> to vector<16x48xf32>
    %757 = arith.mulf %752, %756 : vector<16x48xf32>
    %758 = arith.addf %751, %757 : vector<16x48xf32>
    %759 = vector.extract_strided_slice %744 {offsets = [2, 0], sizes = [16, 48], strides = [1, 1]} : vector<18x48xf32> to vector<16x48xf32>
    %c8_313 = arith.constant 8 : index
    %c0_314 = arith.constant 0 : index
    %760 = vector.load %arg5[%c8_313, %c0_314] : memref<9x48xf32, #tpu.memory_space<vmem>>, vector<1x48xf32>
    %761 = vector.shape_cast %760 : vector<1x48xf32> to vector<48xf32>
    %762 = vector.shape_cast %761 : vector<48xf32> to vector<1x48xf32>
    %763 = vector.broadcast %762 : vector<1x48xf32> to vector<16x48xf32>
    %764 = arith.mulf %759, %763 : vector<16x48xf32>
    %765 = arith.addf %758, %764 : vector<16x48xf32>
    %c0_315 = arith.constant 0 : index
    %c0_316 = arith.constant 0 : index
    %766 = vector.load %arg6[%c0_315, %c0_316] : memref<1x48xf32, #tpu.memory_space<vmem>>, vector<1x48xf32>
    %767 = vector.shape_cast %766 : vector<1x48xf32> to vector<48xf32>
    %768 = vector.shape_cast %767 : vector<48xf32> to vector<1x48xf32>
    %769 = vector.broadcast %768 : vector<1x48xf32> to vector<16x48xf32>
    %770 = arith.addf %765, %769 : vector<16x48xf32>
    %cst_317 = arith.constant 0.000000e+00 : f32
    %cst_318 = arith.constant 6.000000e+00 : f32
    %771 = vector.broadcast %cst_317 : f32 to vector<16x48xf32>
    %772 = arith.maximumf %771, %770 : vector<16x48xf32>
    %773 = vector.broadcast %cst_318 : f32 to vector<16x48xf32>
    %774 = arith.minimumf %773, %772 : vector<16x48xf32>
    %775 = arith.index_cast %c7_i32 : i32 to index
    %c0_319 = arith.constant 0 : index
    %c0_320 = arith.constant 0 : index
    %776 = vector.load %arg11[%775, %c0_319, %c0_320] : memref<16x16x48xf32, #tpu.memory_space<vmem>>, vector<1x16x48xf32>
    %777 = vector.shape_cast %776 : vector<1x16x48xf32> to vector<16x48xf32>
    %778 = vector.shape_cast %774 : vector<16x48xf32> to vector<1x16x48xf32>
    tpu.vector_store %arg11[%775, %c0_319, %c0_320], %778 {strides = array<i32>} : memref<16x16x48xf32, #tpu.memory_space<vmem>>, vector<1x16x48xf32>,
    %c8_i32 = arith.constant 8 : i32
    %cst_321 = arith.constant 0.000000e+00 : f32
    %779 = vector.broadcast %cst_321 : f32 to vector<16x48xf32>
    %c1_i32_322 = arith.constant 1 : i32
    %780 = arith.muli %c8_i32, %c1_i32_322 : i32
    %c0_i32_323 = arith.constant 0 : i32
    %781 = arith.addi %780, %c0_i32_323 : i32
    %782 = arith.index_cast %781 : i32 to index
    %c0_324 = arith.constant 0 : index
    %c0_325 = arith.constant 0 : index
    %783 = vector.load %arg10[%782, %c0_324, %c0_325] : memref<18x18x48xf32, #tpu.memory_space<vmem>>, vector<1x18x48xf32>
    %784 = vector.shape_cast %783 : vector<1x18x48xf32> to vector<18x48xf32>
    %785 = vector.extract_strided_slice %784 {offsets = [0, 0], sizes = [16, 48], strides = [1, 1]} : vector<18x48xf32> to vector<16x48xf32>
    %c0_326 = arith.constant 0 : index
    %c0_327 = arith.constant 0 : index
    %786 = vector.load %arg5[%c0_326, %c0_327] : memref<9x48xf32, #tpu.memory_space<vmem>>, vector<1x48xf32>
    %787 = vector.shape_cast %786 : vector<1x48xf32> to vector<48xf32>
    %788 = vector.shape_cast %787 : vector<48xf32> to vector<1x48xf32>
    %789 = vector.broadcast %788 : vector<1x48xf32> to vector<16x48xf32>
    %790 = arith.mulf %785, %789 : vector<16x48xf32>
    %791 = arith.addf %779, %790 : vector<16x48xf32>
    %792 = vector.extract_strided_slice %784 {offsets = [1, 0], sizes = [16, 48], strides = [1, 1]} : vector<18x48xf32> to vector<16x48xf32>
    %c1_328 = arith.constant 1 : index
    %c0_329 = arith.constant 0 : index
    %793 = vector.load %arg5[%c1_328, %c0_329] : memref<9x48xf32, #tpu.memory_space<vmem>>, vector<1x48xf32>
    %794 = vector.shape_cast %793 : vector<1x48xf32> to vector<48xf32>
    %795 = vector.shape_cast %794 : vector<48xf32> to vector<1x48xf32>
    %796 = vector.broadcast %795 : vector<1x48xf32> to vector<16x48xf32>
    %797 = arith.mulf %792, %796 : vector<16x48xf32>
    %798 = arith.addf %791, %797 : vector<16x48xf32>
    %799 = vector.extract_strided_slice %784 {offsets = [2, 0], sizes = [16, 48], strides = [1, 1]} : vector<18x48xf32> to vector<16x48xf32>
    %c2_330 = arith.constant 2 : index
    %c0_331 = arith.constant 0 : index
    %800 = vector.load %arg5[%c2_330, %c0_331] : memref<9x48xf32, #tpu.memory_space<vmem>>, vector<1x48xf32>
    %801 = vector.shape_cast %800 : vector<1x48xf32> to vector<48xf32>
    %802 = vector.shape_cast %801 : vector<48xf32> to vector<1x48xf32>
    %803 = vector.broadcast %802 : vector<1x48xf32> to vector<16x48xf32>
    %804 = arith.mulf %799, %803 : vector<16x48xf32>
    %805 = arith.addf %798, %804 : vector<16x48xf32>
    %c1_i32_332 = arith.constant 1 : i32
    %806 = arith.muli %c8_i32, %c1_i32_332 : i32
    %c1_i32_333 = arith.constant 1 : i32
    %807 = arith.addi %806, %c1_i32_333 : i32
    %808 = arith.index_cast %807 : i32 to index
    %c0_334 = arith.constant 0 : index
    %c0_335 = arith.constant 0 : index
    %809 = vector.load %arg10[%808, %c0_334, %c0_335] : memref<18x18x48xf32, #tpu.memory_space<vmem>>, vector<1x18x48xf32>
    %810 = vector.shape_cast %809 : vector<1x18x48xf32> to vector<18x48xf32>
    %811 = vector.extract_strided_slice %810 {offsets = [0, 0], sizes = [16, 48], strides = [1, 1]} : vector<18x48xf32> to vector<16x48xf32>
    %c3_336 = arith.constant 3 : index
    %c0_337 = arith.constant 0 : index
    %812 = vector.load %arg5[%c3_336, %c0_337] : memref<9x48xf32, #tpu.memory_space<vmem>>, vector<1x48xf32>
    %813 = vector.shape_cast %812 : vector<1x48xf32> to vector<48xf32>
    %814 = vector.shape_cast %813 : vector<48xf32> to vector<1x48xf32>
    %815 = vector.broadcast %814 : vector<1x48xf32> to vector<16x48xf32>
    %816 = arith.mulf %811, %815 : vector<16x48xf32>
    %817 = arith.addf %805, %816 : vector<16x48xf32>
    %818 = vector.extract_strided_slice %810 {offsets = [1, 0], sizes = [16, 48], strides = [1, 1]} : vector<18x48xf32> to vector<16x48xf32>
    %c4_338 = arith.constant 4 : index
    %c0_339 = arith.constant 0 : index
    %819 = vector.load %arg5[%c4_338, %c0_339] : memref<9x48xf32, #tpu.memory_space<vmem>>, vector<1x48xf32>
    %820 = vector.shape_cast %819 : vector<1x48xf32> to vector<48xf32>
    %821 = vector.shape_cast %820 : vector<48xf32> to vector<1x48xf32>
    %822 = vector.broadcast %821 : vector<1x48xf32> to vector<16x48xf32>
    %823 = arith.mulf %818, %822 : vector<16x48xf32>
    %824 = arith.addf %817, %823 : vector<16x48xf32>
    %825 = vector.extract_strided_slice %810 {offsets = [2, 0], sizes = [16, 48], strides = [1, 1]} : vector<18x48xf32> to vector<16x48xf32>
    %c5_340 = arith.constant 5 : index
    %c0_341 = arith.constant 0 : index
    %826 = vector.load %arg5[%c5_340, %c0_341] : memref<9x48xf32, #tpu.memory_space<vmem>>, vector<1x48xf32>
    %827 = vector.shape_cast %826 : vector<1x48xf32> to vector<48xf32>
    %828 = vector.shape_cast %827 : vector<48xf32> to vector<1x48xf32>
    %829 = vector.broadcast %828 : vector<1x48xf32> to vector<16x48xf32>
    %830 = arith.mulf %825, %829 : vector<16x48xf32>
    %831 = arith.addf %824, %830 : vector<16x48xf32>
    %c1_i32_342 = arith.constant 1 : i32
    %832 = arith.muli %c8_i32, %c1_i32_342 : i32
    %c2_i32_343 = arith.constant 2 : i32
    %833 = arith.addi %832, %c2_i32_343 : i32
    %834 = arith.index_cast %833 : i32 to index
    %c0_344 = arith.constant 0 : index
    %c0_345 = arith.constant 0 : index
    %835 = vector.load %arg10[%834, %c0_344, %c0_345] : memref<18x18x48xf32, #tpu.memory_space<vmem>>, vector<1x18x48xf32>
    %836 = vector.shape_cast %835 : vector<1x18x48xf32> to vector<18x48xf32>
    %837 = vector.extract_strided_slice %836 {offsets = [0, 0], sizes = [16, 48], strides = [1, 1]} : vector<18x48xf32> to vector<16x48xf32>
    %c6_346 = arith.constant 6 : index
    %c0_347 = arith.constant 0 : index
    %838 = vector.load %arg5[%c6_346, %c0_347] : memref<9x48xf32, #tpu.memory_space<vmem>>, vector<1x48xf32>
    %839 = vector.shape_cast %838 : vector<1x48xf32> to vector<48xf32>
    %840 = vector.shape_cast %839 : vector<48xf32> to vector<1x48xf32>
    %841 = vector.broadcast %840 : vector<1x48xf32> to vector<16x48xf32>
    %842 = arith.mulf %837, %841 : vector<16x48xf32>
    %843 = arith.addf %831, %842 : vector<16x48xf32>
    %844 = vector.extract_strided_slice %836 {offsets = [1, 0], sizes = [16, 48], strides = [1, 1]} : vector<18x48xf32> to vector<16x48xf32>
    %c7_348 = arith.constant 7 : index
    %c0_349 = arith.constant 0 : index
    %845 = vector.load %arg5[%c7_348, %c0_349] : memref<9x48xf32, #tpu.memory_space<vmem>>, vector<1x48xf32>
    %846 = vector.shape_cast %845 : vector<1x48xf32> to vector<48xf32>
    %847 = vector.shape_cast %846 : vector<48xf32> to vector<1x48xf32>
    %848 = vector.broadcast %847 : vector<1x48xf32> to vector<16x48xf32>
    %849 = arith.mulf %844, %848 : vector<16x48xf32>
    %850 = arith.addf %843, %849 : vector<16x48xf32>
    %851 = vector.extract_strided_slice %836 {offsets = [2, 0], sizes = [16, 48], strides = [1, 1]} : vector<18x48xf32> to vector<16x48xf32>
    %c8_350 = arith.constant 8 : index
    %c0_351 = arith.constant 0 : index
    %852 = vector.load %arg5[%c8_350, %c0_351] : memref<9x48xf32, #tpu.memory_space<vmem>>, vector<1x48xf32>
    %853 = vector.shape_cast %852 : vector<1x48xf32> to vector<48xf32>
    %854 = vector.shape_cast %853 : vector<48xf32> to vector<1x48xf32>
    %855 = vector.broadcast %854 : vector<1x48xf32> to vector<16x48xf32>
    %856 = arith.mulf %851, %855 : vector<16x48xf32>
    %857 = arith.addf %850, %856 : vector<16x48xf32>
    %c0_352 = arith.constant 0 : index
    %c0_353 = arith.constant 0 : index
    %858 = vector.load %arg6[%c0_352, %c0_353] : memref<1x48xf32, #tpu.memory_space<vmem>>, vector<1x48xf32>
    %859 = vector.shape_cast %858 : vector<1x48xf32> to vector<48xf32>
    %860 = vector.shape_cast %859 : vector<48xf32> to vector<1x48xf32>
    %861 = vector.broadcast %860 : vector<1x48xf32> to vector<16x48xf32>
    %862 = arith.addf %857, %861 : vector<16x48xf32>
    %cst_354 = arith.constant 0.000000e+00 : f32
    %cst_355 = arith.constant 6.000000e+00 : f32
    %863 = vector.broadcast %cst_354 : f32 to vector<16x48xf32>
    %864 = arith.maximumf %863, %862 : vector<16x48xf32>
    %865 = vector.broadcast %cst_355 : f32 to vector<16x48xf32>
    %866 = arith.minimumf %865, %864 : vector<16x48xf32>
    %867 = arith.index_cast %c8_i32 : i32 to index
    %c0_356 = arith.constant 0 : index
    %c0_357 = arith.constant 0 : index
    %868 = vector.load %arg11[%867, %c0_356, %c0_357] : memref<16x16x48xf32, #tpu.memory_space<vmem>>, vector<1x16x48xf32>
    %869 = vector.shape_cast %868 : vector<1x16x48xf32> to vector<16x48xf32>
    %870 = vector.shape_cast %866 : vector<16x48xf32> to vector<1x16x48xf32>
    tpu.vector_store %arg11[%867, %c0_356, %c0_357], %870 {strides = array<i32>} : memref<16x16x48xf32, #tpu.memory_space<vmem>>, vector<1x16x48xf32>,
    %c9_i32 = arith.constant 9 : i32
    %cst_358 = arith.constant 0.000000e+00 : f32
    %871 = vector.broadcast %cst_358 : f32 to vector<16x48xf32>
    %c1_i32_359 = arith.constant 1 : i32
    %872 = arith.muli %c9_i32, %c1_i32_359 : i32
    %c0_i32_360 = arith.constant 0 : i32
    %873 = arith.addi %872, %c0_i32_360 : i32
    %874 = arith.index_cast %873 : i32 to index
    %c0_361 = arith.constant 0 : index
    %c0_362 = arith.constant 0 : index
    %875 = vector.load %arg10[%874, %c0_361, %c0_362] : memref<18x18x48xf32, #tpu.memory_space<vmem>>, vector<1x18x48xf32>
    %876 = vector.shape_cast %875 : vector<1x18x48xf32> to vector<18x48xf32>
    %877 = vector.extract_strided_slice %876 {offsets = [0, 0], sizes = [16, 48], strides = [1, 1]} : vector<18x48xf32> to vector<16x48xf32>
    %c0_363 = arith.constant 0 : index
    %c0_364 = arith.constant 0 : index
    %878 = vector.load %arg5[%c0_363, %c0_364] : memref<9x48xf32, #tpu.memory_space<vmem>>, vector<1x48xf32>
    %879 = vector.shape_cast %878 : vector<1x48xf32> to vector<48xf32>
    %880 = vector.shape_cast %879 : vector<48xf32> to vector<1x48xf32>
    %881 = vector.broadcast %880 : vector<1x48xf32> to vector<16x48xf32>
    %882 = arith.mulf %877, %881 : vector<16x48xf32>
    %883 = arith.addf %871, %882 : vector<16x48xf32>
    %884 = vector.extract_strided_slice %876 {offsets = [1, 0], sizes = [16, 48], strides = [1, 1]} : vector<18x48xf32> to vector<16x48xf32>
    %c1_365 = arith.constant 1 : index
    %c0_366 = arith.constant 0 : index
    %885 = vector.load %arg5[%c1_365, %c0_366] : memref<9x48xf32, #tpu.memory_space<vmem>>, vector<1x48xf32>
    %886 = vector.shape_cast %885 : vector<1x48xf32> to vector<48xf32>
    %887 = vector.shape_cast %886 : vector<48xf32> to vector<1x48xf32>
    %888 = vector.broadcast %887 : vector<1x48xf32> to vector<16x48xf32>
    %889 = arith.mulf %884, %888 : vector<16x48xf32>
    %890 = arith.addf %883, %889 : vector<16x48xf32>
    %891 = vector.extract_strided_slice %876 {offsets = [2, 0], sizes = [16, 48], strides = [1, 1]} : vector<18x48xf32> to vector<16x48xf32>
    %c2_367 = arith.constant 2 : index
    %c0_368 = arith.constant 0 : index
    %892 = vector.load %arg5[%c2_367, %c0_368] : memref<9x48xf32, #tpu.memory_space<vmem>>, vector<1x48xf32>
    %893 = vector.shape_cast %892 : vector<1x48xf32> to vector<48xf32>
    %894 = vector.shape_cast %893 : vector<48xf32> to vector<1x48xf32>
    %895 = vector.broadcast %894 : vector<1x48xf32> to vector<16x48xf32>
    %896 = arith.mulf %891, %895 : vector<16x48xf32>
    %897 = arith.addf %890, %896 : vector<16x48xf32>
    %c1_i32_369 = arith.constant 1 : i32
    %898 = arith.muli %c9_i32, %c1_i32_369 : i32
    %c1_i32_370 = arith.constant 1 : i32
    %899 = arith.addi %898, %c1_i32_370 : i32
    %900 = arith.index_cast %899 : i32 to index
    %c0_371 = arith.constant 0 : index
    %c0_372 = arith.constant 0 : index
    %901 = vector.load %arg10[%900, %c0_371, %c0_372] : memref<18x18x48xf32, #tpu.memory_space<vmem>>, vector<1x18x48xf32>
    %902 = vector.shape_cast %901 : vector<1x18x48xf32> to vector<18x48xf32>
    %903 = vector.extract_strided_slice %902 {offsets = [0, 0], sizes = [16, 48], strides = [1, 1]} : vector<18x48xf32> to vector<16x48xf32>
    %c3_373 = arith.constant 3 : index
    %c0_374 = arith.constant 0 : index
    %904 = vector.load %arg5[%c3_373, %c0_374] : memref<9x48xf32, #tpu.memory_space<vmem>>, vector<1x48xf32>
    %905 = vector.shape_cast %904 : vector<1x48xf32> to vector<48xf32>
    %906 = vector.shape_cast %905 : vector<48xf32> to vector<1x48xf32>
    %907 = vector.broadcast %906 : vector<1x48xf32> to vector<16x48xf32>
    %908 = arith.mulf %903, %907 : vector<16x48xf32>
    %909 = arith.addf %897, %908 : vector<16x48xf32>
    %910 = vector.extract_strided_slice %902 {offsets = [1, 0], sizes = [16, 48], strides = [1, 1]} : vector<18x48xf32> to vector<16x48xf32>
    %c4_375 = arith.constant 4 : index
    %c0_376 = arith.constant 0 : index
    %911 = vector.load %arg5[%c4_375, %c0_376] : memref<9x48xf32, #tpu.memory_space<vmem>>, vector<1x48xf32>
    %912 = vector.shape_cast %911 : vector<1x48xf32> to vector<48xf32>
    %913 = vector.shape_cast %912 : vector<48xf32> to vector<1x48xf32>
    %914 = vector.broadcast %913 : vector<1x48xf32> to vector<16x48xf32>
    %915 = arith.mulf %910, %914 : vector<16x48xf32>
    %916 = arith.addf %909, %915 : vector<16x48xf32>
    %917 = vector.extract_strided_slice %902 {offsets = [2, 0], sizes = [16, 48], strides = [1, 1]} : vector<18x48xf32> to vector<16x48xf32>
    %c5_377 = arith.constant 5 : index
    %c0_378 = arith.constant 0 : index
    %918 = vector.load %arg5[%c5_377, %c0_378] : memref<9x48xf32, #tpu.memory_space<vmem>>, vector<1x48xf32>
    %919 = vector.shape_cast %918 : vector<1x48xf32> to vector<48xf32>
    %920 = vector.shape_cast %919 : vector<48xf32> to vector<1x48xf32>
    %921 = vector.broadcast %920 : vector<1x48xf32> to vector<16x48xf32>
    %922 = arith.mulf %917, %921 : vector<16x48xf32>
    %923 = arith.addf %916, %922 : vector<16x48xf32>
    %c1_i32_379 = arith.constant 1 : i32
    %924 = arith.muli %c9_i32, %c1_i32_379 : i32
    %c2_i32_380 = arith.constant 2 : i32
    %925 = arith.addi %924, %c2_i32_380 : i32
    %926 = arith.index_cast %925 : i32 to index
    %c0_381 = arith.constant 0 : index
    %c0_382 = arith.constant 0 : index
    %927 = vector.load %arg10[%926, %c0_381, %c0_382] : memref<18x18x48xf32, #tpu.memory_space<vmem>>, vector<1x18x48xf32>
    %928 = vector.shape_cast %927 : vector<1x18x48xf32> to vector<18x48xf32>
    %929 = vector.extract_strided_slice %928 {offsets = [0, 0], sizes = [16, 48], strides = [1, 1]} : vector<18x48xf32> to vector<16x48xf32>
    %c6_383 = arith.constant 6 : index
    %c0_384 = arith.constant 0 : index
    %930 = vector.load %arg5[%c6_383, %c0_384] : memref<9x48xf32, #tpu.memory_space<vmem>>, vector<1x48xf32>
    %931 = vector.shape_cast %930 : vector<1x48xf32> to vector<48xf32>
    %932 = vector.shape_cast %931 : vector<48xf32> to vector<1x48xf32>
    %933 = vector.broadcast %932 : vector<1x48xf32> to vector<16x48xf32>
    %934 = arith.mulf %929, %933 : vector<16x48xf32>
    %935 = arith.addf %923, %934 : vector<16x48xf32>
    %936 = vector.extract_strided_slice %928 {offsets = [1, 0], sizes = [16, 48], strides = [1, 1]} : vector<18x48xf32> to vector<16x48xf32>
    %c7_385 = arith.constant 7 : index
    %c0_386 = arith.constant 0 : index
    %937 = vector.load %arg5[%c7_385, %c0_386] : memref<9x48xf32, #tpu.memory_space<vmem>>, vector<1x48xf32>
    %938 = vector.shape_cast %937 : vector<1x48xf32> to vector<48xf32>
    %939 = vector.shape_cast %938 : vector<48xf32> to vector<1x48xf32>
    %940 = vector.broadcast %939 : vector<1x48xf32> to vector<16x48xf32>
    %941 = arith.mulf %936, %940 : vector<16x48xf32>
    %942 = arith.addf %935, %941 : vector<16x48xf32>
    %943 = vector.extract_strided_slice %928 {offsets = [2, 0], sizes = [16, 48], strides = [1, 1]} : vector<18x48xf32> to vector<16x48xf32>
    %c8_387 = arith.constant 8 : index
    %c0_388 = arith.constant 0 : index
    %944 = vector.load %arg5[%c8_387, %c0_388] : memref<9x48xf32, #tpu.memory_space<vmem>>, vector<1x48xf32>
    %945 = vector.shape_cast %944 : vector<1x48xf32> to vector<48xf32>
    %946 = vector.shape_cast %945 : vector<48xf32> to vector<1x48xf32>
    %947 = vector.broadcast %946 : vector<1x48xf32> to vector<16x48xf32>
    %948 = arith.mulf %943, %947 : vector<16x48xf32>
    %949 = arith.addf %942, %948 : vector<16x48xf32>
    %c0_389 = arith.constant 0 : index
    %c0_390 = arith.constant 0 : index
    %950 = vector.load %arg6[%c0_389, %c0_390] : memref<1x48xf32, #tpu.memory_space<vmem>>, vector<1x48xf32>
    %951 = vector.shape_cast %950 : vector<1x48xf32> to vector<48xf32>
    %952 = vector.shape_cast %951 : vector<48xf32> to vector<1x48xf32>
    %953 = vector.broadcast %952 : vector<1x48xf32> to vector<16x48xf32>
    %954 = arith.addf %949, %953 : vector<16x48xf32>
    %cst_391 = arith.constant 0.000000e+00 : f32
    %cst_392 = arith.constant 6.000000e+00 : f32
    %955 = vector.broadcast %cst_391 : f32 to vector<16x48xf32>
    %956 = arith.maximumf %955, %954 : vector<16x48xf32>
    %957 = vector.broadcast %cst_392 : f32 to vector<16x48xf32>
    %958 = arith.minimumf %957, %956 : vector<16x48xf32>
    %959 = arith.index_cast %c9_i32 : i32 to index
    %c0_393 = arith.constant 0 : index
    %c0_394 = arith.constant 0 : index
    %960 = vector.load %arg11[%959, %c0_393, %c0_394] : memref<16x16x48xf32, #tpu.memory_space<vmem>>, vector<1x16x48xf32>
    %961 = vector.shape_cast %960 : vector<1x16x48xf32> to vector<16x48xf32>
    %962 = vector.shape_cast %958 : vector<16x48xf32> to vector<1x16x48xf32>
    tpu.vector_store %arg11[%959, %c0_393, %c0_394], %962 {strides = array<i32>} : memref<16x16x48xf32, #tpu.memory_space<vmem>>, vector<1x16x48xf32>,
    %c10_i32 = arith.constant 10 : i32
    %cst_395 = arith.constant 0.000000e+00 : f32
    %963 = vector.broadcast %cst_395 : f32 to vector<16x48xf32>
    %c1_i32_396 = arith.constant 1 : i32
    %964 = arith.muli %c10_i32, %c1_i32_396 : i32
    %c0_i32_397 = arith.constant 0 : i32
    %965 = arith.addi %964, %c0_i32_397 : i32
    %966 = arith.index_cast %965 : i32 to index
    %c0_398 = arith.constant 0 : index
    %c0_399 = arith.constant 0 : index
    %967 = vector.load %arg10[%966, %c0_398, %c0_399] : memref<18x18x48xf32, #tpu.memory_space<vmem>>, vector<1x18x48xf32>
    %968 = vector.shape_cast %967 : vector<1x18x48xf32> to vector<18x48xf32>
    %969 = vector.extract_strided_slice %968 {offsets = [0, 0], sizes = [16, 48], strides = [1, 1]} : vector<18x48xf32> to vector<16x48xf32>
    %c0_400 = arith.constant 0 : index
    %c0_401 = arith.constant 0 : index
    %970 = vector.load %arg5[%c0_400, %c0_401] : memref<9x48xf32, #tpu.memory_space<vmem>>, vector<1x48xf32>
    %971 = vector.shape_cast %970 : vector<1x48xf32> to vector<48xf32>
    %972 = vector.shape_cast %971 : vector<48xf32> to vector<1x48xf32>
    %973 = vector.broadcast %972 : vector<1x48xf32> to vector<16x48xf32>
    %974 = arith.mulf %969, %973 : vector<16x48xf32>
    %975 = arith.addf %963, %974 : vector<16x48xf32>
    %976 = vector.extract_strided_slice %968 {offsets = [1, 0], sizes = [16, 48], strides = [1, 1]} : vector<18x48xf32> to vector<16x48xf32>
    %c1_402 = arith.constant 1 : index
    %c0_403 = arith.constant 0 : index
    %977 = vector.load %arg5[%c1_402, %c0_403] : memref<9x48xf32, #tpu.memory_space<vmem>>, vector<1x48xf32>
    %978 = vector.shape_cast %977 : vector<1x48xf32> to vector<48xf32>
    %979 = vector.shape_cast %978 : vector<48xf32> to vector<1x48xf32>
    %980 = vector.broadcast %979 : vector<1x48xf32> to vector<16x48xf32>
    %981 = arith.mulf %976, %980 : vector<16x48xf32>
    %982 = arith.addf %975, %981 : vector<16x48xf32>
    %983 = vector.extract_strided_slice %968 {offsets = [2, 0], sizes = [16, 48], strides = [1, 1]} : vector<18x48xf32> to vector<16x48xf32>
    %c2_404 = arith.constant 2 : index
    %c0_405 = arith.constant 0 : index
    %984 = vector.load %arg5[%c2_404, %c0_405] : memref<9x48xf32, #tpu.memory_space<vmem>>, vector<1x48xf32>
    %985 = vector.shape_cast %984 : vector<1x48xf32> to vector<48xf32>
    %986 = vector.shape_cast %985 : vector<48xf32> to vector<1x48xf32>
    %987 = vector.broadcast %986 : vector<1x48xf32> to vector<16x48xf32>
    %988 = arith.mulf %983, %987 : vector<16x48xf32>
    %989 = arith.addf %982, %988 : vector<16x48xf32>
    %c1_i32_406 = arith.constant 1 : i32
    %990 = arith.muli %c10_i32, %c1_i32_406 : i32
    %c1_i32_407 = arith.constant 1 : i32
    %991 = arith.addi %990, %c1_i32_407 : i32
    %992 = arith.index_cast %991 : i32 to index
    %c0_408 = arith.constant 0 : index
    %c0_409 = arith.constant 0 : index
    %993 = vector.load %arg10[%992, %c0_408, %c0_409] : memref<18x18x48xf32, #tpu.memory_space<vmem>>, vector<1x18x48xf32>
    %994 = vector.shape_cast %993 : vector<1x18x48xf32> to vector<18x48xf32>
    %995 = vector.extract_strided_slice %994 {offsets = [0, 0], sizes = [16, 48], strides = [1, 1]} : vector<18x48xf32> to vector<16x48xf32>
    %c3_410 = arith.constant 3 : index
    %c0_411 = arith.constant 0 : index
    %996 = vector.load %arg5[%c3_410, %c0_411] : memref<9x48xf32, #tpu.memory_space<vmem>>, vector<1x48xf32>
    %997 = vector.shape_cast %996 : vector<1x48xf32> to vector<48xf32>
    %998 = vector.shape_cast %997 : vector<48xf32> to vector<1x48xf32>
    %999 = vector.broadcast %998 : vector<1x48xf32> to vector<16x48xf32>
    %1000 = arith.mulf %995, %999 : vector<16x48xf32>
    %1001 = arith.addf %989, %1000 : vector<16x48xf32>
    %1002 = vector.extract_strided_slice %994 {offsets = [1, 0], sizes = [16, 48], strides = [1, 1]} : vector<18x48xf32> to vector<16x48xf32>
    %c4_412 = arith.constant 4 : index
    %c0_413 = arith.constant 0 : index
    %1003 = vector.load %arg5[%c4_412, %c0_413] : memref<9x48xf32, #tpu.memory_space<vmem>>, vector<1x48xf32>
    %1004 = vector.shape_cast %1003 : vector<1x48xf32> to vector<48xf32>
    %1005 = vector.shape_cast %1004 : vector<48xf32> to vector<1x48xf32>
    %1006 = vector.broadcast %1005 : vector<1x48xf32> to vector<16x48xf32>
    %1007 = arith.mulf %1002, %1006 : vector<16x48xf32>
    %1008 = arith.addf %1001, %1007 : vector<16x48xf32>
    %1009 = vector.extract_strided_slice %994 {offsets = [2, 0], sizes = [16, 48], strides = [1, 1]} : vector<18x48xf32> to vector<16x48xf32>
    %c5_414 = arith.constant 5 : index
    %c0_415 = arith.constant 0 : index
    %1010 = vector.load %arg5[%c5_414, %c0_415] : memref<9x48xf32, #tpu.memory_space<vmem>>, vector<1x48xf32>
    %1011 = vector.shape_cast %1010 : vector<1x48xf32> to vector<48xf32>
    %1012 = vector.shape_cast %1011 : vector<48xf32> to vector<1x48xf32>
    %1013 = vector.broadcast %1012 : vector<1x48xf32> to vector<16x48xf32>
    %1014 = arith.mulf %1009, %1013 : vector<16x48xf32>
    %1015 = arith.addf %1008, %1014 : vector<16x48xf32>
    %c1_i32_416 = arith.constant 1 : i32
    %1016 = arith.muli %c10_i32, %c1_i32_416 : i32
    %c2_i32_417 = arith.constant 2 : i32
    %1017 = arith.addi %1016, %c2_i32_417 : i32
    %1018 = arith.index_cast %1017 : i32 to index
    %c0_418 = arith.constant 0 : index
    %c0_419 = arith.constant 0 : index
    %1019 = vector.load %arg10[%1018, %c0_418, %c0_419] : memref<18x18x48xf32, #tpu.memory_space<vmem>>, vector<1x18x48xf32>
    %1020 = vector.shape_cast %1019 : vector<1x18x48xf32> to vector<18x48xf32>
    %1021 = vector.extract_strided_slice %1020 {offsets = [0, 0], sizes = [16, 48], strides = [1, 1]} : vector<18x48xf32> to vector<16x48xf32>
    %c6_420 = arith.constant 6 : index
    %c0_421 = arith.constant 0 : index
    %1022 = vector.load %arg5[%c6_420, %c0_421] : memref<9x48xf32, #tpu.memory_space<vmem>>, vector<1x48xf32>
    %1023 = vector.shape_cast %1022 : vector<1x48xf32> to vector<48xf32>
    %1024 = vector.shape_cast %1023 : vector<48xf32> to vector<1x48xf32>
    %1025 = vector.broadcast %1024 : vector<1x48xf32> to vector<16x48xf32>
    %1026 = arith.mulf %1021, %1025 : vector<16x48xf32>
    %1027 = arith.addf %1015, %1026 : vector<16x48xf32>
    %1028 = vector.extract_strided_slice %1020 {offsets = [1, 0], sizes = [16, 48], strides = [1, 1]} : vector<18x48xf32> to vector<16x48xf32>
    %c7_422 = arith.constant 7 : index
    %c0_423 = arith.constant 0 : index
    %1029 = vector.load %arg5[%c7_422, %c0_423] : memref<9x48xf32, #tpu.memory_space<vmem>>, vector<1x48xf32>
    %1030 = vector.shape_cast %1029 : vector<1x48xf32> to vector<48xf32>
    %1031 = vector.shape_cast %1030 : vector<48xf32> to vector<1x48xf32>
    %1032 = vector.broadcast %1031 : vector<1x48xf32> to vector<16x48xf32>
    %1033 = arith.mulf %1028, %1032 : vector<16x48xf32>
    %1034 = arith.addf %1027, %1033 : vector<16x48xf32>
    %1035 = vector.extract_strided_slice %1020 {offsets = [2, 0], sizes = [16, 48], strides = [1, 1]} : vector<18x48xf32> to vector<16x48xf32>
    %c8_424 = arith.constant 8 : index
    %c0_425 = arith.constant 0 : index
    %1036 = vector.load %arg5[%c8_424, %c0_425] : memref<9x48xf32, #tpu.memory_space<vmem>>, vector<1x48xf32>
    %1037 = vector.shape_cast %1036 : vector<1x48xf32> to vector<48xf32>
    %1038 = vector.shape_cast %1037 : vector<48xf32> to vector<1x48xf32>
    %1039 = vector.broadcast %1038 : vector<1x48xf32> to vector<16x48xf32>
    %1040 = arith.mulf %1035, %1039 : vector<16x48xf32>
    %1041 = arith.addf %1034, %1040 : vector<16x48xf32>
    %c0_426 = arith.constant 0 : index
    %c0_427 = arith.constant 0 : index
    %1042 = vector.load %arg6[%c0_426, %c0_427] : memref<1x48xf32, #tpu.memory_space<vmem>>, vector<1x48xf32>
    %1043 = vector.shape_cast %1042 : vector<1x48xf32> to vector<48xf32>
    %1044 = vector.shape_cast %1043 : vector<48xf32> to vector<1x48xf32>
    %1045 = vector.broadcast %1044 : vector<1x48xf32> to vector<16x48xf32>
    %1046 = arith.addf %1041, %1045 : vector<16x48xf32>
    %cst_428 = arith.constant 0.000000e+00 : f32
    %cst_429 = arith.constant 6.000000e+00 : f32
    %1047 = vector.broadcast %cst_428 : f32 to vector<16x48xf32>
    %1048 = arith.maximumf %1047, %1046 : vector<16x48xf32>
    %1049 = vector.broadcast %cst_429 : f32 to vector<16x48xf32>
    %1050 = arith.minimumf %1049, %1048 : vector<16x48xf32>
    %1051 = arith.index_cast %c10_i32 : i32 to index
    %c0_430 = arith.constant 0 : index
    %c0_431 = arith.constant 0 : index
    %1052 = vector.load %arg11[%1051, %c0_430, %c0_431] : memref<16x16x48xf32, #tpu.memory_space<vmem>>, vector<1x16x48xf32>
    %1053 = vector.shape_cast %1052 : vector<1x16x48xf32> to vector<16x48xf32>
    %1054 = vector.shape_cast %1050 : vector<16x48xf32> to vector<1x16x48xf32>
    tpu.vector_store %arg11[%1051, %c0_430, %c0_431], %1054 {strides = array<i32>} : memref<16x16x48xf32, #tpu.memory_space<vmem>>, vector<1x16x48xf32>,
    %c11_i32 = arith.constant 11 : i32
    %cst_432 = arith.constant 0.000000e+00 : f32
    %1055 = vector.broadcast %cst_432 : f32 to vector<16x48xf32>
    %c1_i32_433 = arith.constant 1 : i32
    %1056 = arith.muli %c11_i32, %c1_i32_433 : i32
    %c0_i32_434 = arith.constant 0 : i32
    %1057 = arith.addi %1056, %c0_i32_434 : i32
    %1058 = arith.index_cast %1057 : i32 to index
    %c0_435 = arith.constant 0 : index
    %c0_436 = arith.constant 0 : index
    %1059 = vector.load %arg10[%1058, %c0_435, %c0_436] : memref<18x18x48xf32, #tpu.memory_space<vmem>>, vector<1x18x48xf32>
    %1060 = vector.shape_cast %1059 : vector<1x18x48xf32> to vector<18x48xf32>
    %1061 = vector.extract_strided_slice %1060 {offsets = [0, 0], sizes = [16, 48], strides = [1, 1]} : vector<18x48xf32> to vector<16x48xf32>
    %c0_437 = arith.constant 0 : index
    %c0_438 = arith.constant 0 : index
    %1062 = vector.load %arg5[%c0_437, %c0_438] : memref<9x48xf32, #tpu.memory_space<vmem>>, vector<1x48xf32>
    %1063 = vector.shape_cast %1062 : vector<1x48xf32> to vector<48xf32>
    %1064 = vector.shape_cast %1063 : vector<48xf32> to vector<1x48xf32>
    %1065 = vector.broadcast %1064 : vector<1x48xf32> to vector<16x48xf32>
    %1066 = arith.mulf %1061, %1065 : vector<16x48xf32>
    %1067 = arith.addf %1055, %1066 : vector<16x48xf32>
    %1068 = vector.extract_strided_slice %1060 {offsets = [1, 0], sizes = [16, 48], strides = [1, 1]} : vector<18x48xf32> to vector<16x48xf32>
    %c1_439 = arith.constant 1 : index
    %c0_440 = arith.constant 0 : index
    %1069 = vector.load %arg5[%c1_439, %c0_440] : memref<9x48xf32, #tpu.memory_space<vmem>>, vector<1x48xf32>
    %1070 = vector.shape_cast %1069 : vector<1x48xf32> to vector<48xf32>
    %1071 = vector.shape_cast %1070 : vector<48xf32> to vector<1x48xf32>
    %1072 = vector.broadcast %1071 : vector<1x48xf32> to vector<16x48xf32>
    %1073 = arith.mulf %1068, %1072 : vector<16x48xf32>
    %1074 = arith.addf %1067, %1073 : vector<16x48xf32>
    %1075 = vector.extract_strided_slice %1060 {offsets = [2, 0], sizes = [16, 48], strides = [1, 1]} : vector<18x48xf32> to vector<16x48xf32>
    %c2_441 = arith.constant 2 : index
    %c0_442 = arith.constant 0 : index
    %1076 = vector.load %arg5[%c2_441, %c0_442] : memref<9x48xf32, #tpu.memory_space<vmem>>, vector<1x48xf32>
    %1077 = vector.shape_cast %1076 : vector<1x48xf32> to vector<48xf32>
    %1078 = vector.shape_cast %1077 : vector<48xf32> to vector<1x48xf32>
    %1079 = vector.broadcast %1078 : vector<1x48xf32> to vector<16x48xf32>
    %1080 = arith.mulf %1075, %1079 : vector<16x48xf32>
    %1081 = arith.addf %1074, %1080 : vector<16x48xf32>
    %c1_i32_443 = arith.constant 1 : i32
    %1082 = arith.muli %c11_i32, %c1_i32_443 : i32
    %c1_i32_444 = arith.constant 1 : i32
    %1083 = arith.addi %1082, %c1_i32_444 : i32
    %1084 = arith.index_cast %1083 : i32 to index
    %c0_445 = arith.constant 0 : index
    %c0_446 = arith.constant 0 : index
    %1085 = vector.load %arg10[%1084, %c0_445, %c0_446] : memref<18x18x48xf32, #tpu.memory_space<vmem>>, vector<1x18x48xf32>
    %1086 = vector.shape_cast %1085 : vector<1x18x48xf32> to vector<18x48xf32>
    %1087 = vector.extract_strided_slice %1086 {offsets = [0, 0], sizes = [16, 48], strides = [1, 1]} : vector<18x48xf32> to vector<16x48xf32>
    %c3_447 = arith.constant 3 : index
    %c0_448 = arith.constant 0 : index
    %1088 = vector.load %arg5[%c3_447, %c0_448] : memref<9x48xf32, #tpu.memory_space<vmem>>, vector<1x48xf32>
    %1089 = vector.shape_cast %1088 : vector<1x48xf32> to vector<48xf32>
    %1090 = vector.shape_cast %1089 : vector<48xf32> to vector<1x48xf32>
    %1091 = vector.broadcast %1090 : vector<1x48xf32> to vector<16x48xf32>
    %1092 = arith.mulf %1087, %1091 : vector<16x48xf32>
    %1093 = arith.addf %1081, %1092 : vector<16x48xf32>
    %1094 = vector.extract_strided_slice %1086 {offsets = [1, 0], sizes = [16, 48], strides = [1, 1]} : vector<18x48xf32> to vector<16x48xf32>
    %c4_449 = arith.constant 4 : index
    %c0_450 = arith.constant 0 : index
    %1095 = vector.load %arg5[%c4_449, %c0_450] : memref<9x48xf32, #tpu.memory_space<vmem>>, vector<1x48xf32>
    %1096 = vector.shape_cast %1095 : vector<1x48xf32> to vector<48xf32>
    %1097 = vector.shape_cast %1096 : vector<48xf32> to vector<1x48xf32>
    %1098 = vector.broadcast %1097 : vector<1x48xf32> to vector<16x48xf32>
    %1099 = arith.mulf %1094, %1098 : vector<16x48xf32>
    %1100 = arith.addf %1093, %1099 : vector<16x48xf32>
    %1101 = vector.extract_strided_slice %1086 {offsets = [2, 0], sizes = [16, 48], strides = [1, 1]} : vector<18x48xf32> to vector<16x48xf32>
    %c5_451 = arith.constant 5 : index
    %c0_452 = arith.constant 0 : index
    %1102 = vector.load %arg5[%c5_451, %c0_452] : memref<9x48xf32, #tpu.memory_space<vmem>>, vector<1x48xf32>
    %1103 = vector.shape_cast %1102 : vector<1x48xf32> to vector<48xf32>
    %1104 = vector.shape_cast %1103 : vector<48xf32> to vector<1x48xf32>
    %1105 = vector.broadcast %1104 : vector<1x48xf32> to vector<16x48xf32>
    %1106 = arith.mulf %1101, %1105 : vector<16x48xf32>
    %1107 = arith.addf %1100, %1106 : vector<16x48xf32>
    %c1_i32_453 = arith.constant 1 : i32
    %1108 = arith.muli %c11_i32, %c1_i32_453 : i32
    %c2_i32_454 = arith.constant 2 : i32
    %1109 = arith.addi %1108, %c2_i32_454 : i32
    %1110 = arith.index_cast %1109 : i32 to index
    %c0_455 = arith.constant 0 : index
    %c0_456 = arith.constant 0 : index
    %1111 = vector.load %arg10[%1110, %c0_455, %c0_456] : memref<18x18x48xf32, #tpu.memory_space<vmem>>, vector<1x18x48xf32>
    %1112 = vector.shape_cast %1111 : vector<1x18x48xf32> to vector<18x48xf32>
    %1113 = vector.extract_strided_slice %1112 {offsets = [0, 0], sizes = [16, 48], strides = [1, 1]} : vector<18x48xf32> to vector<16x48xf32>
    %c6_457 = arith.constant 6 : index
    %c0_458 = arith.constant 0 : index
    %1114 = vector.load %arg5[%c6_457, %c0_458] : memref<9x48xf32, #tpu.memory_space<vmem>>, vector<1x48xf32>
    %1115 = vector.shape_cast %1114 : vector<1x48xf32> to vector<48xf32>
    %1116 = vector.shape_cast %1115 : vector<48xf32> to vector<1x48xf32>
    %1117 = vector.broadcast %1116 : vector<1x48xf32> to vector<16x48xf32>
    %1118 = arith.mulf %1113, %1117 : vector<16x48xf32>
    %1119 = arith.addf %1107, %1118 : vector<16x48xf32>
    %1120 = vector.extract_strided_slice %1112 {offsets = [1, 0], sizes = [16, 48], strides = [1, 1]} : vector<18x48xf32> to vector<16x48xf32>
    %c7_459 = arith.constant 7 : index
    %c0_460 = arith.constant 0 : index
    %1121 = vector.load %arg5[%c7_459, %c0_460] : memref<9x48xf32, #tpu.memory_space<vmem>>, vector<1x48xf32>
    %1122 = vector.shape_cast %1121 : vector<1x48xf32> to vector<48xf32>
    %1123 = vector.shape_cast %1122 : vector<48xf32> to vector<1x48xf32>
    %1124 = vector.broadcast %1123 : vector<1x48xf32> to vector<16x48xf32>
    %1125 = arith.mulf %1120, %1124 : vector<16x48xf32>
    %1126 = arith.addf %1119, %1125 : vector<16x48xf32>
    %1127 = vector.extract_strided_slice %1112 {offsets = [2, 0], sizes = [16, 48], strides = [1, 1]} : vector<18x48xf32> to vector<16x48xf32>
    %c8_461 = arith.constant 8 : index
    %c0_462 = arith.constant 0 : index
    %1128 = vector.load %arg5[%c8_461, %c0_462] : memref<9x48xf32, #tpu.memory_space<vmem>>, vector<1x48xf32>
    %1129 = vector.shape_cast %1128 : vector<1x48xf32> to vector<48xf32>
    %1130 = vector.shape_cast %1129 : vector<48xf32> to vector<1x48xf32>
    %1131 = vector.broadcast %1130 : vector<1x48xf32> to vector<16x48xf32>
    %1132 = arith.mulf %1127, %1131 : vector<16x48xf32>
    %1133 = arith.addf %1126, %1132 : vector<16x48xf32>
    %c0_463 = arith.constant 0 : index
    %c0_464 = arith.constant 0 : index
    %1134 = vector.load %arg6[%c0_463, %c0_464] : memref<1x48xf32, #tpu.memory_space<vmem>>, vector<1x48xf32>
    %1135 = vector.shape_cast %1134 : vector<1x48xf32> to vector<48xf32>
    %1136 = vector.shape_cast %1135 : vector<48xf32> to vector<1x48xf32>
    %1137 = vector.broadcast %1136 : vector<1x48xf32> to vector<16x48xf32>
    %1138 = arith.addf %1133, %1137 : vector<16x48xf32>
    %cst_465 = arith.constant 0.000000e+00 : f32
    %cst_466 = arith.constant 6.000000e+00 : f32
    %1139 = vector.broadcast %cst_465 : f32 to vector<16x48xf32>
    %1140 = arith.maximumf %1139, %1138 : vector<16x48xf32>
    %1141 = vector.broadcast %cst_466 : f32 to vector<16x48xf32>
    %1142 = arith.minimumf %1141, %1140 : vector<16x48xf32>
    %1143 = arith.index_cast %c11_i32 : i32 to index
    %c0_467 = arith.constant 0 : index
    %c0_468 = arith.constant 0 : index
    %1144 = vector.load %arg11[%1143, %c0_467, %c0_468] : memref<16x16x48xf32, #tpu.memory_space<vmem>>, vector<1x16x48xf32>
    %1145 = vector.shape_cast %1144 : vector<1x16x48xf32> to vector<16x48xf32>
    %1146 = vector.shape_cast %1142 : vector<16x48xf32> to vector<1x16x48xf32>
    tpu.vector_store %arg11[%1143, %c0_467, %c0_468], %1146 {strides = array<i32>} : memref<16x16x48xf32, #tpu.memory_space<vmem>>, vector<1x16x48xf32>,
    %c12_i32 = arith.constant 12 : i32
    %cst_469 = arith.constant 0.000000e+00 : f32
    %1147 = vector.broadcast %cst_469 : f32 to vector<16x48xf32>
    %c1_i32_470 = arith.constant 1 : i32
    %1148 = arith.muli %c12_i32, %c1_i32_470 : i32
    %c0_i32_471 = arith.constant 0 : i32
    %1149 = arith.addi %1148, %c0_i32_471 : i32
    %1150 = arith.index_cast %1149 : i32 to index
    %c0_472 = arith.constant 0 : index
    %c0_473 = arith.constant 0 : index
    %1151 = vector.load %arg10[%1150, %c0_472, %c0_473] : memref<18x18x48xf32, #tpu.memory_space<vmem>>, vector<1x18x48xf32>
    %1152 = vector.shape_cast %1151 : vector<1x18x48xf32> to vector<18x48xf32>
    %1153 = vector.extract_strided_slice %1152 {offsets = [0, 0], sizes = [16, 48], strides = [1, 1]} : vector<18x48xf32> to vector<16x48xf32>
    %c0_474 = arith.constant 0 : index
    %c0_475 = arith.constant 0 : index
    %1154 = vector.load %arg5[%c0_474, %c0_475] : memref<9x48xf32, #tpu.memory_space<vmem>>, vector<1x48xf32>
    %1155 = vector.shape_cast %1154 : vector<1x48xf32> to vector<48xf32>
    %1156 = vector.shape_cast %1155 : vector<48xf32> to vector<1x48xf32>
    %1157 = vector.broadcast %1156 : vector<1x48xf32> to vector<16x48xf32>
    %1158 = arith.mulf %1153, %1157 : vector<16x48xf32>
    %1159 = arith.addf %1147, %1158 : vector<16x48xf32>
    %1160 = vector.extract_strided_slice %1152 {offsets = [1, 0], sizes = [16, 48], strides = [1, 1]} : vector<18x48xf32> to vector<16x48xf32>
    %c1_476 = arith.constant 1 : index
    %c0_477 = arith.constant 0 : index
    %1161 = vector.load %arg5[%c1_476, %c0_477] : memref<9x48xf32, #tpu.memory_space<vmem>>, vector<1x48xf32>
    %1162 = vector.shape_cast %1161 : vector<1x48xf32> to vector<48xf32>
    %1163 = vector.shape_cast %1162 : vector<48xf32> to vector<1x48xf32>
    %1164 = vector.broadcast %1163 : vector<1x48xf32> to vector<16x48xf32>
    %1165 = arith.mulf %1160, %1164 : vector<16x48xf32>
    %1166 = arith.addf %1159, %1165 : vector<16x48xf32>
    %1167 = vector.extract_strided_slice %1152 {offsets = [2, 0], sizes = [16, 48], strides = [1, 1]} : vector<18x48xf32> to vector<16x48xf32>
    %c2_478 = arith.constant 2 : index
    %c0_479 = arith.constant 0 : index
    %1168 = vector.load %arg5[%c2_478, %c0_479] : memref<9x48xf32, #tpu.memory_space<vmem>>, vector<1x48xf32>
    %1169 = vector.shape_cast %1168 : vector<1x48xf32> to vector<48xf32>
    %1170 = vector.shape_cast %1169 : vector<48xf32> to vector<1x48xf32>
    %1171 = vector.broadcast %1170 : vector<1x48xf32> to vector<16x48xf32>
    %1172 = arith.mulf %1167, %1171 : vector<16x48xf32>
    %1173 = arith.addf %1166, %1172 : vector<16x48xf32>
    %c1_i32_480 = arith.constant 1 : i32
    %1174 = arith.muli %c12_i32, %c1_i32_480 : i32
    %c1_i32_481 = arith.constant 1 : i32
    %1175 = arith.addi %1174, %c1_i32_481 : i32
    %1176 = arith.index_cast %1175 : i32 to index
    %c0_482 = arith.constant 0 : index
    %c0_483 = arith.constant 0 : index
    %1177 = vector.load %arg10[%1176, %c0_482, %c0_483] : memref<18x18x48xf32, #tpu.memory_space<vmem>>, vector<1x18x48xf32>
    %1178 = vector.shape_cast %1177 : vector<1x18x48xf32> to vector<18x48xf32>
    %1179 = vector.extract_strided_slice %1178 {offsets = [0, 0], sizes = [16, 48], strides = [1, 1]} : vector<18x48xf32> to vector<16x48xf32>
    %c3_484 = arith.constant 3 : index
    %c0_485 = arith.constant 0 : index
    %1180 = vector.load %arg5[%c3_484, %c0_485] : memref<9x48xf32, #tpu.memory_space<vmem>>, vector<1x48xf32>
    %1181 = vector.shape_cast %1180 : vector<1x48xf32> to vector<48xf32>
    %1182 = vector.shape_cast %1181 : vector<48xf32> to vector<1x48xf32>
    %1183 = vector.broadcast %1182 : vector<1x48xf32> to vector<16x48xf32>
    %1184 = arith.mulf %1179, %1183 : vector<16x48xf32>
    %1185 = arith.addf %1173, %1184 : vector<16x48xf32>
    %1186 = vector.extract_strided_slice %1178 {offsets = [1, 0], sizes = [16, 48], strides = [1, 1]} : vector<18x48xf32> to vector<16x48xf32>
    %c4_486 = arith.constant 4 : index
    %c0_487 = arith.constant 0 : index
    %1187 = vector.load %arg5[%c4_486, %c0_487] : memref<9x48xf32, #tpu.memory_space<vmem>>, vector<1x48xf32>
    %1188 = vector.shape_cast %1187 : vector<1x48xf32> to vector<48xf32>
    %1189 = vector.shape_cast %1188 : vector<48xf32> to vector<1x48xf32>
    %1190 = vector.broadcast %1189 : vector<1x48xf32> to vector<16x48xf32>
    %1191 = arith.mulf %1186, %1190 : vector<16x48xf32>
    %1192 = arith.addf %1185, %1191 : vector<16x48xf32>
    %1193 = vector.extract_strided_slice %1178 {offsets = [2, 0], sizes = [16, 48], strides = [1, 1]} : vector<18x48xf32> to vector<16x48xf32>
    %c5_488 = arith.constant 5 : index
    %c0_489 = arith.constant 0 : index
    %1194 = vector.load %arg5[%c5_488, %c0_489] : memref<9x48xf32, #tpu.memory_space<vmem>>, vector<1x48xf32>
    %1195 = vector.shape_cast %1194 : vector<1x48xf32> to vector<48xf32>
    %1196 = vector.shape_cast %1195 : vector<48xf32> to vector<1x48xf32>
    %1197 = vector.broadcast %1196 : vector<1x48xf32> to vector<16x48xf32>
    %1198 = arith.mulf %1193, %1197 : vector<16x48xf32>
    %1199 = arith.addf %1192, %1198 : vector<16x48xf32>
    %c1_i32_490 = arith.constant 1 : i32
    %1200 = arith.muli %c12_i32, %c1_i32_490 : i32
    %c2_i32_491 = arith.constant 2 : i32
    %1201 = arith.addi %1200, %c2_i32_491 : i32
    %1202 = arith.index_cast %1201 : i32 to index
    %c0_492 = arith.constant 0 : index
    %c0_493 = arith.constant 0 : index
    %1203 = vector.load %arg10[%1202, %c0_492, %c0_493] : memref<18x18x48xf32, #tpu.memory_space<vmem>>, vector<1x18x48xf32>
    %1204 = vector.shape_cast %1203 : vector<1x18x48xf32> to vector<18x48xf32>
    %1205 = vector.extract_strided_slice %1204 {offsets = [0, 0], sizes = [16, 48], strides = [1, 1]} : vector<18x48xf32> to vector<16x48xf32>
    %c6_494 = arith.constant 6 : index
    %c0_495 = arith.constant 0 : index
    %1206 = vector.load %arg5[%c6_494, %c0_495] : memref<9x48xf32, #tpu.memory_space<vmem>>, vector<1x48xf32>
    %1207 = vector.shape_cast %1206 : vector<1x48xf32> to vector<48xf32>
    %1208 = vector.shape_cast %1207 : vector<48xf32> to vector<1x48xf32>
    %1209 = vector.broadcast %1208 : vector<1x48xf32> to vector<16x48xf32>
    %1210 = arith.mulf %1205, %1209 : vector<16x48xf32>
    %1211 = arith.addf %1199, %1210 : vector<16x48xf32>
    %1212 = vector.extract_strided_slice %1204 {offsets = [1, 0], sizes = [16, 48], strides = [1, 1]} : vector<18x48xf32> to vector<16x48xf32>
    %c7_496 = arith.constant 7 : index
    %c0_497 = arith.constant 0 : index
    %1213 = vector.load %arg5[%c7_496, %c0_497] : memref<9x48xf32, #tpu.memory_space<vmem>>, vector<1x48xf32>
    %1214 = vector.shape_cast %1213 : vector<1x48xf32> to vector<48xf32>
    %1215 = vector.shape_cast %1214 : vector<48xf32> to vector<1x48xf32>
    %1216 = vector.broadcast %1215 : vector<1x48xf32> to vector<16x48xf32>
    %1217 = arith.mulf %1212, %1216 : vector<16x48xf32>
    %1218 = arith.addf %1211, %1217 : vector<16x48xf32>
    %1219 = vector.extract_strided_slice %1204 {offsets = [2, 0], sizes = [16, 48], strides = [1, 1]} : vector<18x48xf32> to vector<16x48xf32>
    %c8_498 = arith.constant 8 : index
    %c0_499 = arith.constant 0 : index
    %1220 = vector.load %arg5[%c8_498, %c0_499] : memref<9x48xf32, #tpu.memory_space<vmem>>, vector<1x48xf32>
    %1221 = vector.shape_cast %1220 : vector<1x48xf32> to vector<48xf32>
    %1222 = vector.shape_cast %1221 : vector<48xf32> to vector<1x48xf32>
    %1223 = vector.broadcast %1222 : vector<1x48xf32> to vector<16x48xf32>
    %1224 = arith.mulf %1219, %1223 : vector<16x48xf32>
    %1225 = arith.addf %1218, %1224 : vector<16x48xf32>
    %c0_500 = arith.constant 0 : index
    %c0_501 = arith.constant 0 : index
    %1226 = vector.load %arg6[%c0_500, %c0_501] : memref<1x48xf32, #tpu.memory_space<vmem>>, vector<1x48xf32>
    %1227 = vector.shape_cast %1226 : vector<1x48xf32> to vector<48xf32>
    %1228 = vector.shape_cast %1227 : vector<48xf32> to vector<1x48xf32>
    %1229 = vector.broadcast %1228 : vector<1x48xf32> to vector<16x48xf32>
    %1230 = arith.addf %1225, %1229 : vector<16x48xf32>
    %cst_502 = arith.constant 0.000000e+00 : f32
    %cst_503 = arith.constant 6.000000e+00 : f32
    %1231 = vector.broadcast %cst_502 : f32 to vector<16x48xf32>
    %1232 = arith.maximumf %1231, %1230 : vector<16x48xf32>
    %1233 = vector.broadcast %cst_503 : f32 to vector<16x48xf32>
    %1234 = arith.minimumf %1233, %1232 : vector<16x48xf32>
    %1235 = arith.index_cast %c12_i32 : i32 to index
    %c0_504 = arith.constant 0 : index
    %c0_505 = arith.constant 0 : index
    %1236 = vector.load %arg11[%1235, %c0_504, %c0_505] : memref<16x16x48xf32, #tpu.memory_space<vmem>>, vector<1x16x48xf32>
    %1237 = vector.shape_cast %1236 : vector<1x16x48xf32> to vector<16x48xf32>
    %1238 = vector.shape_cast %1234 : vector<16x48xf32> to vector<1x16x48xf32>
    tpu.vector_store %arg11[%1235, %c0_504, %c0_505], %1238 {strides = array<i32>} : memref<16x16x48xf32, #tpu.memory_space<vmem>>, vector<1x16x48xf32>,
    %c13_i32 = arith.constant 13 : i32
    %cst_506 = arith.constant 0.000000e+00 : f32
    %1239 = vector.broadcast %cst_506 : f32 to vector<16x48xf32>
    %c1_i32_507 = arith.constant 1 : i32
    %1240 = arith.muli %c13_i32, %c1_i32_507 : i32
    %c0_i32_508 = arith.constant 0 : i32
    %1241 = arith.addi %1240, %c0_i32_508 : i32
    %1242 = arith.index_cast %1241 : i32 to index
    %c0_509 = arith.constant 0 : index
    %c0_510 = arith.constant 0 : index
    %1243 = vector.load %arg10[%1242, %c0_509, %c0_510] : memref<18x18x48xf32, #tpu.memory_space<vmem>>, vector<1x18x48xf32>
    %1244 = vector.shape_cast %1243 : vector<1x18x48xf32> to vector<18x48xf32>
    %1245 = vector.extract_strided_slice %1244 {offsets = [0, 0], sizes = [16, 48], strides = [1, 1]} : vector<18x48xf32> to vector<16x48xf32>
    %c0_511 = arith.constant 0 : index
    %c0_512 = arith.constant 0 : index
    %1246 = vector.load %arg5[%c0_511, %c0_512] : memref<9x48xf32, #tpu.memory_space<vmem>>, vector<1x48xf32>
    %1247 = vector.shape_cast %1246 : vector<1x48xf32> to vector<48xf32>
    %1248 = vector.shape_cast %1247 : vector<48xf32> to vector<1x48xf32>
    %1249 = vector.broadcast %1248 : vector<1x48xf32> to vector<16x48xf32>
    %1250 = arith.mulf %1245, %1249 : vector<16x48xf32>
    %1251 = arith.addf %1239, %1250 : vector<16x48xf32>
    %1252 = vector.extract_strided_slice %1244 {offsets = [1, 0], sizes = [16, 48], strides = [1, 1]} : vector<18x48xf32> to vector<16x48xf32>
    %c1_513 = arith.constant 1 : index
    %c0_514 = arith.constant 0 : index
    %1253 = vector.load %arg5[%c1_513, %c0_514] : memref<9x48xf32, #tpu.memory_space<vmem>>, vector<1x48xf32>
    %1254 = vector.shape_cast %1253 : vector<1x48xf32> to vector<48xf32>
    %1255 = vector.shape_cast %1254 : vector<48xf32> to vector<1x48xf32>
    %1256 = vector.broadcast %1255 : vector<1x48xf32> to vector<16x48xf32>
    %1257 = arith.mulf %1252, %1256 : vector<16x48xf32>
    %1258 = arith.addf %1251, %1257 : vector<16x48xf32>
    %1259 = vector.extract_strided_slice %1244 {offsets = [2, 0], sizes = [16, 48], strides = [1, 1]} : vector<18x48xf32> to vector<16x48xf32>
    %c2_515 = arith.constant 2 : index
    %c0_516 = arith.constant 0 : index
    %1260 = vector.load %arg5[%c2_515, %c0_516] : memref<9x48xf32, #tpu.memory_space<vmem>>, vector<1x48xf32>
    %1261 = vector.shape_cast %1260 : vector<1x48xf32> to vector<48xf32>
    %1262 = vector.shape_cast %1261 : vector<48xf32> to vector<1x48xf32>
    %1263 = vector.broadcast %1262 : vector<1x48xf32> to vector<16x48xf32>
    %1264 = arith.mulf %1259, %1263 : vector<16x48xf32>
    %1265 = arith.addf %1258, %1264 : vector<16x48xf32>
    %c1_i32_517 = arith.constant 1 : i32
    %1266 = arith.muli %c13_i32, %c1_i32_517 : i32
    %c1_i32_518 = arith.constant 1 : i32
    %1267 = arith.addi %1266, %c1_i32_518 : i32
    %1268 = arith.index_cast %1267 : i32 to index
    %c0_519 = arith.constant 0 : index
    %c0_520 = arith.constant 0 : index
    %1269 = vector.load %arg10[%1268, %c0_519, %c0_520] : memref<18x18x48xf32, #tpu.memory_space<vmem>>, vector<1x18x48xf32>
    %1270 = vector.shape_cast %1269 : vector<1x18x48xf32> to vector<18x48xf32>
    %1271 = vector.extract_strided_slice %1270 {offsets = [0, 0], sizes = [16, 48], strides = [1, 1]} : vector<18x48xf32> to vector<16x48xf32>
    %c3_521 = arith.constant 3 : index
    %c0_522 = arith.constant 0 : index
    %1272 = vector.load %arg5[%c3_521, %c0_522] : memref<9x48xf32, #tpu.memory_space<vmem>>, vector<1x48xf32>
    %1273 = vector.shape_cast %1272 : vector<1x48xf32> to vector<48xf32>
    %1274 = vector.shape_cast %1273 : vector<48xf32> to vector<1x48xf32>
    %1275 = vector.broadcast %1274 : vector<1x48xf32> to vector<16x48xf32>
    %1276 = arith.mulf %1271, %1275 : vector<16x48xf32>
    %1277 = arith.addf %1265, %1276 : vector<16x48xf32>
    %1278 = vector.extract_strided_slice %1270 {offsets = [1, 0], sizes = [16, 48], strides = [1, 1]} : vector<18x48xf32> to vector<16x48xf32>
    %c4_523 = arith.constant 4 : index
    %c0_524 = arith.constant 0 : index
    %1279 = vector.load %arg5[%c4_523, %c0_524] : memref<9x48xf32, #tpu.memory_space<vmem>>, vector<1x48xf32>
    %1280 = vector.shape_cast %1279 : vector<1x48xf32> to vector<48xf32>
    %1281 = vector.shape_cast %1280 : vector<48xf32> to vector<1x48xf32>
    %1282 = vector.broadcast %1281 : vector<1x48xf32> to vector<16x48xf32>
    %1283 = arith.mulf %1278, %1282 : vector<16x48xf32>
    %1284 = arith.addf %1277, %1283 : vector<16x48xf32>
    %1285 = vector.extract_strided_slice %1270 {offsets = [2, 0], sizes = [16, 48], strides = [1, 1]} : vector<18x48xf32> to vector<16x48xf32>
    %c5_525 = arith.constant 5 : index
    %c0_526 = arith.constant 0 : index
    %1286 = vector.load %arg5[%c5_525, %c0_526] : memref<9x48xf32, #tpu.memory_space<vmem>>, vector<1x48xf32>
    %1287 = vector.shape_cast %1286 : vector<1x48xf32> to vector<48xf32>
    %1288 = vector.shape_cast %1287 : vector<48xf32> to vector<1x48xf32>
    %1289 = vector.broadcast %1288 : vector<1x48xf32> to vector<16x48xf32>
    %1290 = arith.mulf %1285, %1289 : vector<16x48xf32>
    %1291 = arith.addf %1284, %1290 : vector<16x48xf32>
    %c1_i32_527 = arith.constant 1 : i32
    %1292 = arith.muli %c13_i32, %c1_i32_527 : i32
    %c2_i32_528 = arith.constant 2 : i32
    %1293 = arith.addi %1292, %c2_i32_528 : i32
    %1294 = arith.index_cast %1293 : i32 to index
    %c0_529 = arith.constant 0 : index
    %c0_530 = arith.constant 0 : index
    %1295 = vector.load %arg10[%1294, %c0_529, %c0_530] : memref<18x18x48xf32, #tpu.memory_space<vmem>>, vector<1x18x48xf32>
    %1296 = vector.shape_cast %1295 : vector<1x18x48xf32> to vector<18x48xf32>
    %1297 = vector.extract_strided_slice %1296 {offsets = [0, 0], sizes = [16, 48], strides = [1, 1]} : vector<18x48xf32> to vector<16x48xf32>
    %c6_531 = arith.constant 6 : index
    %c0_532 = arith.constant 0 : index
    %1298 = vector.load %arg5[%c6_531, %c0_532] : memref<9x48xf32, #tpu.memory_space<vmem>>, vector<1x48xf32>
    %1299 = vector.shape_cast %1298 : vector<1x48xf32> to vector<48xf32>
    %1300 = vector.shape_cast %1299 : vector<48xf32> to vector<1x48xf32>
    %1301 = vector.broadcast %1300 : vector<1x48xf32> to vector<16x48xf32>
    %1302 = arith.mulf %1297, %1301 : vector<16x48xf32>
    %1303 = arith.addf %1291, %1302 : vector<16x48xf32>
    %1304 = vector.extract_strided_slice %1296 {offsets = [1, 0], sizes = [16, 48], strides = [1, 1]} : vector<18x48xf32> to vector<16x48xf32>
    %c7_533 = arith.constant 7 : index
    %c0_534 = arith.constant 0 : index
    %1305 = vector.load %arg5[%c7_533, %c0_534] : memref<9x48xf32, #tpu.memory_space<vmem>>, vector<1x48xf32>
    %1306 = vector.shape_cast %1305 : vector<1x48xf32> to vector<48xf32>
    %1307 = vector.shape_cast %1306 : vector<48xf32> to vector<1x48xf32>
    %1308 = vector.broadcast %1307 : vector<1x48xf32> to vector<16x48xf32>
    %1309 = arith.mulf %1304, %1308 : vector<16x48xf32>
    %1310 = arith.addf %1303, %1309 : vector<16x48xf32>
    %1311 = vector.extract_strided_slice %1296 {offsets = [2, 0], sizes = [16, 48], strides = [1, 1]} : vector<18x48xf32> to vector<16x48xf32>
    %c8_535 = arith.constant 8 : index
    %c0_536 = arith.constant 0 : index
    %1312 = vector.load %arg5[%c8_535, %c0_536] : memref<9x48xf32, #tpu.memory_space<vmem>>, vector<1x48xf32>
    %1313 = vector.shape_cast %1312 : vector<1x48xf32> to vector<48xf32>
    %1314 = vector.shape_cast %1313 : vector<48xf32> to vector<1x48xf32>
    %1315 = vector.broadcast %1314 : vector<1x48xf32> to vector<16x48xf32>
    %1316 = arith.mulf %1311, %1315 : vector<16x48xf32>
    %1317 = arith.addf %1310, %1316 : vector<16x48xf32>
    %c0_537 = arith.constant 0 : index
    %c0_538 = arith.constant 0 : index
    %1318 = vector.load %arg6[%c0_537, %c0_538] : memref<1x48xf32, #tpu.memory_space<vmem>>, vector<1x48xf32>
    %1319 = vector.shape_cast %1318 : vector<1x48xf32> to vector<48xf32>
    %1320 = vector.shape_cast %1319 : vector<48xf32> to vector<1x48xf32>
    %1321 = vector.broadcast %1320 : vector<1x48xf32> to vector<16x48xf32>
    %1322 = arith.addf %1317, %1321 : vector<16x48xf32>
    %cst_539 = arith.constant 0.000000e+00 : f32
    %cst_540 = arith.constant 6.000000e+00 : f32
    %1323 = vector.broadcast %cst_539 : f32 to vector<16x48xf32>
    %1324 = arith.maximumf %1323, %1322 : vector<16x48xf32>
    %1325 = vector.broadcast %cst_540 : f32 to vector<16x48xf32>
    %1326 = arith.minimumf %1325, %1324 : vector<16x48xf32>
    %1327 = arith.index_cast %c13_i32 : i32 to index
    %c0_541 = arith.constant 0 : index
    %c0_542 = arith.constant 0 : index
    %1328 = vector.load %arg11[%1327, %c0_541, %c0_542] : memref<16x16x48xf32, #tpu.memory_space<vmem>>, vector<1x16x48xf32>
    %1329 = vector.shape_cast %1328 : vector<1x16x48xf32> to vector<16x48xf32>
    %1330 = vector.shape_cast %1326 : vector<16x48xf32> to vector<1x16x48xf32>
    tpu.vector_store %arg11[%1327, %c0_541, %c0_542], %1330 {strides = array<i32>} : memref<16x16x48xf32, #tpu.memory_space<vmem>>, vector<1x16x48xf32>,
    %c14_i32 = arith.constant 14 : i32
    %cst_543 = arith.constant 0.000000e+00 : f32
    %1331 = vector.broadcast %cst_543 : f32 to vector<16x48xf32>
    %c1_i32_544 = arith.constant 1 : i32
    %1332 = arith.muli %c14_i32, %c1_i32_544 : i32
    %c0_i32_545 = arith.constant 0 : i32
    %1333 = arith.addi %1332, %c0_i32_545 : i32
    %1334 = arith.index_cast %1333 : i32 to index
    %c0_546 = arith.constant 0 : index
    %c0_547 = arith.constant 0 : index
    %1335 = vector.load %arg10[%1334, %c0_546, %c0_547] : memref<18x18x48xf32, #tpu.memory_space<vmem>>, vector<1x18x48xf32>
    %1336 = vector.shape_cast %1335 : vector<1x18x48xf32> to vector<18x48xf32>
    %1337 = vector.extract_strided_slice %1336 {offsets = [0, 0], sizes = [16, 48], strides = [1, 1]} : vector<18x48xf32> to vector<16x48xf32>
    %c0_548 = arith.constant 0 : index
    %c0_549 = arith.constant 0 : index
    %1338 = vector.load %arg5[%c0_548, %c0_549] : memref<9x48xf32, #tpu.memory_space<vmem>>, vector<1x48xf32>
    %1339 = vector.shape_cast %1338 : vector<1x48xf32> to vector<48xf32>
    %1340 = vector.shape_cast %1339 : vector<48xf32> to vector<1x48xf32>
    %1341 = vector.broadcast %1340 : vector<1x48xf32> to vector<16x48xf32>
    %1342 = arith.mulf %1337, %1341 : vector<16x48xf32>
    %1343 = arith.addf %1331, %1342 : vector<16x48xf32>
    %1344 = vector.extract_strided_slice %1336 {offsets = [1, 0], sizes = [16, 48], strides = [1, 1]} : vector<18x48xf32> to vector<16x48xf32>
    %c1_550 = arith.constant 1 : index
    %c0_551 = arith.constant 0 : index
    %1345 = vector.load %arg5[%c1_550, %c0_551] : memref<9x48xf32, #tpu.memory_space<vmem>>, vector<1x48xf32>
    %1346 = vector.shape_cast %1345 : vector<1x48xf32> to vector<48xf32>
    %1347 = vector.shape_cast %1346 : vector<48xf32> to vector<1x48xf32>
    %1348 = vector.broadcast %1347 : vector<1x48xf32> to vector<16x48xf32>
    %1349 = arith.mulf %1344, %1348 : vector<16x48xf32>
    %1350 = arith.addf %1343, %1349 : vector<16x48xf32>
    %1351 = vector.extract_strided_slice %1336 {offsets = [2, 0], sizes = [16, 48], strides = [1, 1]} : vector<18x48xf32> to vector<16x48xf32>
    %c2_552 = arith.constant 2 : index
    %c0_553 = arith.constant 0 : index
    %1352 = vector.load %arg5[%c2_552, %c0_553] : memref<9x48xf32, #tpu.memory_space<vmem>>, vector<1x48xf32>
    %1353 = vector.shape_cast %1352 : vector<1x48xf32> to vector<48xf32>
    %1354 = vector.shape_cast %1353 : vector<48xf32> to vector<1x48xf32>
    %1355 = vector.broadcast %1354 : vector<1x48xf32> to vector<16x48xf32>
    %1356 = arith.mulf %1351, %1355 : vector<16x48xf32>
    %1357 = arith.addf %1350, %1356 : vector<16x48xf32>
    %c1_i32_554 = arith.constant 1 : i32
    %1358 = arith.muli %c14_i32, %c1_i32_554 : i32
    %c1_i32_555 = arith.constant 1 : i32
    %1359 = arith.addi %1358, %c1_i32_555 : i32
    %1360 = arith.index_cast %1359 : i32 to index
    %c0_556 = arith.constant 0 : index
    %c0_557 = arith.constant 0 : index
    %1361 = vector.load %arg10[%1360, %c0_556, %c0_557] : memref<18x18x48xf32, #tpu.memory_space<vmem>>, vector<1x18x48xf32>
    %1362 = vector.shape_cast %1361 : vector<1x18x48xf32> to vector<18x48xf32>
    %1363 = vector.extract_strided_slice %1362 {offsets = [0, 0], sizes = [16, 48], strides = [1, 1]} : vector<18x48xf32> to vector<16x48xf32>
    %c3_558 = arith.constant 3 : index
    %c0_559 = arith.constant 0 : index
    %1364 = vector.load %arg5[%c3_558, %c0_559] : memref<9x48xf32, #tpu.memory_space<vmem>>, vector<1x48xf32>
    %1365 = vector.shape_cast %1364 : vector<1x48xf32> to vector<48xf32>
    %1366 = vector.shape_cast %1365 : vector<48xf32> to vector<1x48xf32>
    %1367 = vector.broadcast %1366 : vector<1x48xf32> to vector<16x48xf32>
    %1368 = arith.mulf %1363, %1367 : vector<16x48xf32>
    %1369 = arith.addf %1357, %1368 : vector<16x48xf32>
    %1370 = vector.extract_strided_slice %1362 {offsets = [1, 0], sizes = [16, 48], strides = [1, 1]} : vector<18x48xf32> to vector<16x48xf32>
    %c4_560 = arith.constant 4 : index
    %c0_561 = arith.constant 0 : index
    %1371 = vector.load %arg5[%c4_560, %c0_561] : memref<9x48xf32, #tpu.memory_space<vmem>>, vector<1x48xf32>
    %1372 = vector.shape_cast %1371 : vector<1x48xf32> to vector<48xf32>
    %1373 = vector.shape_cast %1372 : vector<48xf32> to vector<1x48xf32>
    %1374 = vector.broadcast %1373 : vector<1x48xf32> to vector<16x48xf32>
    %1375 = arith.mulf %1370, %1374 : vector<16x48xf32>
    %1376 = arith.addf %1369, %1375 : vector<16x48xf32>
    %1377 = vector.extract_strided_slice %1362 {offsets = [2, 0], sizes = [16, 48], strides = [1, 1]} : vector<18x48xf32> to vector<16x48xf32>
    %c5_562 = arith.constant 5 : index
    %c0_563 = arith.constant 0 : index
    %1378 = vector.load %arg5[%c5_562, %c0_563] : memref<9x48xf32, #tpu.memory_space<vmem>>, vector<1x48xf32>
    %1379 = vector.shape_cast %1378 : vector<1x48xf32> to vector<48xf32>
    %1380 = vector.shape_cast %1379 : vector<48xf32> to vector<1x48xf32>
    %1381 = vector.broadcast %1380 : vector<1x48xf32> to vector<16x48xf32>
    %1382 = arith.mulf %1377, %1381 : vector<16x48xf32>
    %1383 = arith.addf %1376, %1382 : vector<16x48xf32>
    %c1_i32_564 = arith.constant 1 : i32
    %1384 = arith.muli %c14_i32, %c1_i32_564 : i32
    %c2_i32_565 = arith.constant 2 : i32
    %1385 = arith.addi %1384, %c2_i32_565 : i32
    %1386 = arith.index_cast %1385 : i32 to index
    %c0_566 = arith.constant 0 : index
    %c0_567 = arith.constant 0 : index
    %1387 = vector.load %arg10[%1386, %c0_566, %c0_567] : memref<18x18x48xf32, #tpu.memory_space<vmem>>, vector<1x18x48xf32>
    %1388 = vector.shape_cast %1387 : vector<1x18x48xf32> to vector<18x48xf32>
    %1389 = vector.extract_strided_slice %1388 {offsets = [0, 0], sizes = [16, 48], strides = [1, 1]} : vector<18x48xf32> to vector<16x48xf32>
    %c6_568 = arith.constant 6 : index
    %c0_569 = arith.constant 0 : index
    %1390 = vector.load %arg5[%c6_568, %c0_569] : memref<9x48xf32, #tpu.memory_space<vmem>>, vector<1x48xf32>
    %1391 = vector.shape_cast %1390 : vector<1x48xf32> to vector<48xf32>
    %1392 = vector.shape_cast %1391 : vector<48xf32> to vector<1x48xf32>
    %1393 = vector.broadcast %1392 : vector<1x48xf32> to vector<16x48xf32>
    %1394 = arith.mulf %1389, %1393 : vector<16x48xf32>
    %1395 = arith.addf %1383, %1394 : vector<16x48xf32>
    %1396 = vector.extract_strided_slice %1388 {offsets = [1, 0], sizes = [16, 48], strides = [1, 1]} : vector<18x48xf32> to vector<16x48xf32>
    %c7_570 = arith.constant 7 : index
    %c0_571 = arith.constant 0 : index
    %1397 = vector.load %arg5[%c7_570, %c0_571] : memref<9x48xf32, #tpu.memory_space<vmem>>, vector<1x48xf32>
    %1398 = vector.shape_cast %1397 : vector<1x48xf32> to vector<48xf32>
    %1399 = vector.shape_cast %1398 : vector<48xf32> to vector<1x48xf32>
    %1400 = vector.broadcast %1399 : vector<1x48xf32> to vector<16x48xf32>
    %1401 = arith.mulf %1396, %1400 : vector<16x48xf32>
    %1402 = arith.addf %1395, %1401 : vector<16x48xf32>
    %1403 = vector.extract_strided_slice %1388 {offsets = [2, 0], sizes = [16, 48], strides = [1, 1]} : vector<18x48xf32> to vector<16x48xf32>
    %c8_572 = arith.constant 8 : index
    %c0_573 = arith.constant 0 : index
    %1404 = vector.load %arg5[%c8_572, %c0_573] : memref<9x48xf32, #tpu.memory_space<vmem>>, vector<1x48xf32>
    %1405 = vector.shape_cast %1404 : vector<1x48xf32> to vector<48xf32>
    %1406 = vector.shape_cast %1405 : vector<48xf32> to vector<1x48xf32>
    %1407 = vector.broadcast %1406 : vector<1x48xf32> to vector<16x48xf32>
    %1408 = arith.mulf %1403, %1407 : vector<16x48xf32>
    %1409 = arith.addf %1402, %1408 : vector<16x48xf32>
    %c0_574 = arith.constant 0 : index
    %c0_575 = arith.constant 0 : index
    %1410 = vector.load %arg6[%c0_574, %c0_575] : memref<1x48xf32, #tpu.memory_space<vmem>>, vector<1x48xf32>
    %1411 = vector.shape_cast %1410 : vector<1x48xf32> to vector<48xf32>
    %1412 = vector.shape_cast %1411 : vector<48xf32> to vector<1x48xf32>
    %1413 = vector.broadcast %1412 : vector<1x48xf32> to vector<16x48xf32>
    %1414 = arith.addf %1409, %1413 : vector<16x48xf32>
    %cst_576 = arith.constant 0.000000e+00 : f32
    %cst_577 = arith.constant 6.000000e+00 : f32
    %1415 = vector.broadcast %cst_576 : f32 to vector<16x48xf32>
    %1416 = arith.maximumf %1415, %1414 : vector<16x48xf32>
    %1417 = vector.broadcast %cst_577 : f32 to vector<16x48xf32>
    %1418 = arith.minimumf %1417, %1416 : vector<16x48xf32>
    %1419 = arith.index_cast %c14_i32 : i32 to index
    %c0_578 = arith.constant 0 : index
    %c0_579 = arith.constant 0 : index
    %1420 = vector.load %arg11[%1419, %c0_578, %c0_579] : memref<16x16x48xf32, #tpu.memory_space<vmem>>, vector<1x16x48xf32>
    %1421 = vector.shape_cast %1420 : vector<1x16x48xf32> to vector<16x48xf32>
    %1422 = vector.shape_cast %1418 : vector<16x48xf32> to vector<1x16x48xf32>
    tpu.vector_store %arg11[%1419, %c0_578, %c0_579], %1422 {strides = array<i32>} : memref<16x16x48xf32, #tpu.memory_space<vmem>>, vector<1x16x48xf32>,
    %c15_i32_580 = arith.constant 15 : i32
    %cst_581 = arith.constant 0.000000e+00 : f32
    %1423 = vector.broadcast %cst_581 : f32 to vector<16x48xf32>
    %c1_i32_582 = arith.constant 1 : i32
    %1424 = arith.muli %c15_i32_580, %c1_i32_582 : i32
    %c0_i32_583 = arith.constant 0 : i32
    %1425 = arith.addi %1424, %c0_i32_583 : i32
    %1426 = arith.index_cast %1425 : i32 to index
    %c0_584 = arith.constant 0 : index
    %c0_585 = arith.constant 0 : index
    %1427 = vector.load %arg10[%1426, %c0_584, %c0_585] : memref<18x18x48xf32, #tpu.memory_space<vmem>>, vector<1x18x48xf32>
    %1428 = vector.shape_cast %1427 : vector<1x18x48xf32> to vector<18x48xf32>
    %1429 = vector.extract_strided_slice %1428 {offsets = [0, 0], sizes = [16, 48], strides = [1, 1]} : vector<18x48xf32> to vector<16x48xf32>
    %c0_586 = arith.constant 0 : index
    %c0_587 = arith.constant 0 : index
    %1430 = vector.load %arg5[%c0_586, %c0_587] : memref<9x48xf32, #tpu.memory_space<vmem>>, vector<1x48xf32>
    %1431 = vector.shape_cast %1430 : vector<1x48xf32> to vector<48xf32>
    %1432 = vector.shape_cast %1431 : vector<48xf32> to vector<1x48xf32>
    %1433 = vector.broadcast %1432 : vector<1x48xf32> to vector<16x48xf32>
    %1434 = arith.mulf %1429, %1433 : vector<16x48xf32>
    %1435 = arith.addf %1423, %1434 : vector<16x48xf32>
    %1436 = vector.extract_strided_slice %1428 {offsets = [1, 0], sizes = [16, 48], strides = [1, 1]} : vector<18x48xf32> to vector<16x48xf32>
    %c1_588 = arith.constant 1 : index
    %c0_589 = arith.constant 0 : index
    %1437 = vector.load %arg5[%c1_588, %c0_589] : memref<9x48xf32, #tpu.memory_space<vmem>>, vector<1x48xf32>
    %1438 = vector.shape_cast %1437 : vector<1x48xf32> to vector<48xf32>
    %1439 = vector.shape_cast %1438 : vector<48xf32> to vector<1x48xf32>
    %1440 = vector.broadcast %1439 : vector<1x48xf32> to vector<16x48xf32>
    %1441 = arith.mulf %1436, %1440 : vector<16x48xf32>
    %1442 = arith.addf %1435, %1441 : vector<16x48xf32>
    %1443 = vector.extract_strided_slice %1428 {offsets = [2, 0], sizes = [16, 48], strides = [1, 1]} : vector<18x48xf32> to vector<16x48xf32>
    %c2_590 = arith.constant 2 : index
    %c0_591 = arith.constant 0 : index
    %1444 = vector.load %arg5[%c2_590, %c0_591] : memref<9x48xf32, #tpu.memory_space<vmem>>, vector<1x48xf32>
    %1445 = vector.shape_cast %1444 : vector<1x48xf32> to vector<48xf32>
    %1446 = vector.shape_cast %1445 : vector<48xf32> to vector<1x48xf32>
    %1447 = vector.broadcast %1446 : vector<1x48xf32> to vector<16x48xf32>
    %1448 = arith.mulf %1443, %1447 : vector<16x48xf32>
    %1449 = arith.addf %1442, %1448 : vector<16x48xf32>
    %c1_i32_592 = arith.constant 1 : i32
    %1450 = arith.muli %c15_i32_580, %c1_i32_592 : i32
    %c1_i32_593 = arith.constant 1 : i32
    %1451 = arith.addi %1450, %c1_i32_593 : i32
    %1452 = arith.index_cast %1451 : i32 to index
    %c0_594 = arith.constant 0 : index
    %c0_595 = arith.constant 0 : index
    %1453 = vector.load %arg10[%1452, %c0_594, %c0_595] : memref<18x18x48xf32, #tpu.memory_space<vmem>>, vector<1x18x48xf32>
    %1454 = vector.shape_cast %1453 : vector<1x18x48xf32> to vector<18x48xf32>
    %1455 = vector.extract_strided_slice %1454 {offsets = [0, 0], sizes = [16, 48], strides = [1, 1]} : vector<18x48xf32> to vector<16x48xf32>
    %c3_596 = arith.constant 3 : index
    %c0_597 = arith.constant 0 : index
    %1456 = vector.load %arg5[%c3_596, %c0_597] : memref<9x48xf32, #tpu.memory_space<vmem>>, vector<1x48xf32>
    %1457 = vector.shape_cast %1456 : vector<1x48xf32> to vector<48xf32>
    %1458 = vector.shape_cast %1457 : vector<48xf32> to vector<1x48xf32>
    %1459 = vector.broadcast %1458 : vector<1x48xf32> to vector<16x48xf32>
    %1460 = arith.mulf %1455, %1459 : vector<16x48xf32>
    %1461 = arith.addf %1449, %1460 : vector<16x48xf32>
    %1462 = vector.extract_strided_slice %1454 {offsets = [1, 0], sizes = [16, 48], strides = [1, 1]} : vector<18x48xf32> to vector<16x48xf32>
    %c4_598 = arith.constant 4 : index
    %c0_599 = arith.constant 0 : index
    %1463 = vector.load %arg5[%c4_598, %c0_599] : memref<9x48xf32, #tpu.memory_space<vmem>>, vector<1x48xf32>
    %1464 = vector.shape_cast %1463 : vector<1x48xf32> to vector<48xf32>
    %1465 = vector.shape_cast %1464 : vector<48xf32> to vector<1x48xf32>
    %1466 = vector.broadcast %1465 : vector<1x48xf32> to vector<16x48xf32>
    %1467 = arith.mulf %1462, %1466 : vector<16x48xf32>
    %1468 = arith.addf %1461, %1467 : vector<16x48xf32>
    %1469 = vector.extract_strided_slice %1454 {offsets = [2, 0], sizes = [16, 48], strides = [1, 1]} : vector<18x48xf32> to vector<16x48xf32>
    %c5_600 = arith.constant 5 : index
    %c0_601 = arith.constant 0 : index
    %1470 = vector.load %arg5[%c5_600, %c0_601] : memref<9x48xf32, #tpu.memory_space<vmem>>, vector<1x48xf32>
    %1471 = vector.shape_cast %1470 : vector<1x48xf32> to vector<48xf32>
    %1472 = vector.shape_cast %1471 : vector<48xf32> to vector<1x48xf32>
    %1473 = vector.broadcast %1472 : vector<1x48xf32> to vector<16x48xf32>
    %1474 = arith.mulf %1469, %1473 : vector<16x48xf32>
    %1475 = arith.addf %1468, %1474 : vector<16x48xf32>
    %c1_i32_602 = arith.constant 1 : i32
    %1476 = arith.muli %c15_i32_580, %c1_i32_602 : i32
    %c2_i32_603 = arith.constant 2 : i32
    %1477 = arith.addi %1476, %c2_i32_603 : i32
    %1478 = arith.index_cast %1477 : i32 to index
    %c0_604 = arith.constant 0 : index
    %c0_605 = arith.constant 0 : index
    %1479 = vector.load %arg10[%1478, %c0_604, %c0_605] : memref<18x18x48xf32, #tpu.memory_space<vmem>>, vector<1x18x48xf32>
    %1480 = vector.shape_cast %1479 : vector<1x18x48xf32> to vector<18x48xf32>
    %1481 = vector.extract_strided_slice %1480 {offsets = [0, 0], sizes = [16, 48], strides = [1, 1]} : vector<18x48xf32> to vector<16x48xf32>
    %c6_606 = arith.constant 6 : index
    %c0_607 = arith.constant 0 : index
    %1482 = vector.load %arg5[%c6_606, %c0_607] : memref<9x48xf32, #tpu.memory_space<vmem>>, vector<1x48xf32>
    %1483 = vector.shape_cast %1482 : vector<1x48xf32> to vector<48xf32>
    %1484 = vector.shape_cast %1483 : vector<48xf32> to vector<1x48xf32>
    %1485 = vector.broadcast %1484 : vector<1x48xf32> to vector<16x48xf32>
    %1486 = arith.mulf %1481, %1485 : vector<16x48xf32>
    %1487 = arith.addf %1475, %1486 : vector<16x48xf32>
    %1488 = vector.extract_strided_slice %1480 {offsets = [1, 0], sizes = [16, 48], strides = [1, 1]} : vector<18x48xf32> to vector<16x48xf32>
    %c7_608 = arith.constant 7 : index
    %c0_609 = arith.constant 0 : index
    %1489 = vector.load %arg5[%c7_608, %c0_609] : memref<9x48xf32, #tpu.memory_space<vmem>>, vector<1x48xf32>
    %1490 = vector.shape_cast %1489 : vector<1x48xf32> to vector<48xf32>
    %1491 = vector.shape_cast %1490 : vector<48xf32> to vector<1x48xf32>
    %1492 = vector.broadcast %1491 : vector<1x48xf32> to vector<16x48xf32>
    %1493 = arith.mulf %1488, %1492 : vector<16x48xf32>
    %1494 = arith.addf %1487, %1493 : vector<16x48xf32>
    %1495 = vector.extract_strided_slice %1480 {offsets = [2, 0], sizes = [16, 48], strides = [1, 1]} : vector<18x48xf32> to vector<16x48xf32>
    %c8_610 = arith.constant 8 : index
    %c0_611 = arith.constant 0 : index
    %1496 = vector.load %arg5[%c8_610, %c0_611] : memref<9x48xf32, #tpu.memory_space<vmem>>, vector<1x48xf32>
    %1497 = vector.shape_cast %1496 : vector<1x48xf32> to vector<48xf32>
    %1498 = vector.shape_cast %1497 : vector<48xf32> to vector<1x48xf32>
    %1499 = vector.broadcast %1498 : vector<1x48xf32> to vector<16x48xf32>
    %1500 = arith.mulf %1495, %1499 : vector<16x48xf32>
    %1501 = arith.addf %1494, %1500 : vector<16x48xf32>
    %c0_612 = arith.constant 0 : index
    %c0_613 = arith.constant 0 : index
    %1502 = vector.load %arg6[%c0_612, %c0_613] : memref<1x48xf32, #tpu.memory_space<vmem>>, vector<1x48xf32>
    %1503 = vector.shape_cast %1502 : vector<1x48xf32> to vector<48xf32>
    %1504 = vector.shape_cast %1503 : vector<48xf32> to vector<1x48xf32>
    %1505 = vector.broadcast %1504 : vector<1x48xf32> to vector<16x48xf32>
    %1506 = arith.addf %1501, %1505 : vector<16x48xf32>
    %cst_614 = arith.constant 0.000000e+00 : f32
    %cst_615 = arith.constant 6.000000e+00 : f32
    %1507 = vector.broadcast %cst_614 : f32 to vector<16x48xf32>
    %1508 = arith.maximumf %1507, %1506 : vector<16x48xf32>
    %1509 = vector.broadcast %cst_615 : f32 to vector<16x48xf32>
    %1510 = arith.minimumf %1509, %1508 : vector<16x48xf32>
    %1511 = arith.index_cast %c15_i32_580 : i32 to index
    %c0_616 = arith.constant 0 : index
    %c0_617 = arith.constant 0 : index
    %1512 = vector.load %arg11[%1511, %c0_616, %c0_617] : memref<16x16x48xf32, #tpu.memory_space<vmem>>, vector<1x16x48xf32>
    %1513 = vector.shape_cast %1512 : vector<1x16x48xf32> to vector<16x48xf32>
    %1514 = vector.shape_cast %1510 : vector<16x48xf32> to vector<1x16x48xf32>
    tpu.vector_store %arg11[%1511, %c0_616, %c0_617], %1514 {strides = array<i32>} : memref<16x16x48xf32, #tpu.memory_space<vmem>>, vector<1x16x48xf32>,
    %c16_i32_618 = arith.constant 16 : i32
    %c0_619 = arith.constant 0 : index
    %c0_620 = arith.constant 0 : index
    %c0_621 = arith.constant 0 : index
    %1515 = vector.load %arg11[%c0_619, %c0_620, %c0_621] : memref<16x16x48xf32, #tpu.memory_space<vmem>>, vector<16x16x48xf32>
    %1516 = vector.shape_cast %1515 : vector<16x16x48xf32> to vector<256x48xf32>
    %c0_622 = arith.constant 0 : index
    %c0_623 = arith.constant 0 : index
    %1517 = vector.load %arg7[%c0_622, %c0_623] : memref<48x8xf32, #tpu.memory_space<vmem>>, vector<48x8xf32>
    %cst_624 = arith.constant dense<0.000000e+00> : vector<256x8xf32>
    %1518 = tpu.matmul %1516, %1517, %cst_624 {dimension_numbers = #tpu.dot_dimension_numbers<[1], [0], [0], [1], [0, 0, 1, 1], [], []>} : vector<256x48xf32>, vector<48x8xf32>, vector<256x8xf32> -> vector<256x8xf32>
    %c0_625 = arith.constant 0 : index
    %c0_626 = arith.constant 0 : index
    %1519 = vector.load %arg8[%c0_625, %c0_626] : memref<1x8xf32, #tpu.memory_space<vmem>>, vector<1x8xf32>
    %1520 = vector.shape_cast %1519 : vector<1x8xf32> to vector<8xf32>
    %1521 = vector.shape_cast %1520 : vector<8xf32> to vector<1x8xf32>
    %1522 = vector.broadcast %1521 : vector<1x8xf32> to vector<256x8xf32>
    %1523 = arith.addf %1518, %1522 : vector<256x8xf32>
    %c16_i32_627 = arith.constant 16 : i32
    %1524 = arith.muli %arg1, %c16_i32_627 : i32
    %c0_628 = arith.constant 0 : index
    %1525 = arith.index_cast %1524 : i32 to index
    %c0_629 = arith.constant 0 : index
    %c0_630 = arith.constant 0 : index
    %1526 = vector.load %arg2[%c0_628, %1525, %c0_629, %c0_630] : memref<1x16x16x8xf32, #tpu.memory_space<vmem>>, vector<1x16x16x8xf32>
    %1527 = vector.shape_cast %1526 : vector<1x16x16x8xf32> to vector<16x16x8xf32>
    %1528 = vector.shape_cast %1527 : vector<16x16x8xf32> to vector<256x8xf32>
    %1529 = arith.addf %1523, %1528 : vector<256x8xf32>
    %c0_631 = arith.constant 0 : index
    %c0_632 = arith.constant 0 : index
    %c0_633 = arith.constant 0 : index
    %1530 = vector.load %arg9[%c0_631, %c0_632, %c0_633] : memref<1x256x8xf32, #tpu.memory_space<vmem>>, vector<1x256x8xf32>
    %1531 = vector.shape_cast %1530 : vector<1x256x8xf32> to vector<256x8xf32>
    %1532 = vector.shape_cast %1529 : vector<256x8xf32> to vector<1x256x8xf32>
    tpu.vector_store %arg9[%c0_631, %c0_632, %c0_633], %1532 {strides = array<i32>} : memref<1x256x8xf32, #tpu.memory_space<vmem>>, vector<1x256x8xf32>,
    return
  }
  func.func @transform_0(%arg0: i32, %arg1: i32) -> (i32, i32, i32, i32) {
    %c0_i32 = arith.constant 0 : i32
    %c0_i32_0 = arith.constant 0 : i32
    %c0_i32_1 = arith.constant 0 : i32
    %c0_i32_2 = arith.constant 0 : i32
    return %arg0, %c0_i32, %c0_i32_0, %c0_i32_1 : i32, i32, i32, i32
  }
  func.func @transform_1(%arg0: i32, %arg1: i32) -> (i32, i32) {
    %c0_i32 = arith.constant 0 : i32
    %c0_i32_0 = arith.constant 0 : i32
    %c0_i32_1 = arith.constant 0 : i32
    return %c0_i32, %c0_i32_0 : i32, i32
  }
  func.func @transform_2(%arg0: i32, %arg1: i32) -> (i32, i32) {
    %c0_i32 = arith.constant 0 : i32
    %c0_i32_0 = arith.constant 0 : i32
    %c0_i32_1 = arith.constant 0 : i32
    return %c0_i32, %c0_i32_0 : i32, i32
  }
  func.func @transform_3(%arg0: i32, %arg1: i32) -> (i32, i32) {
    %c0_i32 = arith.constant 0 : i32
    %c0_i32_0 = arith.constant 0 : i32
    %c0_i32_1 = arith.constant 0 : i32
    return %c0_i32, %c0_i32_0 : i32, i32
  }
  func.func @transform_4(%arg0: i32, %arg1: i32) -> (i32, i32) {
    %c0_i32 = arith.constant 0 : i32
    %c0_i32_0 = arith.constant 0 : i32
    %c0_i32_1 = arith.constant 0 : i32
    return %c0_i32, %c0_i32_0 : i32, i32
  }
  func.func @transform_5(%arg0: i32, %arg1: i32) -> (i32, i32) {
    %c0_i32 = arith.constant 0 : i32
    %c0_i32_0 = arith.constant 0 : i32
    %c0_i32_1 = arith.constant 0 : i32
    return %c0_i32, %c0_i32_0 : i32, i32
  }
  func.func @transform_6(%arg0: i32, %arg1: i32) -> (i32, i32) {
    %c0_i32 = arith.constant 0 : i32
    %c0_i32_0 = arith.constant 0 : i32
    %c0_i32_1 = arith.constant 0 : i32
    return %c0_i32, %c0_i32_0 : i32, i32
  }
  func.func @transform_7(%arg0: i32, %arg1: i32) -> (i32, i32, i32) {
    %c0_i32 = arith.constant 0 : i32
    %c0_i32_0 = arith.constant 0 : i32
    return %arg0, %arg1, %c0_i32 : i32, i32, i32
  }
}

</mosaic_0001>

<bundles_post_ra>
// kernel: tpu_custom_call.1
= control target key start
LH: loop header
LB: loop body
LE: loop exit
PB: predicated region body
PF: predicated region fallthrough
CT: control target
= control target key end

     0   :  { %s4728_s24 = smov 0   ;;  %s4730_s25 = smov 0   ;;  %s6884_s0 = inlined_call_operand.vmem [shape: f32[2,16,16,8], index: 0, kind: input, shape index: {}]   ;;  %s6885_s1 = inlined_call_operand.vmem [shape: f32[8,48], index: 1, kind: input, shape index: {}]   ;;  %s6886_s2 = inlined_call_operand.vmem [shape: f32[1,48], index: 2, kind: input, shape index: {}]   ;;  %s6887_s3 = inlined_call_operand.vmem [shape: f32[9,48], index: 3, kind: input, shape index: {}]   ;;  %s6888_s4 = inlined_call_operand.vmem [shape: f32[1,48], index: 4, kind: input, shape index: {}]   ;;  %s6889_s5 = inlined_call_operand.vmem [shape: f32[48,8], index: 5, kind: input, shape index: {}]   ;;  %s6890_s6 = inlined_call_operand.vmem [shape: f32[1,8], index: 6, kind: input, shape index: {}]   ;;  %s6891_s7 = inlined_call_operand.vmem [shape: f32[2,256,8], index: 7, kind: output, shape index: {}]  }
   0x1   :  { %s4732_s26 = smov 0  }
   0x2 LB: > { %s29_s27 = sadd.s32 1, %s4681_s25  ;;  %p4203_p0 = scmp.ge.s32.totalorder %s4685_s26, 1  ;;  %s4685_s26 = sphi %s4732_s26, %s17_s26   ;;  %s4681_s25 = sphi %s4730_s25, %s7074_s25   ;;  %s4677_s24 = sphi %s4728_s24, %s7073_s24  }
   0x3   : > { %p31_p1 = scmp.ge.s32.totalorder %s29_s27, 2  ;;  %p251_p2 = scmp.lt.s32.totalorder %s4685_s26, 3 }
   0x5   : > { %s7076_s27 = smov (%p31_p1, %s29_s27), 0  ;;  %p252_p3 = pnand %p4203_p0, %p251_p2 }
   0x7   : > { %255 = sbr.rel (%p252_p3) target bundleno = 781 (0x30d), region = 48 }
   0xc   : > { %v351_v0 = vld [vmem:[%s6885_s1] sm:$0xff]  ;;  %p287_p4 = scmp.lt.s32.totalorder %s4677_s24, 1  ;;  %vm359_vm0 = vcmask 64512   ;;  %vm785_vm1 = vcmask 385024   ;;  %v6892_v33 = vmov 0.0   ;;  %vm822_vm2 = vcmask 392192  }
   0xd   : > { %4519 = vmatprep.subr.mxu0 %v351_v0  ;;  %804 = vst.msk [vmem:[#allocation2 + $0x11] sm:$0x1] %vm785_vm1, %v6892_v33  ;;  %786 = vst.msk [vmem:[#allocation2] sm:$0x1] %vm785_vm1, %v6892_v33  ;;  %v4902_v34 = vld [vmem:[%s6886_s2] ss:$0 sm:$0xff] }
   0xe   : > { %4520 = vmatpush3.msra.mxu0 %v351_v0  ;;  %s7078_s24 = smov (!%p287_p4, %s4677_s24), 1  ;;  %787 = vst.msk [vmem:[#allocation2 + $0x18] sm:$0x1] %vm785_vm1, %v6892_v33  ;;  %788 = vst.msk [vmem:[#allocation2 + $0x30] sm:$0x1] %vm785_vm1, %v6892_v33  ;;  %vm865_vm3 = vcmask 386048  }
   0xf   : > { %s4442_s30 = sshll.u32 %s7078_s24, 8  ;;  %789 = vst.msk [vmem:[#allocation2 + $0x48] sm:$0x1] %vm785_vm1, %v6892_v33  ;;  %790 = vst.msk [vmem:[#allocation2 + $0x60] sm:$0x1] %vm785_vm1, %v6892_v33  ;;  %vm899_vm4 = vcmask 1046528  }
  0x10   : > { %s4757_s10 = scalar_lea.vmem %s6884_s0, %s4442_s30  ;;  %791 = vst.msk [vmem:[#allocation2 + $0x78] sm:$0x1] %vm785_vm1, %v6892_v33  ;;  %792 = vst.msk [vmem:[#allocation2 + $0x90] sm:$0x1] %vm785_vm1, %v6892_v33  ;;  %v4922_v57 = vld [vmem:[%s6887_s3 + $0x1] ss:$0 sm:$0xff]  ;;  %s6747_s29 = scalar_lea.vmem %s6891_s7, %s4442_s30 }
  0x11   : > { %v308_v1 = vld [vmem:[%s4757_s10] sm:$0xff]  ;;  %v309_v2 = vld [vmem:[%s4757_s10 + $0x8] sm:$0xff]  ;;  %v321_v3 = vld [vmem:[%s4757_s10 + $0x10] sm:$0xff]  ;;  %793 = vst.msk [vmem:[#allocation2 + $0xa8] sm:$0x1] %vm785_vm1, %v6892_v33  ;;  %vm920_vm5 = vcmask 1045504  }
  0x12   : > { %4521 = vmatprep.mubr.msk.f32.mxu0 %vm359_vm0, %v308_v1  ;;  %v322_v4 = vld [vmem:[%s4757_s10 + $0x18] sm:$0xff]  ;;  %v323_v5 = vld [vmem:[%s4757_s10 + $0x20] sm:$0xff]  ;;  %v324_v6 = vld [vmem:[%s4757_s10 + $0x28] sm:$0xff]  ;;  %794 = vst.msk [vmem:[#allocation2 + $0xc0] sm:$0x1] %vm785_vm1, %v6892_v33 }
  0x13   : > { %4522 = vmatmul.mubr.msk.f32.vlgmr.msra.gmra.mxu0 %vm359_vm0, %v309_v2  ;;  %v325_v7 = vld [vmem:[%s4757_s10 + $0x30] sm:$0xff]  ;;  %v326_v8 = vld [vmem:[%s4757_s10 + $0x38] sm:$0xff]  ;;  %v327_v9 = vld [vmem:[%s4757_s10 + $0x40] sm:$0xff]  ;;  %795 = vst.msk [vmem:[#allocation2 + $0xd8] sm:$0x1] %vm785_vm1, %v6892_v33 }
  0x14   : > { %4524 = vmatprep.mubr.msk.f32.mxu0 %vm359_vm0, %v308_v1  ;;  %v328_v10 = vld [vmem:[%s4757_s10 + $0x48] sm:$0xff]  ;;  %v329_v11 = vld [vmem:[%s4757_s10 + $0x50] sm:$0xff]  ;;  %v330_v12 = vld [vmem:[%s4757_s10 + $0x58] sm:$0xff]  ;;  %796 = vst.msk [vmem:[#allocation2 + $0xf0] sm:$0x1] %vm785_vm1, %v6892_v33 }
  0x15   : > { %v331_v13 = vld [vmem:[%s4757_s10 + $0x60] sm:$0xff]  ;;  %v332_v14 = vld [vmem:[%s4757_s10 + $0x68] sm:$0xff]  ;;  %v333_v15 = vld [vmem:[%s4757_s10 + $0x70] sm:$0xff]  ;;  %797 = vst.msk [vmem:[#allocation2 + $0x108] sm:$0x1] %vm785_vm1, %v6892_v33 }
  0x16   : > { %v334_v16 = vld [vmem:[%s4757_s10 + $0x78] sm:$0xff]  ;;  %v335_v17 = vld [vmem:[%s4757_s10 + $0x80] sm:$0xff]  ;;  %v336_v18 = vld [vmem:[%s4757_s10 + $0x88] sm:$0xff]  ;;  %798 = vst.msk [vmem:[#allocation2 + $0x120] sm:$0x1] %vm785_vm1, %v6892_v33 }
  0x17   : > { %4525 = vmatmul.mubr.msk.f32.gmra.mxu0 %vm359_vm0, %v309_v2  ;;  %v337_v19 = vld [vmem:[%s4757_s10 + $0x90] sm:$0xff]  ;;  %v338_v20 = vld [vmem:[%s4757_s10 + $0x98] sm:$0xff]  ;;  %v339_v21 = vld [vmem:[%s4757_s10 + $0xa0] sm:$0xff]  ;;  %799 = vst.msk [vmem:[#allocation2 + $0x138] sm:$0x1] %vm785_vm1, %v6892_v33 }
  0x18   : > { %4527 = vmatprep.mubr.msk.f32.mxu0 %vm359_vm0, %v321_v3  ;;  %v340_v22 = vld [vmem:[%s4757_s10 + $0xa8] sm:$0xff]  ;;  %v341_v23 = vld [vmem:[%s4757_s10 + $0xb0] sm:$0xff]  ;;  %v342_v24 = vld [vmem:[%s4757_s10 + $0xb8] sm:$0xff]  ;;  %800 = vst.msk [vmem:[#allocation2 + $0x150] sm:$0x1] %vm785_vm1, %v6892_v33 }
  0x19   : > { %v343_v25 = vld [vmem:[%s4757_s10 + $0xc0] sm:$0xff]  ;;  %v344_v26 = vld [vmem:[%s4757_s10 + $0xc8] sm:$0xff]  ;;  %v345_v27 = vld [vmem:[%s4757_s10 + $0xd0] sm:$0xff]  ;;  %801 = vst.msk [vmem:[#allocation2 + $0x168] sm:$0x1] %vm785_vm1, %v6892_v33 }
  0x1a   : > { %v346_v28 = vld [vmem:[%s4757_s10 + $0xd8] sm:$0xff]  ;;  %v347_v29 = vld [vmem:[%s4757_s10 + $0xe0] sm:$0xff]  ;;  %v348_v30 = vld [vmem:[%s4757_s10 + $0xe8] sm:$0xff]  ;;  %802 = vst.msk [vmem:[#allocation2 + $0x180] sm:$0x1] %vm785_vm1, %v6892_v33 }
  0x1b   : > { %4528 = vmatmul.mubr.msk.f32.gmra.mxu0 %vm359_vm0, %v322_v4  ;;  %v349_v31 = vld [vmem:[%s4757_s10 + $0xf0] sm:$0xff]  ;;  %v350_v32 = vld [vmem:[%s4757_s10 + $0xf8] sm:$0xff]  ;;  %803 = vst.msk [vmem:[#allocation2 + $0x198] sm:$0x1] %vm785_vm1, %v6892_v33  ;;  %805 = vst.msk [vmem:[#allocation2 + $0x29] sm:$0x1] %vm785_vm1, %v6892_v33 }
  0x1c   : > { %4530 = vmatprep.mubr.msk.f32.mxu0 %vm359_vm0, %v323_v5  ;;  %806 = vst.msk [vmem:[#allocation2 + $0x41] sm:$0x1] %vm785_vm1, %v6892_v33  ;;  %807 = vst.msk [vmem:[#allocation2 + $0x59] sm:$0x1] %vm785_vm1, %v6892_v33  ;;  %v4927_v58 = vld [vmem:[%s6887_s3 + $0x2] ss:$0 sm:$0xff] }
  0x1d   : > { %808 = vst.msk [vmem:[#allocation2 + $0x71] sm:$0x1] %vm785_vm1, %v6892_v33  ;;  %809 = vst.msk [vmem:[#allocation2 + $0x89] sm:$0x1] %vm785_vm1, %v6892_v33  ;;  %v4934_v0 = vld [vmem:[%s6887_s3] ss:$0 sm:$0xff] }
  0x1e   : > { %810 = vst.msk [vmem:[#allocation2 + $0xa1] sm:$0x1] %vm785_vm1, %v6892_v33  ;;  %811 = vst.msk [vmem:[#allocation2 + $0xb9] sm:$0x1] %vm785_vm1, %v6892_v33 }
  0x1f   : > { %4531 = vmatmul.mubr.msk.f32.gmra.mxu0 %vm359_vm0, %v324_v6  ;;  %812 = vst.msk [vmem:[#allocation2 + $0xd1] sm:$0x1] %vm785_vm1, %v6892_v33  ;;  %813 = vst.msk [vmem:[#allocation2 + $0xe9] sm:$0x1] %vm785_vm1, %v6892_v33  ;;  %v4945_v6 = vld [vmem:[%s6887_s3 + $0x4] ss:$0 sm:$0xff] }
  0x20   : > { %4533 = vmatprep.mubr.msk.f32.mxu0 %vm359_vm0, %v325_v7  ;;  %814 = vst.msk [vmem:[#allocation2 + $0x101] sm:$0x1] %vm785_vm1, %v6892_v33  ;;  %815 = vst.msk [vmem:[#allocation2 + $0x119] sm:$0x1] %vm785_vm1, %v6892_v33  ;;  %v4950_v7 = vld [vmem:[%s6887_s3 + $0x5] ss:$0 sm:$0xff] }
  0x21   : > { %816 = vst.msk [vmem:[#allocation2 + $0x131] sm:$0x1] %vm785_vm1, %v6892_v33  ;;  %817 = vst.msk [vmem:[#allocation2 + $0x149] sm:$0x1] %vm785_vm1, %v6892_v33 }
  0x22   : > { %818 = vst.msk [vmem:[#allocation2 + $0x161] sm:$0x1] %vm785_vm1, %v6892_v33  ;;  %819 = vst.msk [vmem:[#allocation2 + $0x179] sm:$0x1] %vm785_vm1, %v6892_v33 }
  0x23   : > { %4534 = vmatmul.mubr.msk.f32.gmra.mxu0 %vm359_vm0, %v326_v8  ;;  %820 = vst.msk [vmem:[#allocation2 + $0x191] sm:$0x1] %vm785_vm1, %v6892_v33  ;;  %821 = vst.msk [vmem:[#allocation2 + $0x1a9] sm:$0x1] %vm785_vm1, %v6892_v33 }
  0x24   : > { %4536 = vmatprep.mubr.msk.f32.mxu0 %vm359_vm0, %v327_v9 }
  0x27   : > { %4537 = vmatmul.mubr.msk.f32.gmra.mxu0 %vm359_vm0, %v328_v10 }
  0x28   : > { %4539 = vmatprep.mubr.msk.f32.mxu0 %vm359_vm0, %v329_v11 }
  0x2b   : > { %4540 = vmatmul.mubr.msk.f32.gmra.mxu0 %vm359_vm0, %v330_v12 }
  0x2c   : > { %4542 = vmatprep.mubr.msk.f32.mxu0 %vm359_vm0, %v331_v13 }
  0x2f   : > { %4543 = vmatmul.mubr.msk.f32.gmra.mxu0 %vm359_vm0, %v332_v14 }
  0x30   : > { %4545 = vmatprep.mubr.msk.f32.mxu0 %vm359_vm0, %v333_v15 }
  0x33   : > { %4546 = vmatmul.mubr.msk.f32.gmra.mxu0 %vm359_vm0, %v334_v16 }
  0x34   : > { %4548 = vmatprep.mubr.msk.f32.mxu0 %vm359_vm0, %v335_v17 }
  0x37   : > { %4549 = vmatmul.mubr.msk.f32.gmra.mxu0 %vm359_vm0, %v336_v18 }
  0x38   : > { %4551 = vmatprep.mubr.msk.f32.mxu0 %vm359_vm0, %v337_v19 }
  0x3b   : > { %4552 = vmatmul.mubr.msk.f32.gmra.mxu0 %vm359_vm0, %v338_v20 }
  0x3c   : > { %4554 = vmatprep.mubr.msk.f32.mxu0 %vm359_vm0, %v339_v21 }
  0x3f   : > { %4555 = vmatmul.mubr.msk.f32.gmra.mxu0 %vm359_vm0, %v340_v22 }
  0x40   : > { %4557 = vmatprep.mubr.msk.f32.mxu0 %vm359_vm0, %v341_v23 }
  0x43   : > { %4558 = vmatmul.mubr.msk.f32.gmra.mxu0 %vm359_vm0, %v342_v24 }
  0x44   : > { %4560 = vmatprep.mubr.msk.f32.mxu0 %vm359_vm0, %v343_v25 }
  0x47   : > { %4561 = vmatmul.mubr.msk.f32.gmra.mxu0 %vm359_vm0, %v344_v26 }
  0x48   : > { %4563 = vmatprep.mubr.msk.f32.mxu0 %vm359_vm0, %v345_v27 }
  0x4b   : > { %4564 = vmatmul.mubr.msk.f32.gmra.mxu0 %vm359_vm0, %v346_v28  ;;  %v4975_v28 = vld [vmem:[%s6887_s3 + $0x3] ss:$0 sm:$0xff] }
  0x4c   : > { %4566 = vmatprep.mubr.msk.f32.mxu0 %vm359_vm0, %v347_v29 }
  0x4f   : > { %4567 = vmatmul.mubr.msk.f32.gmra.mxu0 %vm359_vm0, %v348_v30 }
  0x50   : > { %4569 = vmatprep.mubr.msk.f32.mxu0 %vm359_vm0, %v349_v31 }
  0x53   : > { %4570 = vmatmul.mubr.msk.f32.gmra.mxu0 %vm359_vm0, %v350_v32 }
  0x54   : > { %4572 = vmatprep.mubr.msk.f32.mxu0 %vm359_vm0, %v349_v31 }
  0x57   : > { %4573 = vmatmul.mubr.msk.f32.gmra.mxu0 %vm359_vm0, %v350_v32 }
  0xd3   : > { %v4523_v35 = vpop.f32.mrf.mxu0 }
  0xd4   : > { %v540_v36 = vadd.f32 %v4523_v35, %v4902_v34 }
  0xd5   : > { %v534_v37 = vpop.f32.mrf.mxu0 }
  0xd6   : > { %v714_v38 = vmax.f32 %v540_v36, 0.0  ;;  %v535_v39 = vadd.f32 %v4902_v34, %v534_v37 }
  0xd7   : > { %v4526_v40 = vpop.f32.mrf.mxu0 }
  0xd8   : > { %v750_v41 = vmin.f32 %v714_v38, 6.0  ;;  %v713_v42 = vmax.f32 %v535_v39, 0.0  ;;  %v550_v43 = vadd.f32 %v4526_v40, %v4902_v34 }
  0xd9   : > { %v544_v44 = vpop.f32.mrf.mxu0 }
  0xda   : > { %824 = vst.msk [vmem:[#allocation2 + $0x9] sm:$0xff] %vm822_vm2, %v750_v41  ;;  %v749_v45 = vmin.f32 %v713_v42, 6.0  ;;  %v716_v46 = vmax.f32 %v550_v43, 0.0  ;;  %v545_v47 = vadd.f32 %v4902_v34, %v544_v44 }
  0xdb   : > { %866 = vst.msk [vmem:[#allocation2 + $0x10] sm:$0x3] %vm865_vm3, %v6892_v33  ;;  %v4529_v48 = vpop.f32.mrf.mxu0 }
  0xdc   : > { %823 = vst.msk [vmem:[#allocation2 + $0x1] sm:$0xff] %vm822_vm2, %v749_v45  ;;  %v752_v49 = vmin.f32 %v716_v46, 6.0  ;;  %v715_v50 = vmax.f32 %v545_v47, 0.0  ;;  %v560_v51 = vadd.f32 %v4529_v48, %v4902_v34 }
  0xdd   : > { %863 = vst.msk [vmem:[#allocation2] sm:$0xff] %vm822_vm2, %v6892_v33  ;;  %864 = vst.msk [vmem:[#allocation2 + $0x8] sm:$0xff] %vm822_vm2, %v6892_v33  ;;  %v554_v52 = vpop.f32.mrf.mxu0 }
  0xde   : > { %826 = vst.msk [vmem:[#allocation2 + $0x21] sm:$0xff] %vm822_vm2, %v752_v49  ;;  %v751_v53 = vmin.f32 %v715_v50, 6.0  ;;  %v718_v54 = vmax.f32 %v560_v51, 0.0  ;;  %v555_v55 = vadd.f32 %v4902_v34, %v554_v52 }
  0xdf   : > { %v4532_v56 = vpop.f32.mrf.mxu0 }
  0xe0   : > { %825 = vst.msk [vmem:[#allocation2 + $0x19] sm:$0xff] %vm822_vm2, %v751_v53  ;;  %v754_v59 = vmin.f32 %v718_v54, 6.0  ;;  %v717_v60 = vmax.f32 %v555_v55, 0.0  ;;  %v570_v61 = vadd.f32 %v4532_v56, %v4902_v34 }
  0xe1   : > { %v564_v62 = vpop.f32.mrf.mxu0 }
  0xe2   : > { %v878_v63 = vld [vmem:[#allocation2 + $0x10] sm:$0x3]  ;;  %828 = vst.msk [vmem:[#allocation2 + $0x39] sm:$0xff] %vm822_vm2, %v754_v59  ;;  %v753_v1 = vmin.f32 %v717_v60, 6.0  ;;  %v720_v2 = vmax.f32 %v570_v61, 0.0  ;;  %v4938_v3 = vadd.f32 %v4902_v34, %v564_v62 }
  0xe3   : > { %v895_v4 = vmul.f32 %v4922_v57, %v878_v63  ;;  %v916_v5 = vmul.f32 %v4927_v58, %v878_v63  ;;  %v4535_v8 = vpop.f32.mrf.mxu0 }
  0xe4   : > { %v876_v9 = vld [vmem:[#allocation2] sm:$0xff]  ;;  %v877_v10 = vld [vmem:[#allocation2 + $0x8] sm:$0xff]  ;;  %827 = vst.msk [vmem:[#allocation2 + $0x31] sm:$0xff] %vm822_vm2, %v753_v1  ;;  %v756_v11 = vmin.f32 %v720_v2, 6.0  ;;  %v719_v12 = vmax.f32 %v4938_v3, 0.0  ;;  %v4955_v13 = vadd.f32 %v4535_v8, %v4902_v34 }
  0xe5   : > { %v903_v14 = vrot.slane %v895_v4, 1  ;;  %v924_v15 = vrot.slane %v916_v5, 2  ;;  %v884_v16 = vmul.f32 %v4934_v0, %v876_v9  ;;  %v885_v17 = vmul.f32 %v4934_v0, %v877_v10  ;;  %v933_v18 = vld [vmem:[#allocation2 + $0x28] sm:$0x3]  ;;  %v4977_v29 = vpop.f32.mrf.mxu0 }
  0xe6   : > { %v1053_v19 = vld [vmem:[#allocation2 + $0x28] sm:$0x3]  ;;  %v893_v20 = vmul.f32 %v4922_v57, %v876_v9  ;;  %v894_v21 = vmul.f32 %v4922_v57, %v877_v10  ;;  %v914_v22 = vmul.f32 %v4927_v58, %v876_v9  ;;  %v915_v23 = vmul.f32 %v4927_v58, %v877_v10  ;;  %830 = vst.msk [vmem:[#allocation2 + $0x51] sm:$0xff] %vm822_vm2, %v756_v11  ;;  %v5000_v10 = vld [vmem:[%s6887_s3 + $0x7] ss:$0 sm:$0xff] }
  0xe7   : > { %v950_v24 = vmul.f32 %v4945_v6, %v933_v18  ;;  %v4966_v25 = vmul.f32 %v4950_v7, %v933_v18  ;;  %v1070_v26 = vmul.f32 %v4922_v57, %v1053_v19  ;;  %v4970_v27 = vmul.f32 %v4927_v58, %v1053_v19  ;;  %v931_v36 = vld [vmem:[#allocation2 + $0x18] sm:$0xff]  ;;  %v932_v37 = vld [vmem:[#allocation2 + $0x20] sm:$0xff]  ;;  %v4987_v50 = vpop.f32.mrf.mxu0  ;;  %v5005_v11 = vld [vmem:[%s6887_s3 + $0x8] ss:$0 sm:$0xff] }
  0xe8   : > { %v900_v30 = vrot.slane %v893_v20, 1  ;;  %v901_v31 = vrot.slane %v894_v21, 1  ;;  %v921_v32 = vrot.slane %v914_v22, 2  ;;  %v922_v35 = vrot.slane %v915_v23, 2 }
  0xe9   : > { %v957_v38 = vrot.slane %v950_v24, 1  ;;  %v977_v39 = vrot.slane %v4966_v25, 2  ;;  %v1077_v40 = vrot.slane %v1070_v26, 1  ;;  %v1097_v41 = vrot.slane %v4970_v27, 2  ;;  %v986_v9 = vld [vmem:[#allocation2 + $0x40] sm:$0x3] }
  0xea   : > { %v902_v42 = vsel %vm899_vm4, %v900_v30, %v901_v31  ;;  %v904_v43 = vsel %vm899_vm4, %v901_v31, %v903_v14  ;;  %v923_v44 = vsel %vm920_vm5, %v921_v32, %v922_v35  ;;  %v925_v45 = vsel %vm920_vm5, %v922_v35, %v924_v15  ;;  %v5007_v14 = vpop.f32.mrf.mxu0  ;;  %v1105_v19 = vld [vmem:[#allocation2 + $0x40] sm:$0x3] }
  0xeb   : > { %v907_v46 = vadd.f32 %v902_v42, %v884_v16  ;;  %v908_v47 = vadd.f32 %v904_v43, %v885_v17  ;;  %v939_v48 = vmul.f32 %v4975_v28, %v931_v36  ;;  %v940_v49 = vmul.f32 %v4975_v28, %v932_v37  ;;  %v1226_v32 = vld [vmem:[#allocation2 + $0x40] sm:$0x3]  ;;  %v984_v42 = vld [vmem:[#allocation2 + $0x30] sm:$0xff]  ;;  %v985_v43 = vld [vmem:[#allocation2 + $0x38] sm:$0xff] }
  0xec   : > { %v948_v51 = vmul.f32 %v4945_v6, %v931_v36  ;;  %v949_v52 = vmul.f32 %v4945_v6, %v932_v37  ;;  %v968_v53 = vmul.f32 %v4950_v7, %v931_v36  ;;  %v969_v54 = vmul.f32 %v4950_v7, %v932_v37 }
  0xed   : > { %v928_v55 = vadd.f32 %v923_v44, %v907_v46  ;;  %v929_v56 = vadd.f32 %v925_v45, %v908_v47  ;;  %v1059_v59 = vmul.f32 %v4934_v0, %v931_v36  ;;  %v1060_v60 = vmul.f32 %v4934_v0, %v932_v37  ;;  %v5028_v44 = vld [vmem:[%s6887_s3 + $0x6] ss:$0 sm:$0xff]  ;;  %v5030_v45 = vpop.f32.mrf.mxu0 }
  0xee   : > { %v954_v61 = vrot.slane %v948_v51, 1  ;;  %v955_v62 = vrot.slane %v949_v52, 1  ;;  %v974_v63 = vrot.slane %v968_v53, 2  ;;  %v975_v1 = vrot.slane %v969_v54, 2 }
  0xef   : > { %v941_v2 = vadd.f32 %v939_v48, %v928_v55  ;;  %v942_v4 = vadd.f32 %v940_v49, %v929_v56  ;;  %v1068_v5 = vmul.f32 %v4922_v57, %v931_v36  ;;  %v1069_v8 = vmul.f32 %v4922_v57, %v932_v37 }
  0xf0   : > { %v956_v15 = vsel %vm899_vm4, %v954_v61, %v955_v62  ;;  %v958_v16 = vsel %vm899_vm4, %v955_v62, %v957_v38  ;;  %v1088_v17 = vmul.f32 %v4927_v58, %v931_v36  ;;  %v1089_v18 = vmul.f32 %v4927_v58, %v932_v37 }
  0xf1   : > { %v961_v20 = vadd.f32 %v956_v15, %v941_v2  ;;  %v962_v21 = vadd.f32 %v958_v16, %v942_v4  ;;  %v1074_v22 = vrot.slane %v1068_v5, 1  ;;  %v1075_v23 = vrot.slane %v1069_v8, 1  ;;  %v5049_v4 = vpop.f32.mrf.mxu0 }
  0xf2   : > { %v1094_v24 = vrot.slane %v1088_v17, 2  ;;  %v1095_v26 = vrot.slane %v1089_v18, 2  ;;  %v5014_v30 = vmul.f32 %v5000_v10, %v986_v9  ;;  %v5017_v31 = vmul.f32 %v5005_v11, %v986_v9 }
  0xf3   : > { %v1076_v35 = vsel %vm899_vm4, %v1074_v22, %v1075_v23  ;;  %v1078_v36 = vsel %vm899_vm4, %v1075_v23, %v1077_v40  ;;  %v1122_v37 = vmul.f32 %v4945_v6, %v1105_v19  ;;  %v5023_v38 = vmul.f32 %v4950_v7, %v1105_v19  ;;  %v1399_v40 = vld [vmem:[#allocation2 + $0x58] sm:$0x3] }
  0xf4   : > { %v1081_v46 = vadd.f32 %v1076_v35, %v1059_v59  ;;  %v1082_v47 = vadd.f32 %v1078_v36, %v1060_v60  ;;  %v5036_v52 = vmul.f32 %v4922_v57, %v1226_v32  ;;  %v5039_v53 = vmul.f32 %v4927_v58, %v1226_v32  ;;  %v5077_v32 = vpop.f32.mrf.mxu0 }
  0xf5   : > { %v1129_v49 = vrot.slane %v1122_v37, 1  ;;  %v1149_v51 = vrot.slane %v5023_v38, 2  ;;  %v976_v54 = vsel %vm920_vm5, %v974_v63, %v975_v1  ;;  %v978_v55 = vsel %vm920_vm5, %v975_v1, %v977_v39 }
  0xf6   : > { %v992_v56 = vmul.f32 %v5028_v44, %v984_v42  ;;  %v993_v59 = vmul.f32 %v5028_v44, %v985_v43  ;;  %v1250_v60 = vrot.slane %v5036_v52, 1  ;;  %v1270_v61 = vrot.slane %v5039_v53, 2 }
  0xf7   : > { %v981_v62 = vadd.f32 %v976_v54, %v961_v20  ;;  %v982_v2 = vadd.f32 %v978_v55, %v962_v21  ;;  %v5052_v5 = vmul.f32 %v5000_v10, %v984_v42  ;;  %v5055_v63 = vmul.f32 %v5000_v10, %v985_v43 }
  0xf8   : > { %v5058_v25 = vmul.f32 %v5005_v11, %v984_v42  ;;  %v5061_v39 = vmul.f32 %v5005_v11, %v985_v43  ;;  %v1096_v9 = vsel %vm920_vm5, %v1094_v24, %v1095_v26  ;;  %v1098_v15 = vsel %vm920_vm5, %v1095_v26, %v1097_v41 }
  0xf9   : > { %v5063_v1 = vadd.f32 %v992_v56, %v981_v62  ;;  %v5065_v8 = vadd.f32 %v993_v59, %v982_v2  ;;  %v1101_v20 = vadd.f32 %v1096_v9, %v1081_v46  ;;  %v1102_v21 = vadd.f32 %v1098_v15, %v1082_v47  ;;  %v1158_v47 = vld [vmem:[#allocation2 + $0x58] sm:$0x3]  ;;  %v604_v15 = vpop.f32.mrf.mxu0 }
  0xfa   : > { %v1111_v22 = vmul.f32 %v4975_v28, %v984_v42  ;;  %v1112_v23 = vmul.f32 %v4975_v28, %v985_v43  ;;  %v1120_v27 = vmul.f32 %v4945_v6, %v984_v42  ;;  %v1121_v41 = vmul.f32 %v4945_v6, %v985_v43 }
  0xfb   : > { %v1140_v24 = vmul.f32 %v4950_v7, %v984_v42  ;;  %v1141_v26 = vmul.f32 %v4950_v7, %v985_v43  ;;  %v1232_v37 = vmul.f32 %v4934_v0, %v984_v42  ;;  %v1233_v46 = vmul.f32 %v4934_v0, %v985_v43 }
  0xfc   : > { %v1113_v35 = vadd.f32 %v1111_v22, %v1101_v20  ;;  %v1114_v36 = vadd.f32 %v1112_v23, %v1102_v21  ;;  %v1126_v52 = vrot.slane %v1120_v27, 1  ;;  %v1127_v54 = vrot.slane %v1121_v41, 1  ;;  %v1278_v27 = vld [vmem:[#allocation2 + $0x58] sm:$0x3] }
  0xfd   : > { %v1146_v55 = vrot.slane %v1140_v24, 2  ;;  %v1147_v56 = vrot.slane %v1141_v26, 2  ;;  %v1241_v59 = vmul.f32 %v4922_v57, %v984_v42  ;;  %v1242_v62 = vmul.f32 %v4922_v57, %v985_v43 }
  0xfe   : > { %v1261_v2 = vmul.f32 %v4927_v58, %v984_v42  ;;  %v1262_v9 = vmul.f32 %v4927_v58, %v985_v43  ;;  %v1128_v20 = vsel %vm899_vm4, %v1126_v52, %v1127_v54  ;;  %v1130_v21 = vsel %vm899_vm4, %v1127_v54, %v1129_v49 }
  0xff   : > { %v5092_v22 = vmul.f32 %v5000_v10, %v1158_v47  ;;  %v5095_v23 = vmul.f32 %v5005_v11, %v1158_v47  ;;  %v1133_v41 = vadd.f32 %v1128_v20, %v1113_v35  ;;  %v1134_v24 = vadd.f32 %v1130_v21, %v1114_v36  ;;  %v4547_v35 = vpop.f32.mrf.mxu0  ;;  %v3683_v36 = vld [vmem:[%s6889_s5 + $0x28] sm:$0xff] }
 0x100   : > { %v1247_v26 = vrot.slane %v1241_v59, 1  ;;  %v1248_v33 = vrot.slane %v1242_v62, 1  ;;  %v1267_v42 = vrot.slane %v1261_v2, 2  ;;  %v1268_v18 = vrot.slane %v1262_v9, 2  ;;  %4575 = vmatprep.subr.mxu1 %v3683_v36 }
 0x101   : > { %v1182_v43 = vrot.slane %v5092_v22, 1  ;;  %v5102_v19 = vmul.f32 %v4945_v6, %v1278_v27  ;;  %v5105_v47 = vmul.f32 %v4950_v7, %v1278_v27  ;;  %v5111_v2 = vmul.f32 %v4922_v57, %v1399_v40  ;;  %4576 = vmatpush3.msra.mxu1 %v3683_v36 }
 0x102   : > { %v1249_v49 = vsel %vm899_vm4, %v1247_v26, %v1248_v33  ;;  %v1251_v54 = vsel %vm899_vm4, %v1248_v33, %v1250_v60  ;;  %v5114_v9 = vmul.f32 %v4927_v58, %v1399_v40  ;;  %v755_v20 = vmin.f32 %v719_v12, 6.0  ;;  %v3682_v26 = vld [vmem:[%s6889_s5 + $0x20] sm:$0xff] }
 0x103   : > { %v1254_v59 = vadd.f32 %v1249_v49, %v1232_v37  ;;  %v1255_v62 = vadd.f32 %v1251_v54, %v1233_v46  ;;  %v1302_v33 = vrot.slane %v5102_v19, 1  ;;  %v1322_v60 = vrot.slane %v5105_v47, 2  ;;  %v614_v54 = vpop.f32.mrf.mxu0  ;;  %4577 = vmatprep.subr.mxu1 %v3682_v26 }
 0x104   : > { %v1148_v21 = vsel %vm920_vm5, %v1146_v55, %v1147_v56  ;;  %v1423_v37 = vrot.slane %v5111_v2, 1  ;;  %v1443_v46 = vrot.slane %v5114_v9, 2  ;;  %v1150_v40 = vsel %vm920_vm5, %v1147_v56, %v1149_v51  ;;  %829 = vst.msk [vmem:[#allocation2 + $0x49] sm:$0xff] %vm822_vm2, %v755_v20  ;;  %4578 = vmatpush3.msra.mxu1 %v3682_v26  ;;  %v3681_v2 = vld [vmem:[%s6889_s5 + $0x18] sm:$0xff] }
 0x105   : > { %v1153_v27 = vadd.f32 %v1148_v21, %v1133_v41  ;;  %v1154_v3 = vadd.f32 %v1150_v40, %v1134_v24  ;;  %v1269_v12 = vsel %vm920_vm5, %v1267_v42, %v1268_v18  ;;  %v1271_v55 = vsel %vm920_vm5, %v1268_v18, %v1270_v61  ;;  %v4550_v20 = vpop.f32.mrf.mxu0  ;;  %4579 = vmatprep.subr.mxu1 %v3681_v2 }
 0x106   : > { %v722_v49 = vmax.f32 %v4955_v13, 0.0  ;;  %v1274_v38 = vadd.f32 %v1269_v12, %v1254_v59  ;;  %v1275_v51 = vadd.f32 %v1271_v55, %v1255_v62  ;;  %v575_v56 = vadd.f32 %v4902_v34, %v4977_v29  ;;  %4580 = vmatpush3.msra.mxu1 %v3681_v2 }
 0x107   : > { %v590_v41 = vadd.f32 %v4987_v50, %v4902_v34  ;;  %v585_v42 = vadd.f32 %v4902_v34, %v5007_v14  ;;  %v600_v53 = vadd.f32 %v5030_v45, %v4902_v34  ;;  %v595_v13 = vadd.f32 %v4902_v34, %v5049_v4 }
 0x108   : > { %v758_v24 = vmin.f32 %v722_v49, 6.0  ;;  %v721_v61 = vmax.f32 %v575_v56, 0.0  ;;  %v610_v36 = vadd.f32 %v5077_v32, %v4902_v34  ;;  %v605_v29 = vadd.f32 %v4902_v34, %v604_v15 }
 0x109   : > { %v724_v18 = vmax.f32 %v590_v41, 0.0  ;;  %v723_v50 = vmax.f32 %v585_v42, 0.0  ;;  %v726_v59 = vmax.f32 %v600_v53, 0.0  ;;  %v725_v62 = vmax.f32 %v595_v13, 0.0 }
 0x10a   : > { %832 = vst.msk [vmem:[#allocation2 + $0x69] sm:$0xff] %vm822_vm2, %v758_v24  ;;  %v5150_v14 = vadd.f32 %v4547_v35, %v4902_v34  ;;  %v757_v45 = vmin.f32 %v721_v61, 6.0  ;;  %v728_v40 = vmax.f32 %v610_v36, 0.0  ;;  %v727_v4 = vmax.f32 %v605_v29, 0.0 }
 0x10b   : > { %v760_v21 = vmin.f32 %v724_v18, 6.0  ;;  %v759_v26 = vmin.f32 %v723_v50, 6.0  ;;  %v762_v12 = vmin.f32 %v726_v59, 6.0  ;;  %v761_v55 = vmin.f32 %v725_v62, 6.0  ;;  %v1156_v49 = vld [vmem:[#allocation2 + $0x48] sm:$0xff]  ;;  %v1157_v15 = vld [vmem:[#allocation2 + $0x50] sm:$0xff] }
 0x10c   : > { %831 = vst.msk [vmem:[#allocation2 + $0x61] sm:$0xff] %vm822_vm2, %v757_v45  ;;  %v764_v56 = vmin.f32 %v728_v40, 6.0  ;;  %v763_v41 = vmin.f32 %v727_v4, 6.0  ;;  %v5156_v35 = vadd.f32 %v4902_v34, %v614_v54  ;;  %v5159_v24 = vadd.f32 %v4550_v20, %v4902_v34 }
 0x10d   : > { %834 = vst.msk [vmem:[#allocation2 + $0x81] sm:$0xff] %vm822_vm2, %v760_v21  ;;  %v1164_v42 = vmul.f32 %v5028_v44, %v1156_v49  ;;  %v1165_v53 = vmul.f32 %v5028_v44, %v1157_v15  ;;  %v1173_v13 = vmul.f32 %v5000_v10, %v1156_v49  ;;  %v1174_v61 = vmul.f32 %v5000_v10, %v1157_v15 }
 0x10e   : > { %833 = vst.msk [vmem:[#allocation2 + $0x79] sm:$0xff] %vm822_vm2, %v759_v26  ;;  %836 = vst.msk [vmem:[#allocation2 + $0x99] sm:$0xff] %vm822_vm2, %v762_v12  ;;  %v5169_v54 = vmul.f32 %v5005_v11, %v1156_v49  ;;  %v5172_v34 = vmul.f32 %v5005_v11, %v1157_v15  ;;  %v1284_v18 = vmul.f32 %v4975_v28, %v1156_v49 }
 0x10f   : > { %835 = vst.msk [vmem:[#allocation2 + $0x91] sm:$0xff] %vm822_vm2, %v761_v55  ;;  %v1285_v36 = vmul.f32 %v4975_v28, %v1157_v15  ;;  %838 = vst.msk [vmem:[#allocation2 + $0xb1] sm:$0xff] %vm822_vm2, %v764_v56  ;;  %v1166_v29 = vadd.f32 %v1164_v42, %v1153_v27  ;;  %v1167_v50 = vadd.f32 %v1165_v53, %v1154_v3  ;;  %v1179_v59 = vrot.slane %v1173_v13, 1 }
 0x110   : > { %837 = vst.msk [vmem:[#allocation2 + $0xa9] sm:$0xff] %vm822_vm2, %v763_v41  ;;  %v1180_v62 = vrot.slane %v1174_v61, 1  ;;  %v1286_v21 = vadd.f32 %v1284_v18, %v1274_v38  ;;  %v1293_v12 = vmul.f32 %v4945_v6, %v1156_v49  ;;  %v1294_v55 = vmul.f32 %v4945_v6, %v1157_v15 }
 0x111   : > { %v1287_v40 = vadd.f32 %v1285_v36, %v1275_v51  ;;  %v1313_v56 = vmul.f32 %v4950_v7, %v1156_v49  ;;  %v1314_v41 = vmul.f32 %v4950_v7, %v1157_v15  ;;  %v1405_v42 = vmul.f32 %v4934_v0, %v1156_v49  ;;  %v1331_v18 = vld [vmem:[#allocation2 + $0x70] sm:$0x3] }
 0x112   : > { %v1181_v4 = vsel %vm899_vm4, %v1179_v59, %v1180_v62  ;;  %v1183_v26 = vsel %vm899_vm4, %v1180_v62, %v1182_v43  ;;  %v1299_v38 = vrot.slane %v1293_v12, 1  ;;  %v1300_v51 = vrot.slane %v1294_v55, 1  ;;  %v1451_v62 = vld [vmem:[#allocation2 + $0x70] sm:$0x3] }
 0x113   : > { %v5186_v27 = vadd.f32 %v1181_v4, %v1166_v29  ;;  %v5188_v3 = vadd.f32 %v1183_v26, %v1167_v50  ;;  %v1406_v22 = vmul.f32 %v4934_v0, %v1157_v15  ;;  %v1319_v53 = vrot.slane %v1313_v56, 2 }
 0x114   : > { %v1320_v43 = vrot.slane %v1314_v41, 2  ;;  %v1414_v13 = vmul.f32 %v4922_v57, %v1156_v49  ;;  %v1415_v61 = vmul.f32 %v4922_v57, %v1157_v15  ;;  %v1301_v36 = vsel %vm899_vm4, %v1299_v38, %v1300_v51  ;;  %v1572_v38 = vld [vmem:[#allocation2 + $0x70] sm:$0x3] }
 0x115   : > { %v1303_v29 = vsel %vm899_vm4, %v1300_v51, %v1302_v33  ;;  %v1434_v50 = vmul.f32 %v4927_v58, %v1156_v49  ;;  %v1435_v59 = vmul.f32 %v4927_v58, %v1157_v15  ;;  %v1306_v4 = vadd.f32 %v1301_v36, %v1286_v21  ;;  %v5214_v21 = vld [vmem:[#allocation2 + $0x60] sm:$0xff] }
 0x116   : > { %v1307_v26 = vadd.f32 %v1303_v29, %v1287_v40  ;;  %v1420_v12 = vrot.slane %v1414_v13, 1  ;;  %v1421_v55 = vrot.slane %v1415_v61, 1  ;;  %v1348_v52 = vmul.f32 %v5000_v10, %v1331_v18  ;;  %v5216_v40 = vld [vmem:[#allocation2 + $0x68] sm:$0xff] }
 0x117   : > { %v1440_v56 = vrot.slane %v1434_v50, 2  ;;  %v1441_v41 = vrot.slane %v1435_v59, 2  ;;  %v5204_v20 = vmul.f32 %v5005_v11, %v1331_v18  ;;  %v1468_v49 = vmul.f32 %v4945_v6, %v1451_v62 }
 0x118   : > { %v1422_v19 = vsel %vm899_vm4, %v1420_v12, %v1421_v55  ;;  %v1424_v33 = vsel %vm899_vm4, %v1421_v55, %v1423_v37  ;;  %v5212_v15 = vmul.f32 %v4950_v7, %v1451_v62  ;;  %v1355_v61 = vrot.slane %v1348_v52, 1  ;;  %v3680_v62 = vld [vmem:[%s6889_s5 + $0x10] sm:$0xff] }
 0x119   : > { %v1427_v51 = vadd.f32 %v1422_v19, %v1405_v42  ;;  %v1428_v13 = vadd.f32 %v1424_v33, %v1406_v22  ;;  %v1475_v36 = vrot.slane %v1468_v49, 1  ;;  %v5224_v29 = vmul.f32 %v4922_v57, %v1572_v38  ;;  %4581 = vmatprep.subr.mxu1 %v3680_v62 }
 0x11a   : > { %v1495_v37 = vrot.slane %v5212_v15, 2  ;;  %v5227_v50 = vmul.f32 %v4927_v58, %v1572_v38  ;;  %v1321_v42 = vsel %vm920_vm5, %v1319_v53, %v1320_v43  ;;  %v1323_v52 = vsel %vm920_vm5, %v1320_v43, %v1322_v60  ;;  %4582 = vmatpush3.msra.mxu1 %v3680_v62 }
 0x11b   : > { %v1337_v22 = vmul.f32 %v5028_v44, %v5214_v21  ;;  %v1338_v59 = vmul.f32 %v5028_v44, %v5216_v40  ;;  %v1596_v12 = vrot.slane %v5224_v29, 1  ;;  %v1326_v53 = vadd.f32 %v1321_v42, %v1306_v4 }
 0x11c   : > { %v1616_v55 = vrot.slane %v5227_v50, 2  ;;  %v1327_v38 = vadd.f32 %v1323_v52, %v1307_v26  ;;  %v1346_v47 = vmul.f32 %v5000_v10, %v5214_v21  ;;  %v1347_v60 = vmul.f32 %v5000_v10, %v5216_v40 }
 0x11d   : > { %v5248_v43 = vmul.f32 %v5005_v11, %v5214_v21  ;;  %v5252_v19 = vmul.f32 %v5005_v11, %v5216_v40  ;;  %v1339_v33 = vadd.f32 %v1337_v22, %v1326_v53  ;;  %v1442_v4 = vsel %vm920_vm5, %v1440_v56, %v1441_v41 }
 0x11e   : > { %v1340_v49 = vadd.f32 %v1338_v59, %v1327_v38  ;;  %v1444_v26 = vsel %vm920_vm5, %v1441_v41, %v1443_v46  ;;  %v1352_v2 = vrot.slane %v1346_v47, 1  ;;  %v1353_v29 = vrot.slane %v1347_v60, 1 }
 0x11f   : > { %v1447_v18 = vadd.f32 %v1442_v4, %v1427_v51  ;;  %v1448_v45 = vadd.f32 %v1444_v26, %v1428_v13  ;;  %v1457_v48 = vmul.f32 %v4975_v28, %v5214_v21  ;;  %v1458_v22 = vmul.f32 %v4975_v28, %v5216_v40 }
 0x120   : > { %v1354_v56 = vsel %vm899_vm4, %v1352_v2, %v1353_v29  ;;  %v1356_v9 = vsel %vm899_vm4, %v1353_v29, %v1355_v61  ;;  %v1466_v46 = vmul.f32 %v4945_v6, %v5214_v21  ;;  %v1467_v41 = vmul.f32 %v4945_v6, %v5216_v40  ;;  %v1624_v29 = vld [vmem:[#allocation2 + $0x88] sm:$0x3] }
 0x121   : > { %v5270_v59 = vadd.f32 %v1354_v56, %v1339_v33  ;;  %v5272_v51 = vadd.f32 %v1356_v9, %v1340_v49  ;;  %v1459_v13 = vadd.f32 %v1457_v48, %v1447_v18  ;;  %v1460_v62 = vadd.f32 %v1458_v22, %v1448_v45  ;;  %v1504_v45 = vld [vmem:[#allocation2 + $0x88] sm:$0x3] }
 0x122   : > { %v1472_v53 = vrot.slane %v1466_v46, 1  ;;  %v1473_v38 = vrot.slane %v1467_v41, 1  ;;  %v1486_v47 = vmul.f32 %v4950_v7, %v5214_v21  ;;  %v1487_v61 = vmul.f32 %v4950_v7, %v5216_v40 }
 0x123   : > { %v1578_v60 = vmul.f32 %v4934_v0, %v5214_v21  ;;  %v1579_v4 = vmul.f32 %v4934_v0, %v5216_v40  ;;  %v1587_v33 = vmul.f32 %v4922_v57, %v5214_v21  ;;  %v1588_v48 = vmul.f32 %v4922_v57, %v5216_v40 }
 0x124   : > { %v1474_v18 = vsel %vm899_vm4, %v1472_v53, %v1473_v38  ;;  %v1476_v49 = vsel %vm899_vm4, %v1473_v38, %v1475_v36  ;;  %v1492_v26 = vrot.slane %v1486_v47, 2  ;;  %v1493_v2 = vrot.slane %v1487_v61, 2  ;;  %v1745_v38 = vld [vmem:[#allocation2 + $0x88] sm:$0x3] }
 0x125   : > { %v1479_v22 = vadd.f32 %v1474_v18, %v1459_v13  ;;  %v1480_v56 = vadd.f32 %v1476_v49, %v1460_v62  ;;  %v1593_v9 = vrot.slane %v1587_v33, 1  ;;  %v1594_v46 = vrot.slane %v1588_v48, 1  ;;  %v1502_v33 = vld [vmem:[#allocation2 + $0x78] sm:$0xff]  ;;  %v1503_v48 = vld [vmem:[#allocation2 + $0x80] sm:$0xff] }
 0x126   : > { %v1607_v41 = vmul.f32 %v4927_v58, %v5214_v21  ;;  %v1608_v42 = vmul.f32 %v4927_v58, %v5216_v40  ;;  %v1521_v52 = vmul.f32 %v5000_v10, %v1504_v45  ;;  %v5294_v16 = vmul.f32 %v5005_v11, %v1504_v45  ;;  %v3679_v45 = vld [vmem:[%s6889_s5 + $0x8] sm:$0xff] }
 0x127   : > { %v1595_v36 = vsel %vm899_vm4, %v1593_v9, %v1594_v46  ;;  %v1597_v53 = vsel %vm899_vm4, %v1594_v46, %v1596_v12  ;;  %v5299_v13 = vmul.f32 %v4945_v6, %v1624_v29  ;;  %v5302_v62 = vmul.f32 %v4950_v7, %v1624_v29  ;;  %4583 = vmatprep.subr.mxu1 %v3679_v45 }
 0x128   : > { %6916 = vst [vmem:[#allocation4_spill] sm:$0xff] %v5294_v16  ;;  %v1600_v21 = vadd.f32 %v1595_v36, %v1578_v60  ;;  %v1601_v47 = vadd.f32 %v1597_v53, %v1579_v4  ;;  %v1613_v61 = vrot.slane %v1607_v41, 2  ;;  %v1614_v40 = vrot.slane %v1608_v42, 2  ;;  %4584 = vmatpush3.msra.mxu1 %v3679_v45  ;;  %v3678_v53 = vld [vmem:[%s6889_s5] sm:$0xff] }
 0x129   : > { %v1528_v18 = vrot.slane %v1521_v52, 1  ;;  %v1648_v49 = vrot.slane %v5299_v13, 1  ;;  %v1668_v9 = vrot.slane %v5302_v62, 2  ;;  %v5311_v29 = vmul.f32 %v4922_v57, %v1745_v38  ;;  %4585 = vmatprep.subr.mxu1 %v3678_v53 }
 0x12a   : > { %v5314_v60 = vmul.f32 %v4927_v58, %v1745_v38  ;;  %v1494_v42 = vsel %vm920_vm5, %v1492_v26, %v1493_v2  ;;  %v1496_v4 = vsel %vm920_vm5, %v1493_v2, %v1495_v37  ;;  %v1510_v41 = vmul.f32 %v5028_v44, %v1502_v33  ;;  %4586 = vmatpush3.msra.mxu1 %v3678_v53 }
 0x12b   : > { %v1499_v52 = vadd.f32 %v1494_v42, %v1479_v22  ;;  %v1500_v46 = vadd.f32 %v1496_v4, %v1480_v56  ;;  %v1511_v36 = vmul.f32 %v5028_v44, %v1503_v48  ;;  %v1769_v13 = vrot.slane %v5311_v29, 1 }
 0x12c   : > { %v1519_v26 = vmul.f32 %v5000_v10, %v1502_v33  ;;  %v1520_v15 = vmul.f32 %v5000_v10, %v1503_v48  ;;  %v5330_v22 = vmul.f32 %v5005_v11, %v1502_v33  ;;  %v5333_v56 = vmul.f32 %v5005_v11, %v1503_v48 }
 0x12d   : > { %v1512_v37 = vadd.f32 %v1510_v41, %v1499_v52  ;;  %v1513_v2 = vadd.f32 %v1511_v36, %v1500_v46  ;;  %v1615_v29 = vsel %vm920_vm5, %v1613_v61, %v1614_v40  ;;  %v1617_v4 = vsel %vm920_vm5, %v1614_v40, %v1616_v55 }
 0x12e   : > { %6917 = vst [vmem:[#allocation5_spill] sm:$0xff] %v5330_v22  ;;  %v1525_v45 = vrot.slane %v1519_v26, 1  ;;  %v1526_v42 = vrot.slane %v1520_v15, 1  ;;  %v1620_v46 = vadd.f32 %v1615_v29, %v1600_v21  ;;  %v1621_v41 = vadd.f32 %v1617_v4, %v1601_v47 }
 0x12f   : > { %v1630_v53 = vmul.f32 %v4975_v28, %v1502_v33  ;;  %v1631_v26 = vmul.f32 %v4975_v28, %v1503_v48  ;;  %v1639_v50 = vmul.f32 %v4945_v6, %v1502_v33  ;;  %v1640_v55 = vmul.f32 %v4945_v6, %v1503_v48 }
 0x130   : > { %v1527_v36 = vsel %vm899_vm4, %v1525_v45, %v1526_v42  ;;  %v1529_v17 = vsel %vm899_vm4, %v1526_v42, %v1528_v18  ;;  %v1659_v21 = vmul.f32 %v4950_v7, %v1502_v33  ;;  %v1660_v47 = vmul.f32 %v4950_v7, %v1503_v48 }
 0x131   : > { %v5345_v15 = vadd.f32 %v1527_v36, %v1512_v37  ;;  %v5347_v61 = vadd.f32 %v1529_v17, %v1513_v2  ;;  %v1632_v40 = vadd.f32 %v1630_v53, %v1620_v46  ;;  %v1633_v12 = vadd.f32 %v1631_v26, %v1621_v41  ;;  %v1677_v36 = vld [vmem:[#allocation2 + $0xa0] sm:$0x3] }
 0x132   : > { %v1645_v45 = vrot.slane %v1639_v50, 1  ;;  %v1646_v18 = vrot.slane %v1640_v55, 1  ;;  %v1751_v42 = vmul.f32 %v4934_v0, %v1502_v33  ;;  %v1752_v29 = vmul.f32 %v4934_v0, %v1503_v48  ;;  %v1797_v50 = vld [vmem:[#allocation2 + $0xa0] sm:$0x3] }
 0x133   : > { %6918 = vst [vmem:[#allocation6_spill] sm:$0xff] %v5345_v15  ;;  %6919 = vst [vmem:[#allocation7_spill] sm:$0xff] %v5347_v61  ;;  %v1665_v37 = vrot.slane %v1659_v21, 2  ;;  %v1666_v4 = vrot.slane %v1660_v47, 2  ;;  %v1760_v17 = vmul.f32 %v4922_v57, %v1502_v33  ;;  %v1761_v2 = vmul.f32 %v4922_v57, %v1503_v48  ;;  %v5364_v21 = vld [vmem:[%s6887_s3 + $0x1] ss:$0 sm:$0xff] }
 0x134   : > { %v1647_v46 = vsel %vm899_vm4, %v1645_v45, %v1646_v18  ;;  %v1649_v41 = vsel %vm899_vm4, %v1646_v18, %v1648_v49  ;;  %v1780_v53 = vmul.f32 %v4927_v58, %v1502_v33  ;;  %v1781_v26 = vmul.f32 %v4927_v58, %v1503_v48  ;;  %v1918_v33 = vld [vmem:[#allocation2 + $0xa0] sm:$0x3]  ;;  %v5373_v58 = vld [vmem:[%s6887_s3 + $0x2] ss:$0 sm:$0xff] }
 0x135   : > { %v1652_v55 = vadd.f32 %v1647_v46, %v1632_v40  ;;  %v1653_v52 = vadd.f32 %v1649_v41, %v1633_v12  ;;  %v1766_v32 = vrot.slane %v1760_v17, 1  ;;  %v1767_v0 = vrot.slane %v1761_v2, 1  ;;  %v5381_v17 = vld [vmem:[#allocation2 + $0x90] sm:$0xff]  ;;  %v5383_v2 = vld [vmem:[#allocation2 + $0x98] sm:$0xff] }
 0x136   : > { %v1786_v57 = vrot.slane %v1780_v53, 2  ;;  %v1787_v47 = vrot.slane %v1781_v26, 2  ;;  %v1694_v45 = vmul.f32 %v5000_v10, %v1677_v36  ;;  %v5368_v49 = vmul.f32 %v5005_v11, %v1677_v36 }
 0x137   : > { %v1768_v48 = vsel %vm899_vm4, %v1766_v32, %v1767_v0  ;;  %v1770_v12 = vsel %vm899_vm4, %v1767_v0, %v1769_v13  ;;  %v1814_v40 = vmul.f32 %v4945_v6, %v1797_v50  ;;  %v5379_v18 = vmul.f32 %v4950_v7, %v1797_v50 }
 0x138   : > { %6920 = vst [vmem:[#allocation8_spill] sm:$0xff] %v5368_v49  ;;  %v1773_v36 = vadd.f32 %v1768_v48, %v1751_v42  ;;  %v1774_v46 = vadd.f32 %v1770_v12, %v1752_v29  ;;  %v1701_v41 = vrot.slane %v1694_v45, 1  ;;  %v5388_v32 = vmul.f32 %v5364_v21, %v1918_v33 }
 0x139   : > { %v1821_v26 = vrot.slane %v1814_v40, 1  ;;  %v5391_v13 = vmul.f32 %v5373_v58, %v1918_v33  ;;  %v1667_v50 = vsel %vm920_vm5, %v1665_v37, %v1666_v4  ;;  %v1669_v0 = vsel %vm920_vm5, %v1666_v4, %v1668_v9 }
 0x13a   : > { %v1683_v42 = vmul.f32 %v5028_v44, %v5381_v17  ;;  %v1684_v29 = vmul.f32 %v5028_v44, %v5383_v2  ;;  %v1942_v45 = vrot.slane %v5388_v32, 1  ;;  %v1672_v12 = vadd.f32 %v1667_v50, %v1652_v55 }
 0x13b   : > { %v1673_v40 = vadd.f32 %v1669_v0, %v1653_v52  ;;  %v1692_v33 = vmul.f32 %v5000_v10, %v5381_v17  ;;  %v1693_v62 = vmul.f32 %v5000_v10, %v5383_v2  ;;  %v5409_v9 = vmul.f32 %v5005_v11, %v5381_v17 }
 0x13c   : > { %v5413_v37 = vmul.f32 %v5005_v11, %v5383_v2  ;;  %v1685_v4 = vadd.f32 %v1683_v42, %v1672_v12  ;;  %v1788_v53 = vsel %vm920_vm5, %v1786_v57, %v1787_v47  ;;  %v6923_v52 = vrot.slane %v5314_v60, 2 }
 0x13d   : > { %6921 = vst [vmem:[#allocation9_spill] sm:$0xff] %v5409_v9  ;;  %v1686_v32 = vadd.f32 %v1684_v29, %v1673_v40  ;;  %v1698_v50 = vrot.slane %v1692_v33, 1  ;;  %v1699_v0 = vrot.slane %v1693_v62, 1  ;;  %v1793_v49 = vadd.f32 %v1788_v53, %v1773_v36  ;;  %v5425_v29 = vpop.f32.mrf.mxu0  ;;  %v5436_v36 = vld [vmem:[%s6887_s3] ss:$0 sm:$0xff] }
 0x13e   : > { %6922 = vst [vmem:[#allocation10_spill] sm:$0xff] %v5413_v37  ;;  %v1790_v55 = vsel %vm920_vm5, %v1787_v47, %v6923_v52  ;;  %v1803_v16 = vmul.f32 %v4975_v28, %v5381_v17  ;;  %v1804_v42 = vmul.f32 %v4975_v28, %v5383_v2  ;;  %v1812_v47 = vmul.f32 %v4945_v6, %v5381_v17 }
 0x13f   : > { %v1794_v61 = vadd.f32 %v1790_v55, %v1774_v46  ;;  %v1700_v60 = vsel %vm899_vm4, %v1698_v50, %v1699_v0  ;;  %v1702_v57 = vsel %vm899_vm4, %v1699_v0, %v1701_v41  ;;  %v1813_v12 = vmul.f32 %v4945_v6, %v5383_v2 }
 0x140   : > { %v5438_v46 = vadd.f32 %v1700_v60, %v1685_v4  ;;  %v5440_v28 = vadd.f32 %v1702_v57, %v1686_v32  ;;  %v1805_v53 = vadd.f32 %v1803_v16, %v1793_v49  ;;  %v1818_v33 = vrot.slane %v1812_v47, 1  ;;  %v5457_v49 = vld [vmem:[%s6887_s3 + $0x4] ss:$0 sm:$0xff]  ;;  %v5459_v32 = vpop.f32.mrf.mxu0  ;;  %v1970_v60 = vld [vmem:[#allocation2 + $0xb8] sm:$0x3] }
 0x141   : > { %v1806_v40 = vadd.f32 %v1804_v42, %v1794_v61  ;;  %v1819_v62 = vrot.slane %v1813_v12, 1  ;;  %v1832_v41 = vmul.f32 %v4950_v7, %v5381_v17  ;;  %v1833_v52 = vmul.f32 %v4950_v7, %v5383_v2  ;;  %v1850_v61 = vld [vmem:[#allocation2 + $0xb8] sm:$0x3]  ;;  %v5466_v57 = vld [vmem:[%s6887_s3 + $0x5] ss:$0 sm:$0xff] }
 0x142   : > { %6924 = vst [vmem:[#allocation11_spill] sm:$0xff] %v5438_v46  ;;  %6925 = vst [vmem:[#allocation12_spill] sm:$0xff] %v5440_v28  ;;  %v1924_v6 = vmul.f32 %v5436_v36, %v5381_v17  ;;  %v1925_v55 = vmul.f32 %v5436_v36, %v5383_v2  ;;  %v1933_v4 = vmul.f32 %v5364_v21, %v5381_v17  ;;  %v1848_v46 = vld [vmem:[#allocation2 + $0xa8] sm:$0xff]  ;;  %v729_v15 = vmax.f32 %v5156_v35, 0.0 }
 0x143   : > { %v1934_v16 = vmul.f32 %v5364_v21, %v5383_v2  ;;  %v1820_v7 = vsel %vm899_vm4, %v1818_v33, %v1819_v62  ;;  %v1822_v50 = vsel %vm899_vm4, %v1819_v62, %v1821_v26  ;;  %v1838_v0 = vrot.slane %v1832_v41, 2 }
 0x144   : > { %v1839_v42 = vrot.slane %v1833_v52, 2  ;;  %v1825_v47 = vadd.f32 %v1820_v7, %v1805_v53  ;;  %v1826_v12 = vadd.f32 %v1822_v50, %v1806_v40  ;;  %v1939_v48 = vrot.slane %v1933_v4, 1  ;;  %v2091_v4 = vld [vmem:[#allocation2 + $0xb8] sm:$0x3] }
 0x145   : > { %v1940_v38 = vrot.slane %v1934_v16, 1  ;;  %v1953_v28 = vmul.f32 %v5373_v58, %v5381_v17  ;;  %v1954_v33 = vmul.f32 %v5373_v58, %v5383_v2  ;;  %v1867_v26 = vmul.f32 %v5000_v10, %v1850_v61  ;;  %v5484_v17 = vpop.f32.mrf.mxu0 }
 0x146   : > { %v5474_v62 = vmul.f32 %v5005_v11, %v1850_v61  ;;  %v5479_v53 = vmul.f32 %v5457_v49, %v1970_v60  ;;  %v5482_v40 = vmul.f32 %v5466_v57, %v1970_v60  ;;  %v1849_v61 = vld [vmem:[#allocation2 + $0xb0] sm:$0xff]  ;;  %v5490_v37 = vmul.f32 %v5364_v21, %v2091_v4 }
 0x147   : > { %v1941_v41 = vsel %vm899_vm4, %v1939_v48, %v1940_v38  ;;  %v1943_v52 = vsel %vm899_vm4, %v1940_v38, %v1942_v45  ;;  %v1959_v7 = vrot.slane %v1953_v28, 2  ;;  %v1960_v50 = vrot.slane %v1954_v33, 2 }
 0x148   : > { %6926 = vst [vmem:[#allocation13_spill] sm:$0xff] %v5474_v62  ;;  %v1946_v16 = vadd.f32 %v1941_v41, %v1924_v6  ;;  %v1947_v2 = vadd.f32 %v1943_v52, %v1925_v55  ;;  %v1874_v9 = vrot.slane %v1867_v26, 1  ;;  %v1994_v38 = vrot.slane %v5479_v53, 1  ;;  %v5501_v53 = vpop.f32.mrf.mxu0 }
 0x149   : > { %v5493_v60 = vmul.f32 %v5373_v58, %v2091_v4  ;;  %v1840_v6 = vsel %vm920_vm5, %v1838_v0, %v1839_v42  ;;  %v6927_v28 = vrot.slane %v5379_v18, 2  ;;  %v1856_v41 = vmul.f32 %v5028_v44, %v1848_v46 }
 0x14a   : > { %v1845_v33 = vadd.f32 %v1840_v6, %v1825_v47  ;;  %v1857_v52 = vmul.f32 %v5028_v44, %v1849_v61  ;;  %v2115_v48 = vrot.slane %v5490_v37, 1  ;;  %v1865_v4 = vmul.f32 %v5000_v10, %v1848_v46  ;;  %v5516_v44 = vld [vmem:[%s6887_s3 + $0x3] ss:$0 sm:$0xff] }
 0x14b   : > { %v1842_v55 = vsel %vm920_vm5, %v1839_v42, %v6927_v28  ;;  %v1866_v0 = vmul.f32 %v5000_v10, %v1849_v61  ;;  %v5508_v42 = vmul.f32 %v5005_v11, %v1848_v46  ;;  %v5511_v47 = vmul.f32 %v5005_v11, %v1849_v61 }
 0x14c   : > { %v1846_v26 = vadd.f32 %v1842_v55, %v1826_v12  ;;  %v1858_v62 = vadd.f32 %v1856_v41, %v1845_v33  ;;  %v1871_v37 = vrot.slane %v1865_v4, 1  ;;  %v1961_v6 = vsel %vm920_vm5, %v1959_v7, %v1960_v50  ;;  %v644_v41 = vpop.f32.mrf.mxu0 }
 0x14d   : > { %6928 = vst [vmem:[#allocation14_spill] sm:$0xff] %v5508_v42  ;;  %6929 = vst [vmem:[#allocation15_spill] sm:$0xff] %v5511_v47  ;;  %v1872_v12 = vrot.slane %v1866_v0, 1  ;;  %v6930_v28 = vrot.slane %v5391_v13, 2  ;;  %v1976_v4 = vmul.f32 %v5516_v44, %v1848_v46  ;;  %v1977_v0 = vmul.f32 %v5516_v44, %v1849_v61 }
 0x14e   : > { %v1859_v18 = vadd.f32 %v1857_v52, %v1846_v26  ;;  %v1966_v26 = vadd.f32 %v1961_v6, %v1946_v16  ;;  %v2107_v33 = vmul.f32 %v5364_v21, %v1849_v61 }
 0x14f   : > { %v1963_v10 = vsel %vm920_vm5, %v1960_v50, %v6930_v28  ;;  %v1873_v52 = vsel %vm899_vm4, %v1871_v37, %v1872_v12  ;;  %v1875_v45 = vsel %vm899_vm4, %v1872_v12, %v1874_v9  ;;  %v1985_v50 = vmul.f32 %v5457_v49, %v1848_v46 }
 0x150   : > { %v1967_v11 = vadd.f32 %v1963_v10, %v1947_v2  ;;  %v5528_v7 = vadd.f32 %v1873_v52, %v1858_v62  ;;  %v5530_v13 = vadd.f32 %v1875_v45, %v1859_v18  ;;  %v1986_v28 = vmul.f32 %v5457_v49, %v1849_v61  ;;  %v4559_v62 = vpop.f32.mrf.mxu0 }
 0x151   : > { %v1978_v55 = vadd.f32 %v1976_v4, %v1966_v26  ;;  %v2005_v2 = vmul.f32 %v5466_v57, %v1848_v46  ;;  %v2006_v37 = vmul.f32 %v5466_v57, %v1849_v61  ;;  %v1991_v6 = vrot.slane %v1985_v50, 1 }
 0x152   : > { %6931 = vst [vmem:[#allocation16_spill] sm:$0xff] %v5528_v7  ;;  %6932 = vst [vmem:[#allocation17_spill] sm:$0xff] %v5530_v13  ;;  %v1979_v16 = vadd.f32 %v1977_v0, %v1967_v11  ;;  %v1992_v9 = vrot.slane %v1986_v28, 1  ;;  %v2097_v12 = vmul.f32 %v5436_v36, %v1848_v46  ;;  %v2098_v10 = vmul.f32 %v5436_v36, %v1849_v61  ;;  %v654_v22 = vpop.f32.mrf.mxu0 }
 0x153   : > { %v2011_v52 = vrot.slane %v2005_v2, 2  ;;  %v2012_v45 = vrot.slane %v2006_v37, 2  ;;  %v2106_v18 = vmul.f32 %v5364_v21, %v1848_v46  ;;  %v2126_v4 = vmul.f32 %v5373_v58, %v1848_v46 }
 0x154   : > { %v1993_v26 = vsel %vm899_vm4, %v1991_v6, %v1992_v9  ;;  %v1995_v11 = vsel %vm899_vm4, %v1992_v9, %v1994_v38  ;;  %v2127_v0 = vmul.f32 %v5373_v58, %v1849_v61  ;;  %v2113_v7 = vrot.slane %v2107_v33, 1 }
 0x155   : > { %v1998_v50 = vadd.f32 %v1993_v26, %v1978_v55  ;;  %v1999_v28 = vadd.f32 %v1995_v11, %v1979_v16  ;;  %v2112_v13 = vrot.slane %v2106_v18, 1  ;;  %v2132_v42 = vrot.slane %v2126_v4, 2  ;;  %v5587_v26 = vld [vmem:[%s6887_s3 + $0x7] ss:$0 sm:$0xff] }
 0x156   : > { %v2133_v47 = vrot.slane %v2127_v0, 2  ;;  %v6933_v2 = vmax.f32 %v5150_v14, 0.0  ;;  %v2116_v38 = vsel %vm899_vm4, %v2113_v7, %v2115_v48  ;;  %v2013_v46 = vsel %vm920_vm5, %v2011_v52, %v2012_v45 }
 0x157   : > { %v2114_v6 = vsel %vm899_vm4, %v2112_v13, %v2113_v7  ;;  %v6934_v61 = vrot.slane %v5482_v40, 2  ;;  %v2120_v33 = vadd.f32 %v2116_v38, %v2098_v10  ;;  %v765_v9 = vmin.f32 %v729_v15, 6.0  ;;  %v5571_v15 = vld [vmem:[%s6886_s2] ss:$0 sm:$0xff] }
 0x158   : > { %v766_v37 = vmin.f32 %v6933_v2, 6.0  ;;  %v2119_v16 = vadd.f32 %v2114_v6, %v2097_v12  ;;  %v5554_v14 = vadd.f32 %v2013_v46, %v1998_v50  ;;  %v2134_v35 = vsel %vm920_vm5, %v2132_v42, %v2133_v47 }
 0x159   : > { %v2015_v55 = vsel %vm920_vm5, %v2012_v45, %v6934_v61  ;;  %v6935_v13 = vrot.slane %v5493_v60, 2  ;;  %v732_v7 = vmax.f32 %v5159_v24, 0.0  ;;  %839 = vst.msk [vmem:[#allocation2 + $0xc1] sm:$0xff] %vm822_vm2, %v765_v9  ;;  %v625_v42 = vadd.f32 %v5571_v15, %v5425_v29 }
 0x15a   : > { %840 = vst.msk [vmem:[#allocation2 + $0xc9] sm:$0xff] %vm822_vm2, %v766_v37  ;;  %v5556_v18 = vadd.f32 %v2015_v55, %v1999_v28  ;;  %v5564_v40 = vadd.f32 %v2134_v35, %v2119_v16  ;;  %v640_v60 = vadd.f32 %v5571_v15, %v5459_v32  ;;  %v635_v24 = vadd.f32 %v5571_v15, %v5484_v17  ;;  %v5598_v17 = vld [vmem:[%s6887_s3 + $0x8] ss:$0 sm:$0xff] }
 0x15b   : > { %v2136_v48 = vsel %vm920_vm5, %v2133_v47, %v6935_v13  ;;  %v4562_v47 = vpop.f32.mrf.mxu0  ;;  %v768_v10 = vmin.f32 %v732_v7, 6.0  ;;  %v650_v52 = vadd.f32 %v5571_v15, %v5501_v53  ;;  %v5582_v45 = vadd.f32 %v5571_v15, %v644_v41 }
 0x15c   : > { %v5566_v12 = vadd.f32 %v2136_v48, %v2120_v33  ;;  %v731_v29 = vmax.f32 %v625_v42, 0.0  ;;  %v734_v11 = vmax.f32 %v640_v60, 0.0  ;;  %v5590_v32 = vadd.f32 %v5571_v15, %v4559_v62 }
 0x15d   : > { %v5593_v4 = vadd.f32 %v5571_v15, %v654_v22  ;;  %842 = vst.msk [vmem:[#allocation2 + $0xe1] sm:$0xff] %vm822_vm2, %v768_v10  ;;  %v733_v53 = vmax.f32 %v635_v24, 0.0  ;;  %v736_v41 = vmax.f32 %v650_v52, 0.0  ;;  %v5603_v50 = vadd.f32 %v5571_v15, %v4562_v47 }
 0x15e   : > { %v767_v28 = vmin.f32 %v731_v29, 6.0  ;;  %v770_v62 = vmin.f32 %v734_v11, 6.0  ;;  %v6936_v46 = vrot.slane %v5055_v63, 1  ;;  %v6937_v61 = vrot.slane %v5052_v5, 1 }
 0x15f   : > { %v6938_v16 = vrot.slane %v5014_v30, 1  ;;  %v6940_v35 = vrot.slane %v5061_v39, 2  ;;  %v6941_v13 = vrot.slane %v5058_v25, 2  ;;  %v6942_v7 = vrot.slane %v5017_v31, 2  ;;  %v5646_v25 = vld [vmem:[%s6887_s3 + $0x6] ss:$0 sm:$0xff] }
 0x160   : > { %v5612_v55 = vsel %vm899_vm4, %v6937_v61, %v6936_v46  ;;  %v6939_v33 = vmov %v6936_v46  ;;  %841 = vst.msk [vmem:[#allocation2 + $0xd9] sm:$0xff] %vm822_vm2, %v767_v28  ;;  %844 = vst.msk [vmem:[#allocation2 + $0xf9] sm:$0xff] %vm822_vm2, %v770_v62  ;;  %v2021_v10 = vld [vmem:[#allocation2 + $0xc0] sm:$0xff]  ;;  %v769_v52 = vmin.f32 %v733_v53, 6.0  ;;  %v772_v29 = vmin.f32 %v736_v41, 6.0 }
 0x161   : > { %v2023_v37 = vld [vmem:[#allocation2 + $0xd0] sm:$0x3]  ;;  %v5619_v9 = vsel %vm899_vm4, %v6939_v33, %v6938_v16  ;;  %v5626_v48 = vsel %vm920_vm5, %v6941_v13, %v6940_v35  ;;  %v6943_v5 = vmov %v6940_v35  ;;  %v2022_v24 = vld [vmem:[#allocation2 + $0xc8] sm:$0xff]  ;;  %v2029_v61 = vmul.f32 %v5646_v25, %v2021_v10 }
 0x162   : > { %v2143_v6 = vld [vmem:[#allocation2 + $0xd0] sm:$0x3]  ;;  %v5633_v42 = vsel %vm920_vm5, %v6943_v5, %v6942_v7  ;;  %v2040_v30 = vmul.f32 %v5587_v26, %v2023_v37  ;;  %v5637_v63 = vmul.f32 %v5598_v17, %v2023_v37  ;;  %v2030_v16 = vmul.f32 %v5646_v25, %v2022_v24  ;;  %843 = vst.msk [vmem:[#allocation2 + $0xf1] sm:$0xff] %vm822_vm2, %v769_v52 }
 0x163   : > { %v2264_v38 = vld [vmem:[#allocation2 + $0xd0] sm:$0x3]  ;;  %v2160_v60 = vmul.f32 %v5457_v49, %v2143_v6  ;;  %v5641_v47 = vmul.f32 %v5466_v57, %v2143_v6  ;;  %846 = vst.msk [vmem:[#allocation2 + $0x111] sm:$0xff] %vm822_vm2, %v772_v29  ;;  %v2038_v53 = vmul.f32 %v5587_v26, %v2021_v10  ;;  %v2039_v41 = vmul.f32 %v5587_v26, %v2022_v24 }
 0x164   : > { %6944 = vst [vmem:[#allocation18_spill] sm:$0xff] %v5637_v63  ;;  %v5651_v31 = vmul.f32 %v5364_v21, %v2264_v38  ;;  %v5654_v39 = vmul.f32 %v5373_v58, %v2264_v38  ;;  %v2047_v11 = vrot.slane %v2040_v30, 1  ;;  %v5667_v38 = vmul.f32 %v5598_v17, %v2021_v10  ;;  %v2196_v0 = vld [vmem:[#allocation2 + $0xe8] sm:$0x3] }
 0x165   : > { %v2167_v6 = vrot.slane %v2160_v60, 1  ;;  %v5670_v33 = vmul.f32 %v5598_v17, %v2022_v24  ;;  %v2031_v35 = vadd.f32 %v2029_v61, %v5554_v14  ;;  %v2032_v13 = vadd.f32 %v2030_v16, %v5556_v18 }
 0x166   : > { %v2288_v28 = vrot.slane %v5651_v31, 1  ;;  %6945 = vst [vmem:[#allocation19_spill] sm:$0xff] %v5667_v38  ;;  %v2149_v7 = vmul.f32 %v5516_v44, %v2021_v10  ;;  %v2150_v5 = vmul.f32 %v5516_v44, %v2022_v24  ;;  %v2044_v30 = vrot.slane %v2038_v53, 1 }
 0x167   : > { %6946 = vst [vmem:[#allocation20_spill] sm:$0xff] %v5670_v33  ;;  %v2045_v60 = vrot.slane %v2039_v41, 1  ;;  %v2158_v22 = vmul.f32 %v5457_v49, %v2021_v10  ;;  %v2159_v14 = vmul.f32 %v5457_v49, %v2022_v24  ;;  %v2178_v16 = vmul.f32 %v5466_v57, %v2021_v10 }
 0x168   : > { %v2151_v29 = vadd.f32 %v2149_v7, %v5564_v40  ;;  %v2152_v37 = vadd.f32 %v2150_v5, %v5566_v12  ;;  %v2179_v53 = vmul.f32 %v5466_v57, %v2022_v24  ;;  %v2270_v5 = vmul.f32 %v5436_v36, %v2021_v10 }
 0x169   : > { %v2046_v18 = vsel %vm899_vm4, %v2044_v30, %v2045_v60  ;;  %v2048_v61 = vsel %vm899_vm4, %v2045_v60, %v2047_v11  ;;  %v2164_v52 = vrot.slane %v2158_v22, 1  ;;  %v2165_v40 = vrot.slane %v2159_v14, 1 }
 0x16a   : > { %v5686_v41 = vadd.f32 %v2046_v18, %v2031_v35  ;;  %v5688_v31 = vadd.f32 %v2048_v61, %v2032_v13  ;;  %v2184_v7 = vrot.slane %v2178_v16, 2  ;;  %v2185_v12 = vrot.slane %v2179_v53, 2  ;;  %v2316_v18 = vld [vmem:[#allocation2 + $0xe8] sm:$0x3] }
 0x16b   : > { %v2271_v2 = vmul.f32 %v5436_v36, %v2022_v24  ;;  %v2166_v30 = vsel %vm899_vm4, %v2164_v52, %v2165_v40  ;;  %v2168_v11 = vsel %vm899_vm4, %v2165_v40, %v2167_v6  ;;  %v2279_v60 = vmul.f32 %v5364_v21, %v2021_v10 }
 0x16c   : > { %6947 = vst [vmem:[#allocation21_spill] sm:$0xff] %v5686_v41  ;;  %6948 = vst [vmem:[#allocation22_spill] sm:$0xff] %v5688_v31  ;;  %v2280_v35 = vmul.f32 %v5364_v21, %v2022_v24  ;;  %v2171_v13 = vadd.f32 %v2166_v30, %v2151_v29  ;;  %v2172_v61 = vadd.f32 %v2168_v11, %v2152_v37  ;;  %v2437_v29 = vld [vmem:[#allocation2 + $0xe8] sm:$0x3]  ;;  %v2194_v11 = vld [vmem:[#allocation2 + $0xd8] sm:$0xff] }
 0x16d   : > { %v2299_v22 = vmul.f32 %v5373_v58, %v2021_v10  ;;  %v2300_v14 = vmul.f32 %v5373_v58, %v2022_v24  ;;  %v2285_v16 = vrot.slane %v2279_v60, 1  ;;  %v2213_v62 = vmul.f32 %v5587_v26, %v2196_v0  ;;  %v2195_v60 = vld [vmem:[#allocation2 + $0xe0] sm:$0xff] }
 0x16e   : > { %v2286_v53 = vrot.slane %v2280_v35, 1  ;;  %v5700_v46 = vmul.f32 %v5598_v17, %v2196_v0  ;;  %v2333_v40 = vmul.f32 %v5457_v49, %v2316_v18  ;;  %v5704_v31 = vmul.f32 %v5466_v57, %v2316_v18 }
 0x16f   : > { %v2305_v52 = vrot.slane %v2299_v22, 2  ;;  %v2306_v6 = vrot.slane %v2300_v14, 2  ;;  %v2220_v24 = vrot.slane %v2213_v62, 1  ;;  %v2454_v14 = vmul.f32 %v5364_v21, %v2437_v29 }
 0x170   : > { %6949 = vst [vmem:[#allocation23_spill] sm:$0xff] %v5700_v46  ;;  %v2287_v37 = vsel %vm899_vm4, %v2285_v16, %v2286_v53  ;;  %v2289_v10 = vsel %vm899_vm4, %v2286_v53, %v2288_v28  ;;  %v2340_v63 = vrot.slane %v2333_v40, 1  ;;  %v5712_v18 = vmul.f32 %v5373_v58, %v2437_v29 }
 0x171   : > { %v2292_v35 = vadd.f32 %v2287_v37, %v2270_v5  ;;  %v2293_v0 = vadd.f32 %v2289_v10, %v2271_v2  ;;  %v2186_v41 = vsel %vm920_vm5, %v2184_v7, %v2185_v12  ;;  %v6950_v16 = vrot.slane %v5641_v47, 2 }
 0x172   : > { %v2191_v62 = vadd.f32 %v2186_v41, %v2171_v13  ;;  %v2202_v30 = vmul.f32 %v5646_v25, %v2194_v11  ;;  %v2203_v2 = vmul.f32 %v5646_v25, %v2195_v60  ;;  %v2461_v5 = vrot.slane %v2454_v14, 1 }
 0x173   : > { %v2188_v28 = vsel %vm920_vm5, %v2185_v12, %v6950_v16  ;;  %v2211_v37 = vmul.f32 %v5587_v26, %v2194_v11  ;;  %v2212_v29 = vmul.f32 %v5587_v26, %v2195_v60  ;;  %v5724_v7 = vmul.f32 %v5598_v17, %v2194_v11 }
 0x174   : > { %v2192_v53 = vadd.f32 %v2188_v28, %v2172_v61  ;;  %v2204_v10 = vadd.f32 %v2202_v30, %v2191_v62  ;;  %v5727_v47 = vmul.f32 %v5598_v17, %v2195_v60  ;;  %v2307_v13 = vsel %vm920_vm5, %v2305_v52, %v2306_v6 }
 0x175   : > { %6951 = vst [vmem:[#allocation24_spill] sm:$0xff] %v5724_v7  ;;  %v2217_v41 = vrot.slane %v2211_v37, 1  ;;  %v2218_v12 = vrot.slane %v2212_v29, 1  ;;  %v6953_v61 = vrot.slane %v5654_v39, 2  ;;  %v2312_v30 = vadd.f32 %v2307_v13, %v2292_v35 }
 0x176   : > { %v2205_v22 = vadd.f32 %v2203_v2, %v2192_v53  ;;  %6952 = vst [vmem:[#allocation25_spill] sm:$0xff] %v5727_v47  ;;  %v2322_v40 = vmul.f32 %v5516_v44, %v2194_v11  ;;  %v2323_v37 = vmul.f32 %v5516_v44, %v2195_v60  ;;  %v2331_v39 = vmul.f32 %v5457_v49, %v2194_v11  ;;  %v2610_v47 = vld [vmem:[#allocation2 + $0x100] sm:$0x3] }
 0x177   : > { %v2309_v14 = vsel %vm920_vm5, %v2306_v6, %v6953_v61  ;;  %v2219_v53 = vsel %vm899_vm4, %v2217_v41, %v2218_v12  ;;  %v2221_v2 = vsel %vm899_vm4, %v2218_v12, %v2220_v24  ;;  %v2332_v6 = vmul.f32 %v5457_v49, %v2195_v60 }
 0x178   : > { %v2313_v62 = vadd.f32 %v2309_v14, %v2293_v0  ;;  %v5739_v29 = vadd.f32 %v2219_v53, %v2204_v10  ;;  %v5741_v52 = vadd.f32 %v2221_v2, %v2205_v22  ;;  %v2324_v61 = vadd.f32 %v2322_v40, %v2312_v30  ;;  %v2369_v2 = vld [vmem:[#allocation2 + $0x100] sm:$0x3] }
 0x179   : > { %v2351_v35 = vmul.f32 %v5466_v57, %v2194_v11  ;;  %v2352_v0 = vmul.f32 %v5466_v57, %v2195_v60  ;;  %v2337_v41 = vrot.slane %v2331_v39, 1  ;;  %v2338_v24 = vrot.slane %v2332_v6, 1  ;;  %v2489_v39 = vld [vmem:[#allocation2 + $0x100] sm:$0x3] }
 0x17a   : > { %6954 = vst [vmem:[#allocation26_spill] sm:$0xff] %v5739_v29  ;;  %6955 = vst [vmem:[#allocation27_spill] sm:$0xff] %v5741_v52  ;;  %v2325_v16 = vadd.f32 %v2323_v37, %v2313_v62  ;;  %v2443_v12 = vmul.f32 %v5436_v36, %v2194_v11  ;;  %v2444_v13 = vmul.f32 %v5436_v36, %v2195_v60 }
 0x17b   : > { %v2357_v10 = vrot.slane %v2351_v35, 2  ;;  %v2358_v14 = vrot.slane %v2352_v0, 2  ;;  %v2452_v22 = vmul.f32 %v5364_v21, %v2194_v11  ;;  %v2453_v53 = vmul.f32 %v5364_v21, %v2195_v60 }
 0x17c   : > { %v2339_v40 = vsel %vm899_vm4, %v2337_v41, %v2338_v24  ;;  %v2341_v30 = vsel %vm899_vm4, %v2338_v24, %v2340_v63  ;;  %v2472_v62 = vmul.f32 %v5373_v58, %v2194_v11  ;;  %v2473_v37 = vmul.f32 %v5373_v58, %v2195_v60 }
 0x17d   : > { %v2344_v6 = vadd.f32 %v2339_v40, %v2324_v61  ;;  %v2345_v28 = vadd.f32 %v2341_v30, %v2325_v16  ;;  %v2458_v52 = vrot.slane %v2452_v22, 1  ;;  %v2459_v46 = vrot.slane %v2453_v53, 1  ;;  %v2367_v16 = vld [vmem:[#allocation2 + $0xf0] sm:$0xff]  ;;  %v2368_v61 = vld [vmem:[#allocation2 + $0xf8] sm:$0xff] }
 0x17e   : > { %v2478_v35 = vrot.slane %v2472_v62, 2  ;;  %v2479_v0 = vrot.slane %v2473_v37, 2  ;;  %v2386_v29 = vmul.f32 %v5587_v26, %v2369_v2  ;;  %v5757_v7 = vmul.f32 %v5598_v17, %v2369_v2 }
 0x17f   : > { %v2460_v41 = vsel %vm899_vm4, %v2458_v52, %v2459_v46  ;;  %v2462_v63 = vsel %vm899_vm4, %v2459_v46, %v2461_v5  ;;  %v2506_v11 = vmul.f32 %v5457_v49, %v2489_v39  ;;  %v5763_v60 = vmul.f32 %v5466_v57, %v2489_v39 }
 0x180   : > { %6956 = vst [vmem:[#allocation28_spill] sm:$0xff] %v5757_v7  ;;  %v2465_v24 = vadd.f32 %v2460_v41, %v2443_v12  ;;  %v2466_v22 = vadd.f32 %v2462_v63, %v2444_v13  ;;  %v2393_v53 = vrot.slane %v2386_v29, 1  ;;  %v2627_v62 = vmul.f32 %v5364_v21, %v2610_v47 }
 0x181   : > { %v2513_v30 = vrot.slane %v2506_v11, 1  ;;  %v5769_v52 = vmul.f32 %v5373_v58, %v2610_v47  ;;  %v2359_v46 = vsel %vm920_vm5, %v2357_v10, %v2358_v14  ;;  %v6957_v5 = vrot.slane %v5704_v31, 2 }
 0x182   : > { %v2375_v12 = vmul.f32 %v5646_v25, %v2367_v16  ;;  %v2376_v29 = vmul.f32 %v5646_v25, %v2368_v61  ;;  %v2634_v13 = vrot.slane %v2627_v62, 1  ;;  %v2364_v41 = vadd.f32 %v2359_v46, %v2344_v6 }
 0x183   : > { %v2361_v37 = vsel %vm920_vm5, %v2358_v14, %v6957_v5  ;;  %v2384_v11 = vmul.f32 %v5587_v26, %v2367_v16  ;;  %v2385_v47 = vmul.f32 %v5587_v26, %v2368_v61  ;;  %v5781_v40 = vmul.f32 %v5598_v17, %v2367_v16 }
 0x184   : > { %v2365_v63 = vadd.f32 %v2361_v37, %v2345_v28  ;;  %v5784_v31 = vmul.f32 %v5598_v17, %v2368_v61  ;;  %v2377_v10 = vadd.f32 %v2375_v12, %v2364_v41  ;;  %v2480_v5 = vsel %vm920_vm5, %v2478_v35, %v2479_v0 }
 0x185   : > { %v6958_v62 = vrot.slane %v5712_v18, 2  ;;  %v2390_v6 = vrot.slane %v2384_v11, 1  ;;  %v2391_v28 = vrot.slane %v2385_v47, 1  ;;  %v2485_v2 = vadd.f32 %v2480_v5, %v2465_v24  ;;  %v664_v5 = vpop.f32.mrf.mxu0 }
 0x186   : > { %v2378_v14 = vadd.f32 %v2376_v29, %v2365_v63  ;;  %v2495_v38 = vmul.f32 %v5516_v44, %v2367_v16  ;;  %v2496_v33 = vmul.f32 %v5516_v44, %v2368_v61  ;;  %v2504_v18 = vmul.f32 %v5457_v49, %v2367_v16 }
 0x187   : > { %v2482_v39 = vsel %vm920_vm5, %v2479_v0, %v6958_v62  ;;  %v2392_v12 = vsel %vm899_vm4, %v2390_v6, %v2391_v28  ;;  %v2394_v35 = vsel %vm899_vm4, %v2391_v28, %v2393_v53  ;;  %v2505_v0 = vmul.f32 %v5457_v49, %v2368_v61  ;;  %v2542_v28 = vld [vmem:[#allocation2 + $0x118] sm:$0x3] }
 0x188   : > { %v2486_v7 = vadd.f32 %v2482_v39, %v2466_v22  ;;  %v5798_v29 = vadd.f32 %v2392_v12, %v2377_v10  ;;  %v5800_v41 = vadd.f32 %v2394_v35, %v2378_v14  ;;  %v2497_v63 = vadd.f32 %v2495_v38, %v2485_v2  ;;  %v2662_v2 = vld [vmem:[#allocation2 + $0x118] sm:$0x3] }
 0x189   : > { %v2510_v24 = vrot.slane %v2504_v18, 1  ;;  %v2511_v22 = vrot.slane %v2505_v0, 1  ;;  %v2524_v39 = vmul.f32 %v5466_v57, %v2367_v16  ;;  %v2525_v47 = vmul.f32 %v5466_v57, %v2368_v61 }
 0x18a   : > { %6959 = vst [vmem:[#allocation29_spill] sm:$0xff] %v5798_v29  ;;  %6960 = vst [vmem:[#allocation30_spill] sm:$0xff] %v5800_v41  ;;  %v2498_v11 = vadd.f32 %v2496_v33, %v2486_v7  ;;  %v2616_v62 = vmul.f32 %v5436_v36, %v2367_v16  ;;  %v2617_v53 = vmul.f32 %v5436_v36, %v2368_v61 }
 0x18b   : > { %v2625_v6 = vmul.f32 %v5364_v21, %v2367_v16  ;;  %v2626_v10 = vmul.f32 %v5364_v21, %v2368_v61  ;;  %v2512_v14 = vsel %vm899_vm4, %v2510_v24, %v2511_v22  ;;  %v2514_v38 = vsel %vm899_vm4, %v2511_v22, %v2513_v30  ;;  %v4565_v24 = vpop.f32.mrf.mxu0 }
 0x18c   : > { %v2530_v33 = vrot.slane %v2524_v39, 2  ;;  %v2531_v7 = vrot.slane %v2525_v47, 2  ;;  %v2517_v12 = vadd.f32 %v2512_v14, %v2497_v63  ;;  %v2518_v35 = vadd.f32 %v2514_v38, %v2498_v11 }
 0x18d   : > { %v2631_v18 = vrot.slane %v2625_v6, 1  ;;  %v2632_v0 = vrot.slane %v2626_v10, 1  ;;  %v2645_v46 = vmul.f32 %v5373_v58, %v2367_v16  ;;  %v2646_v37 = vmul.f32 %v5373_v58, %v2368_v61  ;;  %v2783_v16 = vld [vmem:[#allocation2 + $0x118] sm:$0x3] }
 0x18e   : > { %v5813_v41 = vmul.f32 %v5587_v26, %v2542_v28  ;;  %v5816_v29 = vmul.f32 %v5598_v17, %v2542_v28  ;;  %v5821_v63 = vmul.f32 %v5457_v49, %v2662_v2  ;;  %v5824_v11 = vmul.f32 %v5466_v57, %v2662_v2 }
 0x18f   : > { %v2633_v30 = vsel %vm899_vm4, %v2631_v18, %v2632_v0  ;;  %v2635_v22 = vsel %vm899_vm4, %v2632_v0, %v2634_v13  ;;  %v2651_v47 = vrot.slane %v2645_v46, 2  ;;  %v2652_v6 = vrot.slane %v2646_v37, 2  ;;  %v674_v37 = vpop.f32.mrf.mxu0 }
 0x190   : > { %v2638_v39 = vadd.f32 %v2633_v30, %v2616_v62  ;;  %v2639_v61 = vadd.f32 %v2635_v22, %v2617_v53  ;;  %v5831_v13 = vmul.f32 %v5364_v21, %v2783_v16  ;;  %v5834_v18 = vmul.f32 %v5373_v58, %v2783_v16 }
 0x191   : > { %v6961_v2 = vmax.f32 %v5582_v45, 0.0  ;;  %v2532_v46 = vsel %vm920_vm5, %v2530_v33, %v2531_v7  ;;  %v6962_v53 = vrot.slane %v5763_v60, 2  ;;  %v2653_v22 = vsel %vm920_vm5, %v2651_v47, %v2652_v6 }
 0x192   : > { %v2537_v30 = vadd.f32 %v2532_v46, %v2517_v12  ;;  %v6963_v28 = vrot.slane %v5769_v52, 2  ;;  %v2807_v16 = vrot.slane %v5831_v13, 1  ;;  %v2827_v14 = vrot.slane %v5834_v18, 2 }
 0x193   : > { %v771_v62 = vmin.f32 %v6961_v2, 6.0  ;;  %v2534_v0 = vsel %vm920_vm5, %v2531_v7, %v6962_v53  ;;  %v2658_v33 = vadd.f32 %v2653_v22, %v2638_v39  ;;  %v6964_v60 = vmax.f32 %v5590_v32, 0.0  ;;  %v4568_v39 = vpop.f32.mrf.mxu0 }
 0x194   : > { %v2655_v38 = vsel %vm920_vm5, %v2652_v6, %v6963_v28  ;;  %v2538_v45 = vadd.f32 %v2534_v0, %v2518_v35  ;;  %v6965_v7 = vmax.f32 %v5593_v4, 0.0  ;;  %v740_v47 = vmax.f32 %v5603_v50, 0.0  ;;  %v5865_v4 = vld [vmem:[%s6888_s4] ss:$0 sm:$0xff] }
 0x195   : > { %845 = vst.msk [vmem:[#allocation2 + $0x109] sm:$0xff] %vm822_vm2, %v771_v62  ;;  %v2659_v2 = vadd.f32 %v2655_v38, %v2639_v61  ;;  %v774_v10 = vmin.f32 %v6964_v60, 6.0  ;;  %v1014_v52 = vadd.f32 %v5612_v55, %v5063_v1  ;;  %v1015_v6 = vadd.f32 %v5619_v9, %v5065_v8 }
 0x196   : > { %v773_v12 = vmin.f32 %v6965_v7, 6.0  ;;  %v665_v28 = vadd.f32 %v5571_v15, %v664_v5  ;;  %v680_v35 = vadd.f32 %v5571_v15, %v4565_v24  ;;  %v776_v32 = vmin.f32 %v740_v47, 6.0 }
 0x197   : > { %848 = vst.msk [vmem:[#allocation2 + $0x129] sm:$0xff] %vm822_vm2, %v774_v10  ;;  %v6966_v1 = vrot.slane %v5172_v34, 2  ;;  %v6967_v50 = vrot.slane %v5169_v54, 2  ;;  %v675_v55 = vadd.f32 %v5571_v15, %v674_v37  ;;  %v6968_v9 = vrot.slane %v5095_v23, 2 }
 0x198   : > { %847 = vst.msk [vmem:[#allocation2 + $0x121] sm:$0xff] %vm822_vm2, %v773_v12  ;;  %v1034_v61 = vadd.f32 %v5626_v48, %v1014_v52  ;;  %v1035_v10 = vadd.f32 %v5633_v42, %v1015_v6  ;;  %v739_v38 = vmax.f32 %v665_v28, 0.0  ;;  %v742_v62 = vmax.f32 %v680_v35, 0.0  ;;  %850 = vst.msk [vmem:[#allocation2 + $0x141] sm:$0xff] %vm822_vm2, %v776_v32 }
 0x199   : > { %v1201_v8 = vsel %vm920_vm5, %v6967_v50, %v6966_v1  ;;  %v6969_v5 = vmov %v6966_v1  ;;  %v741_v46 = vmax.f32 %v675_v55, 0.0  ;;  %v5884_v37 = vadd.f32 %v5571_v15, %v4568_v39 }
 0x19a   : > { %v1203_v24 = vsel %vm920_vm5, %v6969_v5, %v6968_v9  ;;  %v1206_v54 = vadd.f32 %v1201_v8, %v5186_v27  ;;  %v5887_v23 = vadd.f32 %v5865_v4, %v1034_v61  ;;  %v5890_v34 = vadd.f32 %v5865_v4, %v1035_v10 }
 0x19b   : > { %v1207_v53 = vadd.f32 %v1203_v24, %v5188_v3  ;;  %v775_v48 = vmin.f32 %v739_v38, 6.0  ;;  %v778_v42 = vmin.f32 %v742_v62, 6.0  ;;  %v777_v27 = vmin.f32 %v741_v46, 6.0 }
 0x19c   : > { %v2540_v0 = vld [vmem:[#allocation2 + $0x108] sm:$0xff]  ;;  %v2541_v22 = vld [vmem:[#allocation2 + $0x110] sm:$0xff]  ;;  %v5893_v60 = vadd.f32 %v5865_v4, %v1206_v54  ;;  %v6970_v10 = vrot.slane %v5813_v41, 1 }
 0x19d   : > { %v5896_v7 = vadd.f32 %v5865_v4, %v1207_v53  ;;  %v2548_v15 = vmul.f32 %v5646_v25, %v2540_v0  ;;  %v2549_v12 = vmul.f32 %v5646_v25, %v2541_v22  ;;  %v2557_v47 = vmul.f32 %v5587_v26, %v2540_v0  ;;  %849 = vst.msk [vmem:[#allocation2 + $0x139] sm:$0xff] %vm822_vm2, %v775_v48 }
 0x19e   : > { %v2558_v52 = vmul.f32 %v5587_v26, %v2541_v22  ;;  %852 = vst.msk [vmem:[#allocation2 + $0x159] sm:$0xff] %vm822_vm2, %v778_v42  ;;  %v5906_v6 = vmul.f32 %v5598_v17, %v2540_v0  ;;  %v5909_v28 = vmul.f32 %v5598_v17, %v2541_v22  ;;  %v2668_v35 = vmul.f32 %v5516_v44, %v2540_v0 }
 0x19f   : > { %v2669_v39 = vmul.f32 %v5516_v44, %v2541_v22  ;;  %851 = vst.msk [vmem:[#allocation2 + $0x151] sm:$0xff] %vm822_vm2, %v777_v27  ;;  %v2550_v32 = vadd.f32 %v2548_v15, %v2537_v30  ;;  %v2551_v1 = vadd.f32 %v2549_v12, %v2538_v45  ;;  %v2563_v50 = vrot.slane %v2557_v47, 1  ;;  %v2715_v47 = vld [vmem:[#allocation2 + $0x130] sm:$0x3] }
 0x1a0   : > { %v2564_v8 = vrot.slane %v2558_v52, 1  ;;  %v2670_v5 = vadd.f32 %v2668_v35, %v2658_v33  ;;  %v2677_v62 = vmul.f32 %v5457_v49, %v2540_v0  ;;  %v2678_v54 = vmul.f32 %v5457_v49, %v2541_v22 }
 0x1a1   : > { %v2671_v24 = vadd.f32 %v2669_v39, %v2659_v2  ;;  %v2697_v46 = vmul.f32 %v5466_v57, %v2540_v0  ;;  %v2698_v53 = vmul.f32 %v5466_v57, %v2541_v22  ;;  %v2789_v48 = vmul.f32 %v5436_v36, %v2540_v0 }
 0x1a2   : > { %v2565_v61 = vsel %vm899_vm4, %v2563_v50, %v2564_v8  ;;  %v2567_v38 = vsel %vm899_vm4, %v2564_v8, %v6970_v10  ;;  %v2683_v33 = vrot.slane %v2677_v62, 1  ;;  %v2684_v2 = vrot.slane %v2678_v54, 1  ;;  %v2835_v50 = vld [vmem:[#allocation2 + $0x130] sm:$0x3] }
 0x1a3   : > { %v5922_v30 = vadd.f32 %v2565_v61, %v2550_v32  ;;  %v5924_v45 = vadd.f32 %v2567_v38, %v2551_v1  ;;  %v2790_v41 = vmul.f32 %v5436_v36, %v2541_v22  ;;  %v2703_v42 = vrot.slane %v2697_v46, 2 }
 0x1a4   : > { %v2704_v27 = vrot.slane %v2698_v53, 2  ;;  %v2798_v15 = vmul.f32 %v5364_v21, %v2540_v0  ;;  %v2799_v12 = vmul.f32 %v5364_v21, %v2541_v22  ;;  %v2685_v52 = vsel %vm899_vm4, %v2683_v33, %v2684_v2  ;;  %v5941_v21 = vld [vmem:[%s6887_s3 + $0x1] ss:$0 sm:$0xff]  ;;  %v5962_v33 = vld [vmem:[#allocation2 + $0x128] sm:$0xff] }
 0x1a5   : > { %v6971_v35 = vrot.slane %v5821_v63, 1  ;;  %v2818_v32 = vmul.f32 %v5373_v58, %v2540_v0  ;;  %v2819_v1 = vmul.f32 %v5373_v58, %v2541_v22  ;;  %v2690_v8 = vadd.f32 %v2685_v52, %v2670_v5  ;;  %v2956_v0 = vld [vmem:[#allocation2 + $0x130] sm:$0x3]  ;;  %v5950_v58 = vld [vmem:[%s6887_s3 + $0x2] ss:$0 sm:$0xff] }
 0x1a6   : > { %v2804_v61 = vrot.slane %v2798_v15, 1  ;;  %v2805_v10 = vrot.slane %v2799_v12, 1  ;;  %v2732_v63 = vmul.f32 %v5587_v26, %v2715_v47  ;;  %v5945_v54 = vmul.f32 %v5598_v17, %v2715_v47  ;;  %v5960_v53 = vld [vmem:[#allocation2 + $0x120] sm:$0xff] }
 0x1a7   : > { %v2687_v39 = vsel %vm899_vm4, %v2684_v2, %v6971_v35  ;;  %v2824_v38 = vrot.slane %v2818_v32, 2  ;;  %v2825_v62 = vrot.slane %v2819_v1, 2  ;;  %v5958_v46 = vmul.f32 %v5466_v57, %v2835_v50 }
 0x1a8   : > { %v2691_v36 = vadd.f32 %v2687_v39, %v2671_v24  ;;  %v2806_v22 = vsel %vm899_vm4, %v2804_v61, %v2805_v10  ;;  %v2808_v5 = vsel %vm899_vm4, %v2805_v10, %v2807_v16  ;;  %v2852_v24 = vmul.f32 %v5457_v49, %v2835_v50 }
 0x1a9   : > { %v2811_v2 = vadd.f32 %v2806_v22, %v2789_v48  ;;  %v2812_v15 = vadd.f32 %v2808_v5, %v2790_v41  ;;  %v2739_v12 = vrot.slane %v2732_v63, 1  ;;  %v2879_v35 = vrot.slane %v5958_v46, 2 }
 0x1aa   : > { %v2859_v52 = vrot.slane %v2852_v24, 1  ;;  %v2973_v13 = vmul.f32 %v5941_v21, %v2956_v0  ;;  %v5968_v16 = vmul.f32 %v5950_v58, %v2956_v0  ;;  %v2705_v39 = vsel %vm920_vm5, %v2703_v42, %v2704_v27 }
 0x1ab   : > { %v6972_v32 = vrot.slane %v5824_v11, 2  ;;  %v2721_v48 = vmul.f32 %v5646_v25, %v5960_v53  ;;  %v2722_v41 = vmul.f32 %v5646_v25, %v5962_v33  ;;  %v2710_v10 = vadd.f32 %v2705_v39, %v2690_v8 }
 0x1ac   : > { %v2980_v50 = vrot.slane %v2973_v13, 1  ;;  %v3000_v61 = vrot.slane %v5968_v16, 2  ;;  %v2730_v0 = vmul.f32 %v5587_v26, %v5960_v53  ;;  %v2731_v42 = vmul.f32 %v5587_v26, %v5962_v33 }
 0x1ad   : > { %v2707_v1 = vsel %vm920_vm5, %v2704_v27, %v6972_v32  ;;  %v5985_v11 = vmul.f32 %v5598_v17, %v5960_v53  ;;  %v5989_v27 = vmul.f32 %v5598_v17, %v5962_v33  ;;  %v2723_v22 = vadd.f32 %v2721_v48, %v2710_v10  ;;  %v6058_v32 = vld [vmem:[#allocation2 + $0x140] sm:$0xff] }
 0x1ae   : > { %v2711_v63 = vadd.f32 %v2707_v1, %v2691_v36  ;;  %v2826_v24 = vsel %vm920_vm5, %v2824_v38, %v2825_v62  ;;  %v2828_v8 = vsel %vm920_vm5, %v2825_v62, %v2827_v14  ;;  %v2736_v36 = vrot.slane %v2730_v0, 1 }
 0x1af   : > { %v2737_v13 = vrot.slane %v2731_v42, 1  ;;  %v2831_v1 = vadd.f32 %v2826_v24, %v2811_v2  ;;  %v2832_v47 = vadd.f32 %v2828_v8, %v2812_v15  ;;  %v2841_v55 = vmul.f32 %v5516_v44, %v5960_v53  ;;  %v6010_v2 = vld [vmem:[%s6887_s3] ss:$0 sm:$0xff] }
 0x1b0   : > { %v2724_v5 = vadd.f32 %v2722_v41, %v2711_v63  ;;  %v2842_v48 = vmul.f32 %v5516_v44, %v5962_v33  ;;  %v2850_v14 = vmul.f32 %v5457_v49, %v5960_v53  ;;  %v2851_v62 = vmul.f32 %v5457_v49, %v5962_v33 }
 0x1b1   : > { %v2738_v38 = vsel %vm899_vm4, %v2736_v36, %v2737_v13  ;;  %v2740_v18 = vsel %vm899_vm4, %v2737_v13, %v2739_v12  ;;  %v2843_v44 = vadd.f32 %v2841_v55, %v2831_v1  ;;  %v2870_v12 = vmul.f32 %v5466_v57, %v5960_v53  ;;  %v3008_v1 = vld [vmem:[#allocation2 + $0x148] sm:$0x3] }
 0x1b2   : > { %v6012_v15 = vadd.f32 %v2738_v38, %v2723_v22  ;;  %v6014_v41 = vadd.f32 %v2740_v18, %v2724_v5  ;;  %v2844_v10 = vadd.f32 %v2842_v48, %v2832_v47  ;;  %v2856_v63 = vrot.slane %v2850_v14, 1  ;;  %v2888_v47 = vld [vmem:[#allocation2 + $0x148] sm:$0x3]  ;;  %v6031_v5 = vld [vmem:[%s6887_s3 + $0x4] ss:$0 sm:$0xff] }
 0x1b3   : > { %v2857_v0 = vrot.slane %v2851_v62, 1  ;;  %v2871_v42 = vmul.f32 %v5466_v57, %v5962_v33  ;;  %v2962_v49 = vmul.f32 %v6010_v2, %v5960_v53  ;;  %v2963_v24 = vmul.f32 %v6010_v2, %v5962_v33  ;;  %v6038_v48 = vld [vmem:[%s6887_s3 + $0x5] ss:$0 sm:$0xff] }
 0x1b4   : > { %v2971_v22 = vmul.f32 %v5941_v21, %v5960_v53  ;;  %v2972_v55 = vmul.f32 %v5941_v21, %v5962_v33  ;;  %v2876_v36 = vrot.slane %v2870_v12, 2  ;;  %v2991_v39 = vmul.f32 %v5950_v58, %v5960_v53 }
 0x1b5   : > { %v2858_v57 = vsel %vm899_vm4, %v2856_v63, %v2857_v0  ;;  %v2860_v8 = vsel %vm899_vm4, %v2857_v0, %v2859_v52  ;;  %v2877_v13 = vrot.slane %v2871_v42, 2  ;;  %v2992_v63 = vmul.f32 %v5950_v58, %v5962_v33 }
 0x1b6   : > { %v2863_v38 = vadd.f32 %v2858_v57, %v2843_v44  ;;  %v2864_v18 = vadd.f32 %v2860_v8, %v2844_v10  ;;  %v2977_v14 = vrot.slane %v2971_v22, 1  ;;  %v2978_v62 = vrot.slane %v2972_v55, 1  ;;  %v3129_v22 = vld [vmem:[#allocation2 + $0x148] sm:$0x3]  ;;  %v6056_v8 = vld [vmem:[#allocation2 + $0x138] sm:$0xff] }
 0x1b7   : > { %v2905_v52 = vmul.f32 %v5587_v26, %v2888_v47  ;;  %v6046_v0 = vmul.f32 %v5598_v17, %v2888_v47  ;;  %v6051_v44 = vmul.f32 %v6031_v5, %v3008_v1  ;;  %v6054_v10 = vmul.f32 %v6038_v48, %v3008_v1 }
 0x1b8   : > { %v2979_v12 = vsel %vm899_vm4, %v2977_v14, %v2978_v62  ;;  %v2981_v42 = vsel %vm899_vm4, %v2978_v62, %v2980_v50  ;;  %v2997_v57 = vrot.slane %v2991_v39, 2  ;;  %v2998_v33 = vrot.slane %v2992_v63, 2 }
 0x1b9   : > { %6973 = vst [vmem:[#allocation31_spill] sm:$0xff] %v6046_v0  ;;  %v2984_v53 = vadd.f32 %v2979_v12, %v2962_v49  ;;  %v2985_v55 = vadd.f32 %v2981_v42, %v2963_v24  ;;  %v2912_v47 = vrot.slane %v2905_v52, 1  ;;  %v3032_v50 = vrot.slane %v6051_v44, 1 }
 0x1ba   : > { %v6064_v9 = vmul.f32 %v5941_v21, %v3129_v22  ;;  %v6067_v1 = vmul.f32 %v5950_v58, %v3129_v22  ;;  %v1045_v39 = vmax.f32 %v5887_v23, 0.0  ;;  %v2878_v49 = vsel %vm920_vm5, %v2876_v36, %v2877_v13 }
 0x1bb   : > { %v2880_v24 = vsel %vm920_vm5, %v2877_v13, %v2879_v35  ;;  %v2883_v63 = vadd.f32 %v2878_v49, %v2863_v38  ;;  %v2894_v52 = vmul.f32 %v5646_v25, %v6056_v8  ;;  %v2895_v12 = vmul.f32 %v5646_v25, %v6058_v32  ;;  %v6091_v25 = vld [vmem:[%s6887_s3 + $0x3] ss:$0 sm:$0xff] }
 0x1bc   : > { %v3153_v42 = vrot.slane %v6064_v9, 1  ;;  %v1047_v22 = vmin.f32 %v1045_v39, 6.0  ;;  %v2884_v14 = vadd.f32 %v2880_v24, %v2864_v18  ;;  %v2903_v36 = vmul.f32 %v5587_v26, %v6056_v8 }
 0x1bd   : > { %v2896_v23 = vadd.f32 %v2894_v52, %v2883_v63  ;;  %v2904_v46 = vmul.f32 %v5587_v26, %v6058_v32  ;;  %v6086_v35 = vmul.f32 %v5598_v17, %v6056_v8  ;;  %v6096_v13 = vmul.f32 %v5598_v17, %v6058_v32 }
 0x1be   : > { %1049 = vst.msk [vmem:[#allocation3] sm:$0xff] %vm822_vm2, %v1047_v22  ;;  %v2897_v9 = vadd.f32 %v2895_v12, %v2884_v14  ;;  %v2999_v38 = vsel %vm920_vm5, %v2997_v57, %v2998_v33  ;;  %v3001_v26 = vsel %vm920_vm5, %v2998_v33, %v3000_v61  ;;  %v2909_v18 = vrot.slane %v2903_v36, 1 }
 0x1bf   : > { %6974 = vst [vmem:[#allocation32_spill] sm:$0xff] %v6086_v35  ;;  %v2910_v39 = vrot.slane %v2904_v46, 1  ;;  %v3004_v24 = vadd.f32 %v2999_v38, %v2984_v53  ;;  %v3005_v52 = vadd.f32 %v3001_v26, %v2985_v55  ;;  %v3014_v14 = vmul.f32 %v6091_v25, %v6056_v8 }
 0x1c0   : > { %v3015_v17 = vmul.f32 %v6091_v25, %v6058_v32  ;;  %v3023_v61 = vmul.f32 %v6031_v5, %v6056_v8  ;;  %v3024_v33 = vmul.f32 %v6031_v5, %v6058_v32  ;;  %v3043_v38 = vmul.f32 %v6038_v48, %v6056_v8 }
 0x1c1   : > { %v2911_v57 = vsel %vm899_vm4, %v2909_v18, %v2910_v39  ;;  %v2913_v16 = vsel %vm899_vm4, %v2910_v39, %v2912_v47  ;;  %v3016_v55 = vadd.f32 %v3014_v14, %v3004_v24  ;;  %v3044_v47 = vmul.f32 %v6038_v48, %v6058_v32  ;;  %v3061_v39 = vld [vmem:[#allocation2 + $0x160] sm:$0x3]  ;;  %v6133_v24 = vld [vmem:[%s6887_s3 + $0x7] ss:$0 sm:$0xff] }
 0x1c2   : > { %v6114_v53 = vadd.f32 %v2911_v57, %v2896_v23  ;;  %v6116_v12 = vadd.f32 %v2913_v16, %v2897_v9  ;;  %v3017_v22 = vadd.f32 %v3015_v17, %v3005_v52  ;;  %v3029_v36 = vrot.slane %v3023_v61, 1  ;;  %v6138_v52 = vld [vmem:[%s6887_s3 + $0x8] ss:$0 sm:$0xff] }
 0x1c3   : > { %v3030_v46 = vrot.slane %v3024_v33, 1  ;;  %v3135_v26 = vmul.f32 %v6010_v2, %v6056_v8  ;;  %v3136_v18 = vmul.f32 %v6010_v2, %v6058_v32  ;;  %v3144_v23 = vmul.f32 %v5941_v21, %v6056_v8  ;;  %v3181_v33 = vld [vmem:[#allocation2 + $0x160] sm:$0x3] }
 0x1c4   : > { %6975 = vst [vmem:[#allocation33_spill] sm:$0xff] %v6114_v53  ;;  %6976 = vst [vmem:[#allocation34_spill] sm:$0xff] %v6116_v12  ;;  %v3145_v9 = vmul.f32 %v5941_v21, %v6058_v32  ;;  %v3049_v16 = vrot.slane %v3043_v38, 2  ;;  %v3050_v61 = vrot.slane %v3044_v47, 2  ;;  %v3164_v62 = vmul.f32 %v5950_v58, %v6056_v8 }
 0x1c5   : > { %v3646_v14 = vld [vmem:[#allocation3] sm:$0xff]  ;;  %v3031_v17 = vsel %vm899_vm4, %v3029_v36, %v3030_v46  ;;  %v3033_v57 = vsel %vm899_vm4, %v3030_v46, %v3032_v50  ;;  %v3150_v3 = vrot.slane %v3144_v23, 1  ;;  %v3165_v12 = vmul.f32 %v5950_v58, %v6058_v32 }
 0x1c6   : > { %4587 = vmatprep.mubr.msk.f32.mxu1 %vm822_vm2, %v3646_v14  ;;  %v3036_v49 = vadd.f32 %v3031_v17, %v3016_v55  ;;  %v3037_v63 = vadd.f32 %v3033_v57, %v3017_v22  ;;  %v3151_v44 = vrot.slane %v3145_v9, 1  ;;  %v1046_v0 = vmax.f32 %v5890_v34, 0.0  ;;  %v3302_v22 = vld [vmem:[#allocation2 + $0x160] sm:$0x3]  ;;  %v6157_v32 = vld [vmem:[#allocation2 + $0x150] sm:$0xff]  ;;  %v6159_v34 = vld [vmem:[#allocation2 + $0x158] sm:$0xff] }
 0x1c7   : > { %v3078_v36 = vmul.f32 %v6133_v24, %v3061_v39  ;;  %v6152_v38 = vmul.f32 %v6138_v52, %v3061_v39  ;;  %v6155_v55 = vmul.f32 %v6031_v5, %v3181_v33  ;;  %v3170_v23 = vrot.slane %v3164_v62, 2 }
 0x1c8   : > { %v3152_v50 = vsel %vm899_vm4, %v3150_v3, %v3151_v44  ;;  %v3154_v46 = vsel %vm899_vm4, %v3151_v44, %v3153_v42  ;;  %v3171_v9 = vrot.slane %v3165_v12, 2  ;;  %v6164_v3 = vld [vmem:[%s6887_s3 + $0x6] ss:$0 sm:$0xff]  ;;  %v1048_v42 = vmin.f32 %v1046_v0, 6.0 }
 0x1c9   : > { %6977 = vst [vmem:[#allocation35_spill] sm:$0xff] %v6152_v38  ;;  %v3157_v47 = vadd.f32 %v3152_v50, %v3135_v26  ;;  %v3158_v8 = vadd.f32 %v3154_v46, %v3136_v18  ;;  %v3085_v44 = vrot.slane %v3078_v36, 1  ;;  %v3205_v14 = vrot.slane %v6155_v55, 1 }
 0x1ca   : > { %v6169_v26 = vmul.f32 %v6038_v48, %v3181_v33  ;;  %v6172_v62 = vmul.f32 %v5941_v21, %v3302_v22  ;;  %v6175_v12 = vmul.f32 %v5950_v58, %v3302_v22  ;;  %v1217_v18 = vmax.f32 %v5893_v60, 0.0  ;;  %1050 = vst.msk [vmem:[#allocation3 + $0x8] sm:$0xff] %vm822_vm2, %v1048_v42 }
 0x1cb   : > { %v3051_v0 = vsel %vm920_vm5, %v3049_v16, %v3050_v61  ;;  %v6978_v17 = vrot.slane %v6054_v10, 2  ;;  %v3067_v33 = vmul.f32 %v6164_v3, %v6157_v32  ;;  %v3068_v36 = vmul.f32 %v6164_v3, %v6159_v34 }
 0x1cc   : > { %v3326_v46 = vrot.slane %v6172_v62, 1  ;;  %v1219_v55 = vmin.f32 %v1217_v18, 6.0  ;;  %v3056_v22 = vadd.f32 %v3051_v0, %v3036_v49  ;;  %v3076_v10 = vmul.f32 %v6133_v24, %v6157_v32 }
 0x1cd   : > { %v3053_v57 = vsel %vm920_vm5, %v3050_v61, %v6978_v17  ;;  %v3077_v16 = vmul.f32 %v6133_v24, %v6159_v34  ;;  %v6197_v61 = vmul.f32 %v6138_v52, %v6157_v32  ;;  %v6201_v62 = vmul.f32 %v6138_v52, %v6159_v34 }
 0x1ce   : > { %v3057_v42 = vadd.f32 %v3053_v57, %v3037_v63  ;;  %1222 = vst.msk [vmem:[#allocation3 + $0x10] sm:$0xff] %vm822_vm2, %v1219_v55  ;;  %v3172_v18 = vsel %vm920_vm5, %v3170_v23, %v3171_v9  ;;  %v6979_v49 = vrot.slane %v6067_v1, 2  ;;  %v3069_v0 = vadd.f32 %v3067_v33, %v3056_v22 }
 0x1cf   : > { %v3082_v57 = vrot.slane %v3076_v10, 1  ;;  %v3083_v39 = vrot.slane %v3077_v16, 1  ;;  %v3177_v50 = vadd.f32 %v3172_v18, %v3157_v47  ;;  %v3187_v23 = vmul.f32 %v6091_v25, %v6157_v32  ;;  %v684_v18 = vpop.f32.mrf.mxu0 }
 0x1d0   : > { %v3174_v63 = vsel %vm920_vm5, %v3171_v9, %v6979_v49  ;;  %v3070_v17 = vadd.f32 %v3068_v36, %v3057_v42  ;;  %v3188_v1 = vmul.f32 %v6091_v25, %v6159_v34  ;;  %v3196_v22 = vmul.f32 %v6031_v5, %v6157_v32 }
 0x1d1   : > { %v3178_v38 = vadd.f32 %v3174_v63, %v3158_v8  ;;  %v3084_v53 = vsel %vm899_vm4, %v3082_v57, %v3083_v39  ;;  %v3086_v35 = vsel %vm899_vm4, %v3083_v39, %v3085_v44  ;;  %v3647_v9 = vld [vmem:[#allocation3 + $0x8] sm:$0xff]  ;;  %v3197_v47 = vmul.f32 %v6031_v5, %v6159_v34 }
 0x1d2   : > { %v6215_v33 = vadd.f32 %v3084_v53, %v3069_v0  ;;  %v6217_v36 = vadd.f32 %v3086_v35, %v3070_v17  ;;  %4588 = vmatmul.mubr.msk.f32.vlgmr.msra.gmra.mxu1 %vm822_vm2, %v3647_v9  ;;  %v3189_v8 = vadd.f32 %v3187_v23, %v3177_v50  ;;  %v3216_v39 = vmul.f32 %v6038_v48, %v6157_v32 }
 0x1d3   : > { %v3190_v44 = vadd.f32 %v3188_v1, %v3178_v38  ;;  %v3217_v42 = vmul.f32 %v6038_v48, %v6159_v34  ;;  %v3202_v53 = vrot.slane %v3196_v22, 1  ;;  %v3203_v10 = vrot.slane %v3197_v47, 1 }
 0x1d4   : > { %6980 = vst [vmem:[#allocation36_spill] sm:$0xff] %v6217_v36  ;;  %v3308_v35 = vmul.f32 %v6010_v2, %v6157_v32  ;;  %v3309_v16 = vmul.f32 %v6010_v2, %v6159_v34  ;;  %v3222_v63 = vrot.slane %v3216_v39, 2  ;;  %v3317_v38 = vmul.f32 %v5941_v21, %v6157_v32 }
 0x1d5   : > { %v3648_v49 = vld [vmem:[#allocation3 + $0x10] sm:$0xff]  ;;  %v3223_v0 = vrot.slane %v3217_v42, 2  ;;  %v3318_v50 = vmul.f32 %v5941_v21, %v6159_v34  ;;  %v3204_v17 = vsel %vm899_vm4, %v3202_v53, %v3203_v10  ;;  %v3206_v57 = vsel %vm899_vm4, %v3203_v10, %v3205_v14  ;;  %v4571_v53 = vpop.f32.mrf.mxu0 }
 0x1d6   : > { %4590 = vmatprep.mubr.msk.f32.mxu1 %vm822_vm2, %v3648_v49  ;;  %v3337_v23 = vmul.f32 %v5950_v58, %v6157_v32  ;;  %v3338_v1 = vmul.f32 %v5950_v58, %v6159_v34  ;;  %v3209_v9 = vadd.f32 %v3204_v17, %v3189_v8  ;;  %v3210_v22 = vadd.f32 %v3206_v57, %v3190_v44  ;;  %v6256_v44 = vld [vmem:[%s6886_s2] ss:$0 sm:$0xff] }
 0x1d7   : > { %v3323_v47 = vrot.slane %v3317_v38, 1  ;;  %v3324_v39 = vrot.slane %v3318_v50, 1  ;;  %v1218_v60 = vmax.f32 %v5896_v7, 0.0  ;;  %v6981_v49 = vmax.f32 %v5884_v37, 0.0 }
 0x1d8   : > { %v3343_v42 = vrot.slane %v3337_v23, 2  ;;  %v3344_v55 = vrot.slane %v3338_v1, 2  ;;  %v6982_v32 = vrot.slane %v5252_v19, 2  ;;  %v6983_v34 = vrot.slane %v5248_v43, 2 }
 0x1d9   : > { %v780_v36 = vmin.f32 %v6981_v49, 6.0  ;;  %v3325_v14 = vsel %vm899_vm4, %v3323_v47, %v3324_v39  ;;  %v3327_v10 = vsel %vm899_vm4, %v3324_v39, %v3326_v46  ;;  %v685_v7 = vadd.f32 %v6256_v44, %v684_v18 }
 0x1da   : > { %v1374_v8 = vsel %vm920_vm5, %v6983_v34, %v6982_v32  ;;  %v3330_v37 = vadd.f32 %v3325_v14, %v3308_v35  ;;  %v3331_v38 = vadd.f32 %v3327_v10, %v3309_v16  ;;  %v1220_v50 = vmin.f32 %v1218_v60, 6.0  ;;  %v694_v16 = vpop.f32.mrf.mxu0 }
 0x1db   : > { %854 = vst.msk [vmem:[#allocation2 + $0x171] sm:$0xff] %vm822_vm2, %v780_v36  ;;  %v1379_v46 = vadd.f32 %v1374_v8, %v5270_v59  ;;  %v743_v17 = vmax.f32 %v685_v7, 0.0  ;;  %v3224_v57 = vsel %vm920_vm5, %v3222_v63, %v3223_v0  ;;  %v6984_v43 = vrot.slane %v6169_v26, 2 }
 0x1dc   : > { %v3345_v1 = vsel %vm920_vm5, %v3343_v42, %v3344_v55  ;;  %1223 = vst.msk [vmem:[#allocation3 + $0x18] sm:$0xff] %vm822_vm2, %v1220_v50  ;;  %v6268_v35 = vadd.f32 %v3224_v57, %v3209_v9  ;;  %v6985_v36 = vrot.slane %v6175_v12, 2  ;;  %v6987_v39 = vmov %v6982_v32  ;;  %v6989_v12 = vld [vmem:[#allocation5_spill] sm:$0xff]  ;;  %v6991_v32 = vld [vmem:[#allocation6_spill] sm:$0xff] }
 0x1dd   : > { %v3226_v23 = vsel %vm920_vm5, %v3223_v0, %v6984_v43  ;;  %v1388_v18 = vadd.f32 %v5865_v4, %v1379_v46  ;;  %v779_v63 = vmin.f32 %v743_v17, 6.0  ;;  %v6275_v47 = vadd.f32 %v3345_v1, %v3330_v37  ;;  %v6995_v37 = vld [vmem:[#allocation10_spill] sm:$0xff]  ;;  %v6997_v50 = vld [vmem:[#allocation9_spill] sm:$0xff] }
 0x1de   : > { %v6270_v60 = vadd.f32 %v3226_v23, %v3210_v22  ;;  %v3347_v59 = vsel %vm920_vm5, %v3344_v55, %v6985_v36  ;;  %v6986_v0 = vrot.slane %v5204_v20, 2  ;;  %v6988_v49 = vrot.slane %v5333_v56, 2  ;;  %v6992_v20 = vld [vmem:[#allocation4_spill] sm:$0xff]  ;;  %v6999_v23 = vld [vmem:[#allocation7_spill] sm:$0xff] }
 0x1df   : > { %v6277_v26 = vadd.f32 %v3347_v59, %v3331_v38  ;;  %v1390_v9 = vmax.f32 %v1388_v18, 0.0  ;;  %v6990_v14 = vrot.slane %v6989_v12, 2  ;;  %v700_v10 = vadd.f32 %v6256_v44, %v4571_v53  ;;  %853 = vst.msk [vmem:[#allocation2 + $0x169] sm:$0xff] %vm822_vm2, %v779_v63  ;;  %v4574_v18 = vpop.f32.mrf.mxu0 }
 0x1e0   : > { %v1376_v42 = vsel %vm920_vm5, %v6987_v39, %v6986_v0  ;;  %v6993_v8 = vrot.slane %v6992_v20, 2  ;;  %v6994_v19 = vmov %v6988_v49  ;;  %v6996_v38 = vrot.slane %v6995_v37, 2 }
 0x1e1   : > { %v1380_v22 = vadd.f32 %v1376_v42, %v5272_v51  ;;  %v1547_v55 = vsel %vm920_vm5, %v6990_v14, %v6988_v49  ;;  %v6299_v51 = vadd.f32 %v6256_v44, %v694_v16  ;;  %v6998_v46 = vrot.slane %v6997_v50, 2  ;;  %v7000_v16 = vld [vmem:[#allocation11_spill] sm:$0xff]  ;;  %v7001_v42 = vld [vmem:[#allocation8_spill] sm:$0xff] }
 0x1e2   : > { %v1552_v34 = vadd.f32 %v1547_v55, %v6991_v32  ;;  %v1549_v7 = vsel %vm920_vm5, %v6994_v19, %v6993_v8  ;;  %v1392_v53 = vmin.f32 %v1390_v9, 6.0  ;;  %v746_v43 = vmax.f32 %v700_v10, 0.0  ;;  %v3234_v36 = vld [vmem:[#allocation2 + $0x178] sm:$0x3] }
 0x1e3   : > { %v1720_v17 = vsel %vm920_vm5, %v6998_v46, %v6996_v38  ;;  %v1389_v57 = vadd.f32 %v5865_v4, %v1380_v22  ;;  %v1553_v1 = vadd.f32 %v1549_v7, %v6999_v23  ;;  %v3354_v56 = vld [vmem:[#allocation2 + $0x178] sm:$0x3]  ;;  %v6311_v39 = vadd.f32 %v6256_v44, %v4574_v18  ;;  %v3649_v32 = vld [vmem:[#allocation3 + $0x18] sm:$0xff] }
 0x1e4   : > { %v3475_v59 = vld [vmem:[#allocation2 + $0x178] sm:$0x3]  ;;  %v1561_v63 = vadd.f32 %v5865_v4, %v1552_v34  ;;  %v1725_v0 = vadd.f32 %v1720_v17, %v7000_v16  ;;  %v7002_v49 = vrot.slane %v7001_v42, 2  ;;  %v7003_v9 = vmov %v6996_v38  ;;  %1395 = vst.msk [vmem:[#allocation3 + $0x20] sm:$0xff] %vm822_vm2, %v1392_v53  ;;  %4591 = vmatmul.mubr.msk.f32.gmra.mxu1 %vm822_vm2, %v3649_v32 }
 0x1e5   : > { %v3251_v12 = vmul.f32 %v6133_v24, %v3234_v36  ;;  %v6322_v14 = vmul.f32 %v6138_v52, %v3234_v36  ;;  %v6325_v55 = vmul.f32 %v6031_v5, %v3354_v56  ;;  %v6328_v10 = vmul.f32 %v6038_v48, %v3354_v56 }
 0x1e6   : > { %v6318_v22 = vsel %vm920_vm5, %v7003_v9, %v7002_v49  ;;  %v6332_v34 = vmul.f32 %v5941_v21, %v3475_v59  ;;  %v6335_v20 = vmul.f32 %v5950_v58, %v3475_v59  ;;  %v1391_v8 = vmax.f32 %v1389_v57, 0.0  ;;  %v3232_v18 = vld [vmem:[#allocation2 + $0x168] sm:$0xff]  ;;  %v3233_v36 = vld [vmem:[#allocation2 + $0x170] sm:$0xff] }
 0x1e7   : > { %v1563_v19 = vmax.f32 %v1561_v63, 0.0  ;;  %v3258_v7 = vrot.slane %v3251_v12, 1  ;;  %v3378_v38 = vrot.slane %v6325_v55, 1  ;;  %v782_v56 = vmin.f32 %v746_v43, 6.0 }
 0x1e8   : > { %v1393_v53 = vmin.f32 %v1391_v8, 6.0  ;;  %v6344_v57 = vadd.f32 %v5865_v4, %v1553_v1  ;;  %v6348_v63 = vadd.f32 %v5865_v4, %v1725_v0  ;;  %v3240_v16 = vmul.f32 %v6164_v3, %v3232_v18 }
 0x1e9   : > { %v1565_v23 = vmin.f32 %v1563_v19, 6.0  ;;  %v3241_v42 = vmul.f32 %v6164_v3, %v3233_v36  ;;  %v3249_v49 = vmul.f32 %v6133_v24, %v3232_v18  ;;  %v3250_v9 = vmul.f32 %v6133_v24, %v3233_v36  ;;  %856 = vst.msk [vmem:[#allocation2 + $0x189] sm:$0xff] %vm822_vm2, %v782_v56 }
 0x1ea   : > { %1396 = vst.msk [vmem:[#allocation3 + $0x28] sm:$0xff] %vm822_vm2, %v1393_v53  ;;  %v6357_v43 = vmul.f32 %v6138_v52, %v3232_v18  ;;  %v6360_v1 = vmul.f32 %v6138_v52, %v3233_v36  ;;  %v3360_v0 = vmul.f32 %v6091_v25, %v3232_v18  ;;  %v3361_v12 = vmul.f32 %v6091_v25, %v3233_v36 }
 0x1eb   : > { %1568 = vst.msk [vmem:[#allocation3 + $0x30] sm:$0xff] %vm822_vm2, %v1565_v23  ;;  %v3650_v55 = vld [vmem:[#allocation3 + $0x20] sm:$0xff]  ;;  %v3242_v32 = vadd.f32 %v3240_v16, %v6268_v35  ;;  %v3243_v8 = vadd.f32 %v3241_v42, %v6270_v60  ;;  %v3255_v19 = vrot.slane %v3249_v49, 1  ;;  %v3256_v53 = vrot.slane %v3250_v9, 1 }
 0x1ec   : > { %4593 = vmatprep.mubr.msk.f32.mxu1 %vm822_vm2, %v3650_v55  ;;  %v3362_v17 = vadd.f32 %v3360_v0, %v6275_v47  ;;  %v3363_v50 = vadd.f32 %v3361_v12, %v6277_v26  ;;  %v3369_v35 = vmul.f32 %v6031_v5, %v3232_v18  ;;  %v3370_v60 = vmul.f32 %v6031_v5, %v3233_v36 }
 0x1ed   : > { %v3257_v59 = vsel %vm899_vm4, %v3255_v19, %v3256_v53  ;;  %v3259_v56 = vsel %vm899_vm4, %v3256_v53, %v3258_v7  ;;  %v3389_v49 = vmul.f32 %v6038_v48, %v3232_v18  ;;  %v3390_v9 = vmul.f32 %v6038_v48, %v3233_v36 }
 0x1ee   : > { %v6376_v16 = vadd.f32 %v3257_v59, %v3242_v32  ;;  %v6378_v42 = vadd.f32 %v3259_v56, %v3243_v8  ;;  %v3375_v55 = vrot.slane %v3369_v35, 1  ;;  %v3376_v47 = vrot.slane %v3370_v60, 1 }
 0x1ef   : > { %v3481_v26 = vmul.f32 %v6010_v2, %v3232_v18  ;;  %v3482_v0 = vmul.f32 %v6010_v2, %v3233_v36  ;;  %v3395_v12 = vrot.slane %v3389_v49, 2  ;;  %v3396_v7 = vrot.slane %v3390_v9, 2 }
 0x1f0   : > { %7004 = vst [vmem:[#allocation5_spill] sm:$0xff] %v6378_v42  ;;  %v3490_v19 = vmul.f32 %v5941_v21, %v3232_v18  ;;  %v3491_v53 = vmul.f32 %v5941_v21, %v3233_v36  ;;  %v3377_v8 = vsel %vm899_vm4, %v3375_v55, %v3376_v47  ;;  %v3379_v56 = vsel %vm899_vm4, %v3376_v47, %v3378_v38  ;;  %v3407_v60 = vld [vmem:[#allocation2 + $0x190] sm:$0x3] }
 0x1f1   : > { %v3651_v59 = vld [vmem:[#allocation3 + $0x28] sm:$0xff]  ;;  %v3510_v23 = vmul.f32 %v5950_v58, %v3232_v18  ;;  %v3511_v35 = vmul.f32 %v5950_v58, %v3233_v36  ;;  %v3527_v2 = vld [vmem:[#allocation2 + $0x190] sm:$0x3]  ;;  %v3382_v49 = vadd.f32 %v3377_v8, %v3362_v17  ;;  %v3383_v9 = vadd.f32 %v3379_v56, %v3363_v50 }
 0x1f2   : > { %v3652_v32 = vld [vmem:[#allocation3 + $0x30] sm:$0xff]  ;;  %4594 = vmatmul.mubr.msk.f32.gmra.mxu1 %vm822_vm2, %v3651_v59  ;;  %v3496_v37 = vrot.slane %v3490_v19, 1  ;;  %v3497_v46 = vrot.slane %v3491_v53, 1  ;;  %v6393_v55 = vmul.f32 %v6133_v24, %v3407_v60  ;;  %v6396_v38 = vmul.f32 %v6138_v52, %v3407_v60 }
 0x1f3   : > { %4596 = vmatprep.mubr.msk.f32.mxu1 %vm822_vm2, %v3652_v32  ;;  %v3516_v21 = vrot.slane %v3510_v23, 2  ;;  %v3517_v42 = vrot.slane %v3511_v35, 2  ;;  %v7005_v18 = vrot.slane %v6332_v34, 1  ;;  %v6403_v50 = vmul.f32 %v6031_v5, %v3527_v2 }
 0x1f4   : > { %v3498_v58 = vsel %vm899_vm4, %v3496_v37, %v3497_v46  ;;  %v6406_v17 = vmul.f32 %v6038_v48, %v3527_v2  ;;  %v3431_v19 = vrot.slane %v6393_v55, 1  ;;  %v1564_v34 = vmax.f32 %v6344_v57, 0.0  ;;  %v704_v2 = vpop.f32.mrf.mxu0 }
 0x1f5   : > { %v3500_v36 = vsel %vm899_vm4, %v3497_v46, %v7005_v18  ;;  %v3503_v23 = vadd.f32 %v3498_v58, %v3481_v26  ;;  %v3551_v59 = vrot.slane %v6403_v50, 1  ;;  %v7006_v46 = vmax.f32 %v6299_v51, 0.0 }
 0x1f6   : > { %v3504_v47 = vadd.f32 %v3500_v36, %v3482_v0  ;;  %v3571_v37 = vrot.slane %v6406_v17, 2  ;;  %v3397_v8 = vsel %vm920_vm5, %v3395_v12, %v3396_v7  ;;  %v7007_v56 = vrot.slane %v6328_v10, 2 }
 0x1f7   : > { %v781_v32 = vmin.f32 %v7006_v46, 6.0  ;;  %v3518_v0 = vsel %vm920_vm5, %v3516_v21, %v3517_v42  ;;  %v7008_v35 = vrot.slane %v6335_v20, 2  ;;  %v1566_v58 = vmin.f32 %v1564_v34, 6.0  ;;  %v7009_v46 = vld [vmem:[#allocation12_spill] sm:$0xff]  ;;  %v7012_v34 = vld [vmem:[#allocation14_spill] sm:$0xff] }
 0x1f8   : > { %v3399_v26 = vsel %vm920_vm5, %v3396_v7, %v7007_v56  ;;  %v3402_v57 = vadd.f32 %v3397_v8, %v3382_v49  ;;  %v3523_v51 = vadd.f32 %v3518_v0, %v3503_v23  ;;  %v1736_v12 = vmax.f32 %v6348_v63, 0.0  ;;  %v7019_v8 = vld [vmem:[#allocation19_spill] sm:$0xff] }
 0x1f9   : > { %v3520_v60 = vsel %vm920_vm5, %v3517_v42, %v7008_v35  ;;  %855 = vst.msk [vmem:[#allocation2 + $0x181] sm:$0xff] %vm822_vm2, %v781_v32  ;;  %v3403_v18 = vadd.f32 %v3399_v26, %v3383_v9  ;;  %v748_v10 = vmax.f32 %v6311_v39, 0.0  ;;  %v1726_v7 = vadd.f32 %v6318_v22, %v7009_v46  ;;  %1569 = vst.msk [vmem:[#allocation3 + $0x38] sm:$0xff] %vm822_vm2, %v1566_v58  ;;  %v7010_v42 = vld [vmem:[#allocation15_spill] sm:$0xff]  ;;  %v7014_v9 = vld [vmem:[#allocation13_spill] sm:$0xff] }
 0x1fa   : > { %v3524_v36 = vadd.f32 %v3520_v60, %v3504_v47  ;;  %v705_v20 = vadd.f32 %v6256_v44, %v704_v2  ;;  %v7011_v21 = vrot.slane %v7010_v42, 2  ;;  %v7013_v56 = vrot.slane %v7012_v34, 2  ;;  %v7017_v39 = vld [vmem:[#allocation20_spill] sm:$0xff]  ;;  %v7022_v46 = vld [vmem:[#allocation17_spill] sm:$0xff]  ;;  %v7024_v42 = vld [vmem:[#allocation18_spill] sm:$0xff] }
 0x1fb   : > { %v7015_v23 = vrot.slane %v7014_v9, 2  ;;  %v7018_v32 = vrot.slane %v7017_v39, 2  ;;  %v7020_v22 = vrot.slane %v7019_v8, 2  ;;  %v1738_v0 = vmin.f32 %v1736_v12, 6.0  ;;  %v7021_v60 = vld [vmem:[#allocation16_spill] sm:$0xff]  ;;  %v7023_v34 = vld [vmem:[#allocation21_spill] sm:$0xff] }
 0x1fc   : > { %v1893_v49 = vsel %vm920_vm5, %v7013_v56, %v7011_v21  ;;  %v7016_v47 = vmov %v7011_v21  ;;  %v784_v44 = vmin.f32 %v748_v10, 6.0  ;;  %v1735_v35 = vadd.f32 %v5865_v4, %v1726_v7  ;;  %v7027_v7 = vld [vmem:[#allocation22_spill] sm:$0xff] }
 0x1fd   : > { %v1895_v63 = vsel %vm920_vm5, %v7016_v47, %v7015_v23  ;;  %v2066_v26 = vsel %vm920_vm5, %v7020_v22, %v7018_v32  ;;  %v1898_v2 = vadd.f32 %v1893_v49, %v7021_v60  ;;  %v747_v58 = vmax.f32 %v705_v20, 0.0  ;;  %1741 = vst.msk [vmem:[#allocation3 + $0x40] sm:$0xff] %vm822_vm2, %v1738_v0  ;;  %v7028_v20 = vld [vmem:[#allocation25_spill] sm:$0xff] }
 0x1fe   : > { %v1899_v21 = vadd.f32 %v1895_v63, %v7022_v46  ;;  %v2071_v56 = vadd.f32 %v2066_v26, %v7023_v34  ;;  %v7025_v9 = vrot.slane %v7024_v42, 2  ;;  %v7026_v23 = vmov %v7018_v32  ;;  %858 = vst.msk [vmem:[#allocation2 + $0x1a1] sm:$0xff] %vm822_vm2, %v784_v44  ;;  %v7030_v63 = vld [vmem:[#allocation24_spill] sm:$0xff]  ;;  %v7033_v44 = vld [vmem:[#allocation26_spill] sm:$0xff] }
 0x1ff   : > { %v1737_v12 = vmax.f32 %v1735_v35, 0.0  ;;  %v1907_v10 = vadd.f32 %v5865_v4, %v1898_v2  ;;  %v7029_v32 = vrot.slane %v7028_v20, 2  ;;  %v7031_v8 = vrot.slane %v7030_v63, 2 }
 0x200   : > { %v2068_v47 = vsel %vm920_vm5, %v7026_v23, %v7025_v9  ;;  %v7032_v26 = vmov 0.0   ;;  %v783_v39 = vmin.f32 %v747_v58, 6.0  ;;  %v6466_v60 = vadd.f32 %v5865_v4, %v1899_v21  ;;  %v3405_v2 = vld [vmem:[#allocation2 + $0x180] sm:$0xff]  ;;  %v3406_v46 = vld [vmem:[#allocation2 + $0x188] sm:$0xff] }
 0x201   : > { %v2072_v49 = vadd.f32 %v2068_v47, %v7027_v7  ;;  %v2239_v22 = vsel %vm920_vm5, %v7031_v8, %v7029_v32  ;;  %875 = vst.msk [vmem:[#allocation2 + $0x1a8] sm:$0x3] %vm865_vm3, %v7032_v26  ;;  %v6469_v0 = vadd.f32 %v5865_v4, %v2071_v56  ;;  %v1739_v34 = vmin.f32 %v1737_v12, 6.0  ;;  %v7034_v23 = vld [vmem:[#allocation23_spill] sm:$0xff] }
 0x202   : > { %v6472_v35 = vadd.f32 %v2239_v22, %v7033_v44  ;;  %v1909_v42 = vmax.f32 %v1907_v10, 0.0  ;;  %v7035_v47 = vrot.slane %v7034_v23, 2  ;;  %v7036_v58 = vmov %v7029_v32  ;;  %857 = vst.msk [vmem:[#allocation2 + $0x199] sm:$0xff] %vm822_vm2, %v783_v39  ;;  %v3653_v12 = vld [vmem:[#allocation3 + $0x38] sm:$0xff] }
 0x203   : > { %v6475_v9 = vadd.f32 %v5865_v4, %v2072_v49  ;;  %v3413_v56 = vmul.f32 %v6164_v3, %v3405_v2  ;;  %v3414_v7 = vmul.f32 %v6164_v3, %v3406_v46  ;;  %v3422_v32 = vmul.f32 %v6133_v24, %v3405_v2  ;;  %1742 = vst.msk [vmem:[#allocation3 + $0x48] sm:$0xff] %vm822_vm2, %v1739_v34 }
 0x204   : > { %v6482_v21 = vsel %vm920_vm5, %v7036_v58, %v7035_v47  ;;  %v3423_v63 = vmul.f32 %v6133_v24, %v3406_v46  ;;  %v6490_v4 = vmul.f32 %v6138_v52, %v3405_v2  ;;  %v6493_v10 = vmul.f32 %v6138_v52, %v3406_v46  ;;  %872 = vst.msk [vmem:[#allocation2 + $0x198] sm:$0xff] %vm822_vm2, %v7032_v26 }
 0x205   : > { %v3533_v49 = vmul.f32 %v6091_v25, %v3405_v2  ;;  %v3534_v20 = vmul.f32 %v6091_v25, %v3406_v46  ;;  %873 = vst.msk [vmem:[#allocation2 + $0x1a0] sm:$0xff] %vm822_vm2, %v7032_v26  ;;  %4597 = vmatmul.mubr.msk.f32.gmra.mxu1 %vm822_vm2, %v3653_v12  ;;  %v3415_v8 = vadd.f32 %v3413_v56, %v3402_v57  ;;  %v3428_v39 = vrot.slane %v3422_v32, 1  ;;  %v3654_v57 = vld [vmem:[#allocation3 + $0x40] sm:$0xff] }
 0x206   : > { %v3416_v22 = vadd.f32 %v3414_v7, %v3403_v18  ;;  %v3429_v44 = vrot.slane %v3423_v63, 1  ;;  %v3448_v23 = vrot.slane %v6490_v4, 2  ;;  %v3449_v47 = vrot.slane %v6493_v10, 2  ;;  %4599 = vmatprep.mubr.msk.f32.mxu1 %vm822_vm2, %v3654_v57 }
 0x207   : > { %v3535_v58 = vadd.f32 %v3533_v49, %v3523_v51  ;;  %v3536_v25 = vadd.f32 %v3534_v20, %v3524_v36  ;;  %v3542_v26 = vmul.f32 %v6031_v5, %v3405_v2  ;;  %v3543_v12 = vmul.f32 %v6031_v5, %v3406_v46 }
 0x208   : > { %v3430_v34 = vsel %vm899_vm4, %v3428_v39, %v3429_v44  ;;  %v3432_v53 = vsel %vm899_vm4, %v3429_v44, %v3431_v19  ;;  %v3562_v7 = vmul.f32 %v6038_v48, %v3405_v2  ;;  %v3563_v51 = vmul.f32 %v6038_v48, %v3406_v46  ;;  %v3580_v36 = vld [vmem:[#allocation2 + $0x1a8] sm:$0x3] }
 0x209   : > { %v6511_v18 = vadd.f32 %v3430_v34, %v3415_v8  ;;  %v6513_v56 = vadd.f32 %v3432_v53, %v3416_v22  ;;  %v3548_v32 = vrot.slane %v3542_v26, 1  ;;  %v3549_v55 = vrot.slane %v3543_v12, 1 }
 0x20a   : > { %v6519_v19 = vmul.f32 %v6133_v24, %v3580_v36  ;;  %v6522_v63 = vmul.f32 %v6138_v52, %v3580_v36  ;;  %v3568_v5 = vrot.slane %v3562_v7, 2  ;;  %v3569_v49 = vrot.slane %v3563_v51, 2  ;;  %v3655_v22 = vld [vmem:[#allocation3 + $0x48] sm:$0xff] }
 0x20b   : > { %v1911_v20 = vmin.f32 %v1909_v42, 6.0  ;;  %v1910_v53 = vmax.f32 %v6466_v60, 0.0  ;;  %v3550_v2 = vsel %vm899_vm4, %v3548_v32, %v3549_v55  ;;  %v3552_v48 = vsel %vm899_vm4, %v3549_v55, %v3551_v59  ;;  %v3578_v39 = vld [vmem:[#allocation2 + $0x198] sm:$0xff]  ;;  %4600 = vmatmul.mubr.msk.f32.gmra.mxu1 %vm822_vm2, %v3655_v22 }
 0x20c   : > { %v3604_v46 = vrot.slane %v6519_v19, 1  ;;  %v3624_v8 = vrot.slane %v6522_v63, 2  ;;  %v3579_v44 = vld [vmem:[#allocation2 + $0x1a0] sm:$0xff]  ;;  %v3555_v34 = vadd.f32 %v3550_v2, %v3535_v58  ;;  %v3556_v26 = vadd.f32 %v3552_v48, %v3536_v25 }
 0x20d   : > { %v3570_v12 = vsel %vm920_vm5, %v3568_v5, %v3569_v49  ;;  %v3572_v60 = vsel %vm920_vm5, %v3569_v49, %v3571_v37  ;;  %1914 = vst.msk [vmem:[#allocation3 + $0x50] sm:$0xff] %vm822_vm2, %v1911_v20  ;;  %v3586_v50 = vmul.f32 %v6164_v3, %v3578_v39  ;;  %v3587_v59 = vmul.f32 %v6164_v3, %v3579_v44  ;;  %v4662_v20 = vld [vmem:[%s6888_s4] ss:$0 sm:$0xff] }
 0x20e   : > { %v6540_v42 = vmul.f32 %v6133_v24, %v3578_v39  ;;  %v6543_v58 = vmul.f32 %v6133_v24, %v3579_v44  ;;  %v3575_v25 = vadd.f32 %v3570_v12, %v3555_v34  ;;  %v3576_v57 = vadd.f32 %v3572_v60, %v3556_v26 }
 0x20f   : > { %v6546_v17 = vmul.f32 %v6138_v52, %v3578_v39  ;;  %v6549_v37 = vmul.f32 %v6138_v52, %v3579_v44  ;;  %v1912_v36 = vmin.f32 %v1910_v53, 6.0  ;;  %v2082_v3 = vmax.f32 %v6469_v0, 0.0  ;;  %v7037_v0 = vld [vmem:[#allocation27_spill] sm:$0xff]  ;;  %v7040_v44 = vld [vmem:[#allocation28_spill] sm:$0xff] }
 0x210   : > { %v3601_v7 = vrot.slane %v6540_v42, 1  ;;  %v3602_v51 = vrot.slane %v6543_v58, 1  ;;  %v6554_v32 = vadd.f32 %v3586_v50, %v3575_v25  ;;  %v6556_v55 = vadd.f32 %v3587_v59, %v3576_v57 }
 0x211   : > { %v3621_v24 = vrot.slane %v6546_v17, 2  ;;  %v3622_v5 = vrot.slane %v6549_v37, 2  ;;  %1915 = vst.msk [vmem:[#allocation3 + $0x58] sm:$0xff] %vm822_vm2, %v1912_v36  ;;  %v2084_v49 = vmin.f32 %v2082_v3, 6.0  ;;  %v2083_v52 = vmax.f32 %v6475_v9, 0.0  ;;  %v7047_v36 = vld [vmem:[#allocation29_spill] sm:$0xff] }
 0x212   : > { %v2253_v53 = vadd.f32 %v4662_v20, %v6472_v35  ;;  %v2245_v2 = vadd.f32 %v6482_v21, %v7037_v0  ;;  %v7038_v48 = vrot.slane %v5784_v31, 2  ;;  %v7039_v22 = vrot.slane %v5781_v40, 2 }
 0x213   : > { %v7041_v34 = vrot.slane %v7040_v44, 2  ;;  %v7043_v12 = vrot.slane %v5909_v28, 2  ;;  %v7044_v60 = vrot.slane %v5906_v6, 2  ;;  %v7045_v21 = vrot.slane %v5816_v29, 2  ;;  %2087 = vst.msk [vmem:[#allocation3 + $0x60] sm:$0xff] %vm822_vm2, %v2084_v49  ;;  %v7048_v29 = vld [vmem:[#allocation30_spill] sm:$0xff] }
 0x214   : > { %v2412_v39 = vsel %vm920_vm5, %v7039_v22, %v7038_v48  ;;  %v7042_v26 = vmov %v7038_v48  ;;  %v3656_v59 = vld [vmem:[#allocation3 + $0x50] sm:$0xff]  ;;  %v2085_v25 = vmin.f32 %v2083_v52, 6.0  ;;  %v2255_v57 = vmax.f32 %v2253_v53, 0.0 }
 0x215   : > { %v2414_v9 = vsel %vm920_vm5, %v7042_v26, %v7041_v34  ;;  %v2585_v35 = vsel %vm920_vm5, %v7044_v60, %v7043_v12  ;;  %v7046_v50 = vmov %v7043_v12  ;;  %v2254_v31 = vadd.f32 %v4662_v20, %v2245_v2  ;;  %v6593_v6 = vld [vmem:[%s6888_s4] ss:$0 sm:$0xff]  ;;  %4602 = vmatprep.mubr.msk.f32.mxu1 %vm822_vm2, %v3656_v59 }
 0x216   : > { %v2587_v40 = vsel %vm920_vm5, %v7046_v50, %v7045_v21  ;;  %v2417_v3 = vadd.f32 %v2412_v39, %v7047_v36  ;;  %v2418_v0 = vadd.f32 %v2414_v9, %v7048_v29  ;;  %v2590_v28 = vadd.f32 %v2585_v35, %v5922_v30  ;;  %2088 = vst.msk [vmem:[#allocation3 + $0x68] sm:$0xff] %vm822_vm2, %v2085_v25  ;;  %v7054_v25 = vld [vmem:[#allocation32_spill] sm:$0xff] }
 0x217   : > { %v2591_v48 = vadd.f32 %v2587_v40, %v5924_v45  ;;  %v7049_v49 = vrot.slane %v5989_v27, 2  ;;  %v7050_v52 = vrot.slane %v5985_v11, 2  ;;  %v2257_v2 = vmin.f32 %v2255_v57, 6.0 }
 0x218   : > { %v2256_v22 = vmax.f32 %v2254_v31, 0.0  ;;  %v2426_v39 = vadd.f32 %v4662_v20, %v2417_v3  ;;  %v2427_v34 = vadd.f32 %v4662_v20, %v2418_v0  ;;  %v2599_v26 = vadd.f32 %v6593_v6, %v2590_v28  ;;  %v7056_v3 = vld [vmem:[#allocation33_spill] sm:$0xff] }
 0x219   : > { %v2758_v53 = vsel %vm920_vm5, %v7050_v52, %v7049_v49  ;;  %v2600_v30 = vadd.f32 %v6593_v6, %v2591_v48  ;;  %v7051_v45 = vrot.slane %v5945_v54, 2  ;;  %v7052_v9 = vmov %v7049_v49  ;;  %2260 = vst.msk [vmem:[#allocation3 + $0x70] sm:$0xff] %vm822_vm2, %v2257_v2  ;;  %v7057_v49 = vld [vmem:[#allocation31_spill] sm:$0xff] }
 0x21a   : > { %v2763_v44 = vadd.f32 %v2758_v53, %v6012_v15  ;;  %v2258_v12 = vmin.f32 %v2256_v22, 6.0  ;;  %v2428_v60 = vmax.f32 %v2426_v39, 0.0  ;;  %v3657_v15 = vld [vmem:[#allocation3 + $0x58] sm:$0xff]  ;;  %v2429_v20 = vmax.f32 %v2427_v34, 0.0  ;;  %v3658_v29 = vld [vmem:[#allocation3 + $0x60] sm:$0xff]  ;;  %v7060_v34 = vld [vmem:[#allocation34_spill] sm:$0xff] }
 0x21b   : > { %v2760_v11 = vsel %vm920_vm5, %v7052_v9, %v7051_v45  ;;  %v2601_v50 = vmax.f32 %v2599_v26, 0.0  ;;  %v2602_v40 = vmax.f32 %v2600_v30, 0.0  ;;  %v7053_v59 = vrot.slane %v6096_v13, 2  ;;  %4603 = vmatmul.mubr.msk.f32.gmra.mxu1 %vm822_vm2, %v3657_v15 }
 0x21c   : > { %v2772_v35 = vadd.f32 %v6593_v6, %v2763_v44  ;;  %v2764_v21 = vadd.f32 %v2760_v11, %v6014_v41  ;;  %v7055_v54 = vrot.slane %v7054_v25, 2  ;;  %2261 = vst.msk [vmem:[#allocation3 + $0x78] sm:$0xff] %vm822_vm2, %v2258_v12  ;;  %v2430_v57 = vmin.f32 %v2428_v60, 6.0  ;;  %4605 = vmatprep.mubr.msk.f32.mxu1 %vm822_vm2, %v3658_v29  ;;  %v7063_v11 = vld [vmem:[#allocation35_spill] sm:$0xff] }
 0x21d   : > { %v2431_v0 = vmin.f32 %v2429_v20, 6.0  ;;  %v2603_v28 = vmin.f32 %v2601_v50, 6.0  ;;  %v2604_v48 = vmin.f32 %v2602_v40, 6.0  ;;  %v7058_v52 = vrot.slane %v7057_v49, 2  ;;  %v3659_v30 = vld [vmem:[#allocation3 + $0x68] sm:$0xff] }
 0x21e   : > { %v2931_v27 = vsel %vm920_vm5, %v7055_v54, %v7053_v59  ;;  %v2774_v31 = vmax.f32 %v2772_v35, 0.0  ;;  %v2773_v36 = vadd.f32 %v6593_v6, %v2764_v21  ;;  %v7059_v53 = vmov %v7053_v59  ;;  %2433 = vst.msk [vmem:[#allocation3 + $0x80] sm:$0xff] %vm822_vm2, %v2430_v57 }
 0x21f   : > { %v2936_v41 = vadd.f32 %v2931_v27, %v7056_v3  ;;  %v2933_v2 = vsel %vm920_vm5, %v7059_v53, %v7058_v52  ;;  %2434 = vst.msk [vmem:[#allocation3 + $0x88] sm:$0xff] %vm822_vm2, %v2431_v0  ;;  %2606 = vst.msk [vmem:[#allocation3 + $0x90] sm:$0xff] %vm822_vm2, %v2603_v28  ;;  %v7061_v13 = vrot.slane %v6201_v62, 2  ;;  %v7062_v45 = vrot.slane %v6197_v61, 2  ;;  %4606 = vmatmul.mubr.msk.f32.gmra.mxu1 %vm822_vm2, %v3659_v30 }
 0x220   : > { %v2776_v22 = vmin.f32 %v2774_v31, 6.0  ;;  %v2775_v39 = vmax.f32 %v2773_v36, 0.0  ;;  %v2937_v26 = vadd.f32 %v2933_v2, %v7060_v34  ;;  %2607 = vst.msk [vmem:[#allocation3 + $0x98] sm:$0xff] %vm822_vm2, %v2604_v48  ;;  %v7064_v12 = vrot.slane %v7063_v11, 2  ;;  %v3660_v27 = vld [vmem:[#allocation3 + $0x70] sm:$0xff] }
 0x221   : > { %v2945_v44 = vadd.f32 %v6593_v6, %v2936_v41  ;;  %v3104_v9 = vsel %vm920_vm5, %v7062_v45, %v7061_v13  ;;  %v7065_v60 = vmov %v7061_v13  ;;  %v7066_v21 = vrot.slane %v6360_v1, 2  ;;  %4608 = vmatprep.mubr.msk.f32.mxu1 %vm822_vm2, %v3660_v27 }
 0x222   : > { %v3106_v35 = vsel %vm920_vm5, %v7065_v60, %v7064_v12  ;;  %v7067_v15 = vrot.slane %v6357_v43, 2  ;;  %v7068_v50 = vrot.slane %v6322_v14, 2  ;;  %2779 = vst.msk [vmem:[#allocation3 + $0xa0] sm:$0xff] %vm822_vm2, %v2776_v22  ;;  %v2777_v59 = vmin.f32 %v2775_v39, 6.0  ;;  %v7070_v43 = vld [vmem:[#allocation36_spill] sm:$0xff]  ;;  %v7071_v14 = vld [vmem:[#allocation5_spill] sm:$0xff] }
 0x223   : > { %v7069_v40 = vmov %v7066_v21  ;;  %v2947_v62 = vmax.f32 %v2945_v44, 0.0  ;;  %v2946_v25 = vadd.f32 %v6593_v6, %v2937_v26  ;;  %v3109_v54 = vadd.f32 %v3104_v9, %v6215_v33  ;;  %v3661_v0 = vld [vmem:[#allocation3 + $0x78] sm:$0xff] }
 0x224   : > { %v3277_v20 = vsel %vm920_vm5, %v7067_v15, %v7066_v21  ;;  %v3279_v61 = vsel %vm920_vm5, %v7069_v40, %v7068_v50  ;;  %v3110_v57 = vadd.f32 %v3106_v35, %v7070_v43  ;;  %v3450_v1 = vsel %vm920_vm5, %v3448_v23, %v3449_v47  ;;  %2780 = vst.msk [vmem:[#allocation3 + $0xa8] sm:$0xff] %vm822_vm2, %v2777_v59  ;;  %v4015_v43 = vld [vmem:[%s4757_s10 + $0x8] sm:$0xff] }
 0x225   : > { %v3282_v31 = vadd.f32 %v3277_v20, %v6376_v16  ;;  %v3283_v36 = vadd.f32 %v3279_v61, %v7071_v14  ;;  %v2949_v3 = vmin.f32 %v2947_v62, 6.0  ;;  %v2948_v41 = vmax.f32 %v2946_v25, 0.0  ;;  %4609 = vmatmul.mubr.msk.f32.gmra.mxu1 %vm822_vm2, %v3661_v0  ;;  %v3662_v2 = vld [vmem:[#allocation3 + $0x80] sm:$0xff]  ;;  %v4014_v14 = vld [vmem:[%s4757_s10] sm:$0xff] }
 0x226   : > { %v3118_v33 = vadd.f32 %v6593_v6, %v3109_v54  ;;  %v3455_v29 = vadd.f32 %v3450_v1, %v6511_v18  ;;  %v3119_v16 = vadd.f32 %v6593_v6, %v3110_v57  ;;  %v7072_v4 = vrot.slane %v6396_v38, 2  ;;  %4611 = vmatprep.mubr.msk.f32.mxu1 %vm822_vm2, %v3662_v2  ;;  %v3664_v10 = vld [vmem:[#allocation3 + $0x90] sm:$0xff]  ;;  %v3663_v30 = vld [vmem:[#allocation3 + $0x88] sm:$0xff] }
 0x227   : > { %v3291_v28 = vadd.f32 %v6593_v6, %v3282_v31  ;;  %v3292_v48 = vadd.f32 %v6593_v6, %v3283_v36  ;;  %2952 = vst.msk [vmem:[#allocation3 + $0xb0] sm:$0xff] %vm822_vm2, %v2949_v3  ;;  %v2950_v49 = vmin.f32 %v2948_v41, 6.0  ;;  %v3603_v38 = vsel %vm899_vm4, %v3601_v7, %v3602_v51  ;;  %v6738_v54 = vld [vmem:[%s6890_s6] ss:$0 sm:$0xff] }
 0x228   : > { %v3452_v23 = vsel %vm920_vm5, %v3449_v47, %v7072_v4  ;;  %v3120_v52 = vmax.f32 %v3118_v33, 0.0  ;;  %v3464_v18 = vadd.f32 %v6593_v6, %v3455_v29  ;;  %v3121_v22 = vmax.f32 %v3119_v16, 0.0  ;;  %v4017_v33 = vld [vmem:[%s4757_s10 + $0x18] sm:$0xff]  ;;  %v4016_v16 = vld [vmem:[%s4757_s10 + $0x10] sm:$0xff] }
 0x229   : > { %v3456_v53 = vadd.f32 %v3452_v23, %v6513_v56  ;;  %v3293_v39 = vmax.f32 %v3291_v28, 0.0  ;;  %v3294_v44 = vmax.f32 %v3292_v48, 0.0  ;;  %2953 = vst.msk [vmem:[#allocation3 + $0xb8] sm:$0xff] %vm822_vm2, %v2950_v49  ;;  %v3608_v56 = vadd.f32 %v3603_v38, %v6554_v32  ;;  %4612 = vmatmul.mubr.msk.f32.gmra.mxu1 %vm822_vm2, %v3663_v30  ;;  %v4019_v49 = vld [vmem:[%s4757_s10 + $0x28] sm:$0xff]  ;;  %v4021_v38 = vld [vmem:[%s4757_s10 + $0x38] sm:$0xff] }
 0x22a   : > { %v3122_v47 = vmin.f32 %v3120_v52, 6.0  ;;  %v3466_v34 = vmax.f32 %v3464_v18, 0.0  ;;  %v3123_v13 = vmin.f32 %v3121_v22, 6.0  ;;  %v3623_v42 = vsel %vm920_vm5, %v3621_v24, %v3622_v5  ;;  %4614 = vmatprep.mubr.msk.f32.mxu1 %vm822_vm2, %v3664_v10  ;;  %v3666_v24 = vld [vmem:[#allocation3 + $0xa0] sm:$0xff] }
 0x22b   : > { %v3465_v26 = vadd.f32 %v6593_v6, %v3456_v53  ;;  %v3295_v45 = vmin.f32 %v3293_v39, 6.0  ;;  %v3296_v9 = vmin.f32 %v3294_v44, 6.0  ;;  %v3628_v12 = vadd.f32 %v3623_v42, %v3608_v56  ;;  %v4018_v53 = vld [vmem:[%s4757_s10 + $0x20] sm:$0xff] }
 0x22c   : > { %3125 = vst.msk [vmem:[#allocation3 + $0xc0] sm:$0xff] %vm822_vm2, %v3122_v47  ;;  %v3468_v7 = vmin.f32 %v3466_v34, 6.0  ;;  %v3605_v32 = vsel %vm899_vm4, %v3602_v51, %v3604_v46  ;;  %3126 = vst.msk [vmem:[#allocation3 + $0xc8] sm:$0xff] %vm822_vm2, %v3123_v13  ;;  %v3625_v19 = vsel %vm920_vm5, %v3622_v5, %v3624_v8  ;;  %v3665_v51 = vld [vmem:[#allocation3 + $0x98] sm:$0xff]  ;;  %v3667_v8 = vld [vmem:[#allocation3 + $0xa8] sm:$0xff] }
 0x22d   : > { %v3467_v11 = vmax.f32 %v3465_v26, 0.0  ;;  %3298 = vst.msk [vmem:[#allocation3 + $0xd0] sm:$0xff] %vm822_vm2, %v3295_v45  ;;  %3299 = vst.msk [vmem:[#allocation3 + $0xd8] sm:$0xff] %vm822_vm2, %v3296_v9  ;;  %v3609_v17 = vadd.f32 %v3605_v32, %v6556_v55  ;;  %v3637_v58 = vadd.f32 %v6593_v6, %v3628_v12  ;;  %4615 = vmatmul.mubr.msk.f32.gmra.mxu1 %vm822_vm2, %v3665_v51  ;;  %v4020_v34 = vld [vmem:[%s4757_s10 + $0x30] sm:$0xff]  ;;  %v4023_v45 = vld [vmem:[%s4757_s10 + $0x48] sm:$0xff] }
 0x22e   : > { %3471 = vst.msk [vmem:[#allocation3 + $0xe0] sm:$0xff] %vm822_vm2, %v3468_v7  ;;  %4617 = vmatprep.mubr.msk.f32.mxu1 %vm822_vm2, %v3666_v24  ;;  %v3668_v37 = vld [vmem:[#allocation3 + $0xb0] sm:$0xff] }
 0x22f   : > { %v3469_v46 = vmin.f32 %v3467_v11, 6.0  ;;  %v3629_v60 = vadd.f32 %v3625_v19, %v3609_v17  ;;  %v3639_v35 = vmax.f32 %v3637_v58, 0.0  ;;  %v4022_v7 = vld [vmem:[%s4757_s10 + $0x40] sm:$0xff]  ;;  %v4025_v19 = vld [vmem:[%s4757_s10 + $0x58] sm:$0xff]  ;;  %v4024_v58 = vld [vmem:[%s4757_s10 + $0x50] sm:$0xff] }
 0x230   : > { %v3669_v20 = vld [vmem:[#allocation3 + $0xb8] sm:$0xff] }
 0x231   : > { %3472 = vst.msk [vmem:[#allocation3 + $0xe8] sm:$0xff] %vm822_vm2, %v3469_v46  ;;  %v3638_v63 = vadd.f32 %v6593_v6, %v3629_v60  ;;  %v3641_v55 = vmin.f32 %v3639_v35, 6.0  ;;  %4618 = vmatmul.mubr.msk.f32.gmra.mxu1 %vm822_vm2, %v3667_v8 }
 0x232   : > { %4620 = vmatprep.mubr.msk.f32.mxu1 %vm822_vm2, %v3668_v37 }
 0x233   : > { %v3640_v5 = vmax.f32 %v3638_v63, 0.0  ;;  %3644 = vst.msk [vmem:[#allocation3 + $0xf0] sm:$0xff] %vm822_vm2, %v3641_v55  ;;  %v3670_v15 = vld [vmem:[#allocation3 + $0xc0] sm:$0xff]  ;;  %v3671_v50 = vld [vmem:[#allocation3 + $0xc8] sm:$0xff]  ;;  %v4027_v63 = vld [vmem:[%s4757_s10 + $0x68] sm:$0xff] }
 0x234   : > { %v3672_v6 = vld [vmem:[#allocation3 + $0xd0] sm:$0xff]  ;;  %v3673_v61 = vld [vmem:[#allocation3 + $0xd8] sm:$0xff] }
 0x235   : > { %v3642_v21 = vmin.f32 %v3640_v5, 6.0  ;;  %4621 = vmatmul.mubr.msk.f32.gmra.mxu1 %vm822_vm2, %v3669_v20  ;;  %v3674_v40 = vld [vmem:[#allocation3 + $0xe0] sm:$0xff]  ;;  %v4026_v5 = vld [vmem:[%s4757_s10 + $0x60] sm:$0xff] }
 0x236   : > { %4623 = vmatprep.mubr.msk.f32.mxu1 %vm822_vm2, %v3670_v15 }
 0x237   : > { %3645 = vst.msk [vmem:[#allocation3 + $0xf8] sm:$0xff] %vm822_vm2, %v3642_v21 }
 0x238   : > { %v3675_v62 = vld [vmem:[#allocation3 + $0xe8] sm:$0xff] }
 0x239   : > { %4624 = vmatmul.mubr.msk.f32.gmra.mxu1 %vm822_vm2, %v3671_v50 }
 0x23a   : > { %4626 = vmatprep.mubr.msk.f32.mxu1 %vm822_vm2, %v3672_v6  ;;  %v3676_v59 = vld [vmem:[#allocation3 + $0xf0] sm:$0xff]  ;;  %v4029_v6 = vld [vmem:[%s4757_s10 + $0x78] sm:$0xff] }
 0x23d   : > { %4627 = vmatmul.mubr.msk.f32.gmra.mxu1 %vm822_vm2, %v3673_v61 }
 0x23e   : > { %4629 = vmatprep.mubr.msk.f32.mxu1 %vm822_vm2, %v3674_v40  ;;  %v3677_v25 = vld [vmem:[#allocation3 + $0xf8] sm:$0xff] }
 0x241   : > { %4630 = vmatmul.mubr.msk.f32.gmra.mxu1 %vm822_vm2, %v3675_v62 }
 0x242   : > { %4632 = vmatprep.mubr.msk.f32.mxu1 %vm822_vm2, %v3676_v59  ;;  %v4028_v59 = vld [vmem:[%s4757_s10 + $0x70] sm:$0xff] }
 0x245   : > { %4633 = vmatmul.mubr.msk.f32.gmra.mxu1 %vm822_vm2, %v3677_v25 }
 0x292   : > { %v4589_v27 = vpop.f32.mrf.mxu1 }
 0x293   : > { %v3859_v57 = vadd.f32 %v4589_v27, %v6738_v54 }
 0x294   : > { %v3853_v31 = vpop.f32.mrf.mxu1 }
 0x295   : > { %v4047_v36 = vadd.f32 %v4015_v43, %v3859_v57  ;;  %v3854_v1 = vadd.f32 %v6738_v54, %v3853_v31  ;;  %v4031_v43 = vld [vmem:[%s4757_s10 + $0x88] sm:$0xff] }
 0x297   : > { %4079 = vst.msk [vmem:[%s6747_s29 + $0x8] sm:$0xff] %vm359_vm0, %v4047_v36  ;;  %v4046_v3 = vadd.f32 %v4014_v14, %v3854_v1  ;;  %v4030_v36 = vld [vmem:[%s4757_s10 + $0x80] sm:$0xff] }
 0x299   : > { %4078 = vst.msk [vmem:[%s6747_s29] sm:$0xff] %vm359_vm0, %v4046_v3 }
 0x2a4   : > { %v4592_v41 = vpop.f32.mrf.mxu1 }
 0x2a5   : > { %v3869_v29 = vadd.f32 %v4592_v41, %v6738_v54 }
 0x2a6   : > { %v3863_v0 = vpop.f32.mrf.mxu1 }
 0x2a7   : > { %v4049_v28 = vadd.f32 %v4017_v33, %v3869_v29  ;;  %v3864_v48 = vadd.f32 %v6738_v54, %v3863_v0  ;;  %v4033_v33 = vld [vmem:[%s4757_s10 + $0x98] sm:$0xff] }
 0x2a9   : > { %4081 = vst.msk [vmem:[%s6747_s29 + $0x18] sm:$0xff] %vm359_vm0, %v4049_v28  ;;  %v4048_v4 = vadd.f32 %v4016_v16, %v3864_v48  ;;  %v4032_v28 = vld [vmem:[%s4757_s10 + $0x90] sm:$0xff] }
 0x2ab   : > { %4080 = vst.msk [vmem:[%s6747_s29 + $0x10] sm:$0xff] %vm359_vm0, %v4048_v4 }
 0x2b2   : > { %v4595_v23 = vpop.f32.mrf.mxu1 }
 0x2b3   : > { %v3879_v52 = vadd.f32 %v4595_v23, %v6738_v54 }
 0x2b4   : > { %v3873_v18 = vpop.f32.mrf.mxu1 }
 0x2b5   : > { %v4051_v2 = vadd.f32 %v4019_v49, %v3879_v52  ;;  %v3874_v22 = vadd.f32 %v6738_v54, %v3873_v18  ;;  %v4035_v49 = vld [vmem:[%s4757_s10 + $0xa8] sm:$0xff] }
 0x2b7   : > { %4083 = vst.msk [vmem:[%s6747_s29 + $0x28] sm:$0xff] %vm359_vm0, %v4051_v2  ;;  %v4050_v39 = vadd.f32 %v4018_v53, %v3874_v22  ;;  %v4034_v2 = vld [vmem:[%s4757_s10 + $0xa0] sm:$0xff] }
 0x2b9   : > { %4082 = vst.msk [vmem:[%s6747_s29 + $0x20] sm:$0xff] %vm359_vm0, %v4050_v39 }
 0x2c5   : > { %v4598_v44 = vpop.f32.mrf.mxu1 }
 0x2c6   : > { %v3889_v10 = vadd.f32 %v4598_v44, %v6738_v54 }
 0x2c7   : > { %v3883_v47 = vpop.f32.mrf.mxu1 }
 0x2c8   : > { %v4053_v26 = vadd.f32 %v4021_v38, %v3889_v10  ;;  %v3884_v56 = vadd.f32 %v6738_v54, %v3883_v47  ;;  %v4037_v38 = vld [vmem:[%s4757_s10 + $0xb8] sm:$0xff] }
 0x2ca   : > { %4085 = vst.msk [vmem:[%s6747_s29 + $0x38] sm:$0xff] %vm359_vm0, %v4053_v26  ;;  %v4052_v30 = vadd.f32 %v4020_v34, %v3884_v56  ;;  %v4036_v26 = vld [vmem:[%s4757_s10 + $0xb0] sm:$0xff] }
 0x2cb   : > { %v4601_v13 = vpop.f32.mrf.mxu1 }
 0x2cc   : > { %4084 = vst.msk [vmem:[%s6747_s29 + $0x30] sm:$0xff] %vm359_vm0, %v4052_v30  ;;  %v3899_v9 = vadd.f32 %v4601_v13, %v6738_v54 }
 0x2cd   : > { %v3893_v42 = vpop.f32.mrf.mxu1 }
 0x2ce   : > { %v4055_v11 = vadd.f32 %v4023_v45, %v3899_v9  ;;  %v3894_v12 = vadd.f32 %v6738_v54, %v3893_v42  ;;  %v4039_v45 = vld [vmem:[%s4757_s10 + $0xc8] sm:$0xff] }
 0x2d0   : > { %4087 = vst.msk [vmem:[%s6747_s29 + $0x48] sm:$0xff] %vm359_vm0, %v4055_v11  ;;  %v4054_v32 = vadd.f32 %v4022_v7, %v3894_v12  ;;  %v4038_v11 = vld [vmem:[%s4757_s10 + $0xc0] sm:$0xff] }
 0x2d2   : > { %4086 = vst.msk [vmem:[%s6747_s29 + $0x40] sm:$0xff] %vm359_vm0, %v4054_v32 }
 0x2db   : > { %v4604_v17 = vpop.f32.mrf.mxu1 }
 0x2dc   : > { %v3909_v24 = vadd.f32 %v4604_v17, %v6738_v54 }
 0x2dd   : > { %v3903_v46 = vpop.f32.mrf.mxu1 }
 0x2de   : > { %v4057_v51 = vadd.f32 %v4025_v19, %v3909_v24  ;;  %v3904_v60 = vadd.f32 %v6738_v54, %v3903_v46  ;;  %v4041_v19 = vld [vmem:[%s4757_s10 + $0xd8] sm:$0xff] }
 0x2df   : > { %v4607_v35 = vpop.f32.mrf.mxu1 }
 0x2e0   : > { %4089 = vst.msk [vmem:[%s6747_s29 + $0x58] sm:$0xff] %vm359_vm0, %v4057_v51  ;;  %v4056_v37 = vadd.f32 %v4024_v58, %v3904_v60  ;;  %v3919_v55 = vadd.f32 %v4607_v35, %v6738_v54  ;;  %v4040_v51 = vld [vmem:[%s4757_s10 + $0xd0] sm:$0xff] }
 0x2e1   : > { %v3913_v8 = vpop.f32.mrf.mxu1 }
 0x2e2   : > { %4088 = vst.msk [vmem:[%s6747_s29 + $0x50] sm:$0xff] %vm359_vm0, %v4056_v37  ;;  %v4059_v21 = vadd.f32 %v4027_v63, %v3919_v55  ;;  %v3914_v15 = vadd.f32 %v6738_v54, %v3913_v8  ;;  %v4043_v37 = vld [vmem:[%s4757_s10 + $0xe8] sm:$0xff] }
 0x2e4   : > { %4091 = vst.msk [vmem:[%s6747_s29 + $0x68] sm:$0xff] %vm359_vm0, %v4059_v21  ;;  %v4058_v50 = vadd.f32 %v4026_v5, %v3914_v15  ;;  %v4042_v21 = vld [vmem:[%s4757_s10 + $0xe0] sm:$0xff] }
 0x2e5   : > { %v4610_v20 = vpop.f32.mrf.mxu1 }
 0x2e6   : > { %v3929_v40 = vadd.f32 %v4610_v20, %v6738_v54  ;;  %4090 = vst.msk [vmem:[%s6747_s29 + $0x60] sm:$0xff] %vm359_vm0, %v4058_v50  ;;  %v4045_v50 = vld [vmem:[%s4757_s10 + $0xf8] sm:$0xff] }
 0x2e7   : > { %v3923_v61 = vpop.f32.mrf.mxu1 }
 0x2e8   : > { %v4061_v62 = vadd.f32 %v4029_v6, %v3929_v40  ;;  %v3924_v25 = vadd.f32 %v6738_v54, %v3923_v61 }
 0x2e9   : > { %v4613_v27 = vpop.f32.mrf.mxu1 }
 0x2ea   : > { %4093 = vst.msk [vmem:[%s6747_s29 + $0x78] sm:$0xff] %vm359_vm0, %v4061_v62  ;;  %v4060_v57 = vadd.f32 %v4028_v59, %v3924_v25  ;;  %v3939_v31 = vadd.f32 %v4613_v27, %v6738_v54  ;;  %v4044_v62 = vld [vmem:[%s4757_s10 + $0xf0] sm:$0xff] }
 0x2eb   : > { %v3933_v14 = vpop.f32.mrf.mxu1 }
 0x2ec   : > { %4092 = vst.msk [vmem:[%s6747_s29 + $0x70] sm:$0xff] %vm359_vm0, %v4060_v57  ;;  %v4063_v1 = vadd.f32 %v4031_v43, %v3939_v31  ;;  %v3934_v3 = vadd.f32 %v6738_v54, %v3933_v14 }
 0x2ed   : > { %v4616_v41 = vpop.f32.mrf.mxu1 }
 0x2ee   : > { %4095 = vst.msk [vmem:[%s6747_s29 + $0x88] sm:$0xff] %vm359_vm0, %v4063_v1  ;;  %v4062_v29 = vadd.f32 %v4030_v36, %v3934_v3  ;;  %v3949_v0 = vadd.f32 %v4616_v41, %v6738_v54 }
 0x2ef   : > { %v3943_v16 = vpop.f32.mrf.mxu1 }
 0x2f0   : > { %4094 = vst.msk [vmem:[%s6747_s29 + $0x80] sm:$0xff] %vm359_vm0, %v4062_v29  ;;  %v4065_v48 = vadd.f32 %v4033_v33, %v3949_v0  ;;  %v3944_v4 = vadd.f32 %v6738_v54, %v3943_v16 }
 0x2f1   : > { %v4619_v23 = vpop.f32.mrf.mxu1 }
 0x2f2   : > { %4097 = vst.msk [vmem:[%s6747_s29 + $0x98] sm:$0xff] %vm359_vm0, %v4065_v48  ;;  %v4064_v52 = vadd.f32 %v4032_v28, %v3944_v4  ;;  %v3959_v18 = vadd.f32 %v4619_v23, %v6738_v54 }
 0x2f3   : > { %v3953_v53 = vpop.f32.mrf.mxu1 }
 0x2f4   : > { %4096 = vst.msk [vmem:[%s6747_s29 + $0x90] sm:$0xff] %vm359_vm0, %v4064_v52  ;;  %v4067_v22 = vadd.f32 %v4035_v49, %v3959_v18  ;;  %v3954_v39 = vadd.f32 %v6738_v54, %v3953_v53 }
 0x2f5   : > { %v4622_v44 = vpop.f32.mrf.mxu1 }
 0x2f6   : > { %4099 = vst.msk [vmem:[%s6747_s29 + $0xa8] sm:$0xff] %vm359_vm0, %v4067_v22  ;;  %v4066_v10 = vadd.f32 %v4034_v2, %v3954_v39  ;;  %v3969_v47 = vadd.f32 %v4622_v44, %v6738_v54 }
 0x2f7   : > { %v3963_v34 = vpop.f32.mrf.mxu1 }
 0x2f8   : > { %4098 = vst.msk [vmem:[%s6747_s29 + $0xa0] sm:$0xff] %vm359_vm0, %v4066_v10  ;;  %v4069_v56 = vadd.f32 %v4037_v38, %v3969_v47  ;;  %v3964_v30 = vadd.f32 %v6738_v54, %v3963_v34 }
 0x2f9   : > { %v4625_v13 = vpop.f32.mrf.mxu1 }
 0x2fa   : > { %4101 = vst.msk [vmem:[%s6747_s29 + $0xb8] sm:$0xff] %vm359_vm0, %v4069_v56  ;;  %v4068_v9 = vadd.f32 %v4036_v26, %v3964_v30  ;;  %v3979_v42 = vadd.f32 %v4625_v13, %v6738_v54 }
 0x2fb   : > { %v3973_v7 = vpop.f32.mrf.mxu1 }
 0x2fc   : > { %4100 = vst.msk [vmem:[%s6747_s29 + $0xb0] sm:$0xff] %vm359_vm0, %v4068_v9  ;;  %v4071_v12 = vadd.f32 %v4039_v45, %v3979_v42  ;;  %v3974_v32 = vadd.f32 %v6738_v54, %v3973_v7 }
 0x2fd   : > { %v4628_v17 = vpop.f32.mrf.mxu1 }
 0x2fe   : > { %4103 = vst.msk [vmem:[%s6747_s29 + $0xc8] sm:$0xff] %vm359_vm0, %v4071_v12  ;;  %v4070_v24 = vadd.f32 %v4038_v11, %v3974_v32  ;;  %v3989_v46 = vadd.f32 %v4628_v17, %v6738_v54 }
 0x2ff   : > { %v3983_v58 = vpop.f32.mrf.mxu1 }
 0x300   : > { %4102 = vst.msk [vmem:[%s6747_s29 + $0xc0] sm:$0xff] %vm359_vm0, %v4070_v24  ;;  %v4073_v60 = vadd.f32 %v4041_v19, %v3989_v46  ;;  %v3984_v35 = vadd.f32 %v6738_v54, %v3983_v58 }
 0x301   : > { %v4631_v63 = vpop.f32.mrf.mxu1 }
 0x302   : > { %4105 = vst.msk [vmem:[%s6747_s29 + $0xd8] sm:$0xff] %vm359_vm0, %v4073_v60  ;;  %v4072_v55 = vadd.f32 %v4040_v51, %v3984_v35  ;;  %v3999_v8 = vadd.f32 %v4631_v63, %v6738_v54 }
 0x303   : > { %v3993_v5 = vpop.f32.mrf.mxu1 }
 0x304   : > { %4104 = vst.msk [vmem:[%s6747_s29 + $0xd0] sm:$0xff] %vm359_vm0, %v4072_v55  ;;  %v4075_v15 = vadd.f32 %v4043_v37, %v3999_v8  ;;  %v3994_v20 = vadd.f32 %v6738_v54, %v3993_v5 }
 0x305   : > { %v4634_v6 = vpop.f32.mrf.mxu1 }
 0x306   : > { %4107 = vst.msk [vmem:[%s6747_s29 + $0xe8] sm:$0xff] %vm359_vm0, %v4075_v15  ;;  %v4074_v40 = vadd.f32 %v4042_v21, %v3994_v20  ;;  %v4009_v61 = vadd.f32 %v4634_v6, %v6738_v54 }
 0x307   : > { %v4003_v59 = vpop.f32.mrf.mxu1 }
 0x308   : > { %4106 = vst.msk [vmem:[%s6747_s29 + $0xe0] sm:$0xff] %vm359_vm0, %v4074_v40  ;;  %v4077_v25 = vadd.f32 %v4045_v50, %v4009_v61  ;;  %v4004_v27 = vadd.f32 %v6738_v54, %v4003_v59 }
 0x30a   : > { %4109 = vst.msk [vmem:[%s6747_s29 + $0xf8] sm:$0xff] %vm359_vm0, %v4077_v25  ;;  %v4076_v43 = vadd.f32 %v4044_v62, %v4004_v27 }
 0x30c   : > { %4108 = vst.msk [vmem:[%s6747_s29 + $0xf0] sm:$0xff] %vm359_vm0, %v4076_v43 }
 0x30d PF: > { %s17_s26 = sadd.s32 1, %s4685_s26   ;;  %s7073_s24 = smov %s4681_s25 }
 0x30e   : > { %p14_p5 = scmp.ge.s32.totalorder %s17_s26, 4   ;;  %s7074_s25 = smov %s7076_s27 }
 0x310   :  { %16 = sbr.rel (!%p14_p5) target bundleno = 2 (0x2), region = 123 }

</bundles_post_ra>
